<compile_context>
chip_gen: v7x
topology: tpu7x:2x2x1
jax: 0.10.0
libtpu: 0.0.40
codegen_flags: <defaults>
</compile_context>

<pallas_src>
import functools

import jax
import jax.numpy as jnp
from jax.experimental import pallas as pl
from jax.experimental.pallas import tpu as pltpu

# MXU operand dtype (accumulation is always f32).  Set to jnp.float32 for
# bit-faithful f32 matmuls.
MATMUL_DTYPE = jnp.bfloat16

LN_EPS = 1e-5   # LayerNorm eps (module default)
BN_EPS = 1e-5   # BatchNorm2d eps (module default)


# ----------------------------------------------------------------------------
# in-kernel math helpers (operate on VMEM-resident values, f32)
# ----------------------------------------------------------------------------
def _erf_f32(x):
    # Abramowitz & Stegun 7.1.26, |abs err| < 1.5e-7.
    # TODO(synk): swap for lax.erf if a bit-exact erf-GELU is required.
    ax = jnp.abs(x)
    t = 1.0 / (1.0 + 0.3275911 * ax)
    poly = t * (0.254829592 + t * (-0.284496736 + t * (1.421413741
             + t * (-1.453152027 + t * 1.061405429))))
    y = 1.0 - poly * jnp.exp(-ax * ax)
    return jnp.where(x >= 0.0, y, -y)


def _gelu_exact(x):
    return 0.5 * x * (1.0 + _erf_f32(x * 0.7071067811865476))


def _layernorm_c(x, g, b):
    # LayerNorm over the channel (lane) dim per (batch, position) row; unbiased=False.
    mean = jnp.mean(x, axis=-1, keepdims=True)
    var = jnp.mean(jnp.square(x - mean), axis=-1, keepdims=True)
    return (x - mean) * jax.lax.rsqrt(var + LN_EPS) * g + b


def _mm(a_f32, w):
    # MXU matmul: f32 value cast to MATMUL_DTYPE against a pre-cast weight,
    # accumulated in f32.
    return jnp.dot(a_f32.astype(MATMUL_DTYPE), w,
                   preferred_element_type=jnp.float32)


# ----------------------------------------------------------------------------
# fused kernel: all `depth` layers of  x = MHSA(LN(x)) + x ; x = FFNet(LN(x)) + x
# ----------------------------------------------------------------------------
def _tr_stack_kernel(x_ref,
                     ln1_g_ref, ln1_b_ref,
                     q_dw_w_ref, q_dw_b_ref, q_pw_w_ref,
                     kv_dw_w_ref, kv_dw_b_ref, k_pw_w_ref, v_pw_w_ref,
                     out_w_ref, out_b_ref,
                     ln2_g_ref, ln2_b_ref,
                     ff1_w_ref, ff1_b_ref, ff2_w_ref, ff2_b_ref,
                     o_ref, *, depth, heads, dim_head, k_taps, pad,
                     stride, n, nk, bb, scale):
    rows = bb * n           # batch rows flattened onto sublanes
    rows_k = bb * nk
    x = x_ref[...].astype(jnp.float32)          # (rows, C)
    c = x.shape[-1]

    # ---------------- layer-invariant precomputation (hoisted, done once) --------
    # Row index within each batch element (for depthwise-conv boundary masks).
    if bb == 1:
        pos = jax.lax.broadcasted_iota(jnp.int32, (rows, c), 0)
    else:
        pos = jax.lax.broadcasted_iota(jnp.int32, (bb, n, c), 1).reshape(rows, c)

    # One boundary mask per tap (single compare, sign-specific), shared by both
    # depthwise convs and all layers.
    tap_masks = []
    for kt in range(k_taps):
        off = kt - pad
        if off == 0:
            tap_masks.append(None)
        elif off < 0:
            tap_masks.append(pos >= -off)       # input row i+off >= 0
        else:
            tap_masks.append(pos < n - off)     # input row i+off <  n

    # 0/1 selection implementing the kv-conv stride (block-diagonal across the bb
    # batch rows), generated in-register: no (rows_k x rows) f32 operand DMA'd from
    # HBM and the matmul runs at bf16 MXU rate (exact, since entries are 0/1).
    # TODO(synk): for long sequences replace with a strided sublane slice.
    bsel = jax.lax.broadcasted_iota(jnp.int32, (bb, nk, rows), 0)
    jsel = jax.lax.broadcasted_iota(jnp.int32, (bb, nk, rows), 1)
    isel = jax.lax.broadcasted_iota(jnp.int32, (bb, nk, rows), 2)
    sel = jnp.where(isel == bsel * n + jsel * stride, 1.0, 0.0)
    sel = sel.reshape(rows_k, rows).astype(MATMUL_DTYPE)

    def dwconv(y, taps, bias):
        # 1-D depthwise conv along the (flattened) row dim, stride 1, zero padding
        # `pad`.  Shifted taps are generated in-register with pltpu.roll (XLU);
        # rows that would cross a batch boundary (or the sequence edge) are masked.
        acc = y * taps[pad]                     # centre tap, no mask needed
        for kt in range(k_taps):
            off = kt - pad
            if off == 0:
                continue
            tap = pltpu.roll(y, (-off) % rows, axis=0)
            tap = jnp.where(tap_masks[kt], tap, 0.0)
            acc = acc + tap * taps[kt]
        return acc + bias

    # ------------------------------ layer loop -----------------------------------
    for l in range(depth):
        # -------- x = MHSA(LayerNorm(x)) + x --------
        y = _layernorm_c(x, ln1_g_ref[l], ln1_b_ref[l])

        # to_q / to_kv depthwise convs (BatchNorm eval-scale folded into the taps,
        # BN shift acts as the bias; the convs themselves have bias=False).
        qd = dwconv(y, q_dw_w_ref[l], q_dw_b_ref[l])                 # (rows, C)
        kvd_full = dwconv(y, kv_dw_w_ref[l], kv_dw_b_ref[l])         # (rows, C)
        kvd = jnp.dot(sel, kvd_full.astype(MATMUL_DTYPE),
                      preferred_element_type=jnp.float32)            # (rows_k, C)

        q = _mm(qd, q_pw_w_ref[l])                                   # (rows,  inner)
        kk = _mm(kvd, k_pw_w_ref[l])                                 # (rows_k, inner)
        vv = _mm(kvd, v_pw_w_ref[l])                                 # (rows_k, inner)

        # Per-(batch, head) attention; heads live in contiguous channel slices, so
        # split-heads is a lane slice.  Head outputs are lane-concatenated so the
        # output projection is a single (rows, inner) @ (inner, C) matmul.
        att_rows = []
        for b in range(bb):
            q_b = q[b * n:(b + 1) * n]
            k_b = kk[b * nk:(b + 1) * nk]
            v_b = vv[b * nk:(b + 1) * nk]
            head_out = []
            for h in range(heads):
                sl = slice(h * dim_head, (h + 1) * dim_head)
                qh = q_b[:, sl].astype(MATMUL_DTYPE)
                kh = k_b[:, sl].astype(MATMUL_DTYPE)
                vh = v_b[:, sl].astype(MATMUL_DTYPE)
                dots = jax.lax.dot_general(
                    qh, kh, (((1,), (1,)), ((), ())),
                    preferred_element_type=jnp.float32) * scale      # (n, nk)
                dots = dots - jnp.max(dots, axis=-1, keepdims=True)
                p = jnp.exp(dots)
                p = p * pl.reciprocal(jnp.sum(p, axis=-1, keepdims=True),
                                      approx=True)                   # softmax, f32
                head_out.append(jnp.dot(p.astype(MATMUL_DTYPE), vh,
                                        preferred_element_type=jnp.float32))
            att_rows.append(head_out[0] if heads == 1
                            else jnp.concatenate(head_out, axis=-1))  # (n, inner)
        att = att_rows[0] if bb == 1 else jnp.concatenate(att_rows, axis=0)
        x = _mm(att, out_w_ref[l]) + out_b_ref[l] + x                 # residual 1

        # -------- x = FFNet(LayerNorm(x)) + x --------
        y2 = _layernorm_c(x, ln2_g_ref[l], ln2_b_ref[l])
        z = _mm(y2, ff1_w_ref[l]) + ff1_b_ref[l]
        z = _gelu_exact(z)                                            # exact-GELU, f32
        x = _mm(z, ff2_w_ref[l]) + ff2_b_ref[l] + x                   # residual 2

    o_ref[...] = x.astype(o_ref.dtype)


# ----------------------------------------------------------------------------
# wrappers
# ----------------------------------------------------------------------------
def _const_spec(arr):
    zeros = (0,) * arr.ndim
    return pl.BlockSpec(arr.shape, lambda i, _z=zeros: _z)


def _pick_batch_block(bsz, n):
    # Small batches: one batch per grid step keeps both v7x TensorCores busy
    # ("parallel" grid axis).  Larger batches: pack a few per step to amortize the
    # ~0.35 us per-grid-step overhead and feed the MXU taller operands.
    if bsz <= 4:
        bb = 1
    else:
        bb = next((d for d in (4, 2) if bsz % d == 0), 1)
    if (bb * n) % 8 != 0 and bsz // bb > 1:
        bb = bsz   # fall back to one full-array block (always a legal block shape)
    return bb


def tr_forward(params, x_nchw, cfg):
    """TR.forward on an NCHW tensor (W must be 1, as in gnn_tr.py's usage)."""
    bsz, c, hgt, wdt = x_nchw.shape
    if wdt != 1:
        # TODO(synk): true 2-D depthwise taps for W > 1 not implemented; gnn_tr.py
        # always calls TR on (B, C, H, 1).
        raise NotImplementedError("TR Pallas kernel assumes W == 1")
    n = hgt * wdt
    heads, dim_head = cfg["heads"], cfg["dim_head"]
    inner = heads * dim_head
    k = cfg["proj_kernel"]
    pad = k // 2
    stride = cfg["kv_proj_stride"]
    nk = (n + 2 * pad - k) // stride + 1
    depth = cfg["depth"]
    scale = dim_head ** -0.5
    bb = _pick_batch_block(bsz, n)

    # (B, C, H, W) -> flattened (B*N, C) rows, channels on lanes.
    h = jnp.transpose(x_nchw.reshape(bsz, c, n), (0, 2, 1)).reshape(bsz * n, c)

    md = MATMUL_DTYPE
    layers = params["layers"]

    def stk(name, dtype=jnp.float32):
        return jnp.stack([lp[name] for lp in layers]).astype(dtype)

    weights = [
        stk("ln1_g"), stk("ln1_b"),
        stk("q_dw_w"), stk("q_dw_b"), stk("q_pw_w", md),
        stk("kv_dw_w"), stk("kv_dw_b"),
        # split fused kv pointwise weight into lane-aligned K and V projections
        jnp.stack([lp["kv_pw_w"][:, :inner] for lp in layers]).astype(md),
        jnp.stack([lp["kv_pw_w"][:, inner:] for lp in layers]).astype(md),
        stk("out_w", md), stk("out_b"),
        stk("ln2_g"), stk("ln2_b"),
        stk("ff1_w", md), stk("ff1_b"), stk("ff2_w", md), stk("ff2_b"),
    ]

    kernel = functools.partial(
        _tr_stack_kernel, depth=depth, heads=heads, dim_head=dim_head,
        k_taps=k, pad=pad, stride=stride, n=n, nk=nk, bb=bb, scale=scale)

    out = pl.pallas_call(
        kernel,
        grid=(bsz // bb,),
        in_specs=[pl.BlockSpec((bb * n, c), lambda i: (i, 0))]
                 + [_const_spec(w) for w in weights],
        out_specs=pl.BlockSpec((bb * n, c), lambda i: (i, 0)),
        out_shape=jax.ShapeDtypeStruct((bsz * n, c), jnp.float32),
        compiler_params=pltpu.CompilerParams(
            dimension_semantics=("parallel",)),
    )(h, *weights)

    return jnp.transpose(out.reshape(bsz, n, c), (0, 2, 1)).reshape(bsz, c, hgt, wdt)


# ----------------------------------------------------------------------------
# pure-JAX f32 reference (mirrors the PyTorch module in eval mode)
# ----------------------------------------------------------------------------
def tr_forward_ref(params, x_nchw, cfg):
    heads, dim_head = cfg["heads"], cfg["dim_head"]
    k = cfg["proj_kernel"]
    pad = k // 2
    stride = cfg["kv_proj_stride"]
    inner = heads * dim_head

    def ln(x, g, b):
        mean = jnp.mean(x, axis=-1, keepdims=True)
        var = jnp.mean(jnp.square(x - mean), axis=-1, keepdims=True)
        return (x - mean) / jnp.sqrt(var + LN_EPS) * g + b

    def dwconv(x, w, bias, s):
        xpad = jnp.pad(x, ((0, 0), (pad, pad), (0, 0)))
        nout = (x.shape[1] + 2 * pad - k) // s + 1
        acc = sum(xpad[:, i:i + s * nout:s, :] * w[i] for i in range(k))
        return acc + bias

    bsz, c, hgt, wdt = x_nchw.shape
    h = jnp.transpose(x_nchw.reshape(bsz, c, hgt * wdt), (0, 2, 1))
    for lp in params["layers"]:
        b_, n_, _ = h.shape
        y = ln(h, lp["ln1_g"], lp["ln1_b"])
        qd = dwconv(y, lp["q_dw_w"], lp["q_dw_b"], 1)
        kvd = dwconv(y, lp["kv_dw_w"], lp["kv_dw_b"], stride)
        q = qd @ lp["q_pw_w"]
        kv = kvd @ lp["kv_pw_w"]
        kk, vv = kv[..., :inner], kv[..., inner:]

        def split(t):   # 'b n (h d) -> b h n d'
            return t.reshape(b_, -1, heads, dim_head).transpose(0, 2, 1, 3)

        dots = jnp.einsum("bhid,bhjd->bhij", split(q), split(kk)) * dim_head ** -0.5
        attn = jax.nn.softmax(dots, axis=-1)
        o = jnp.einsum("bhij,bhjd->bhid", attn, split(vv))
        o = o.transpose(0, 2, 1, 3).reshape(b_, n_, inner)
        h = o @ lp["out_w"] + lp["out_b"] + h
        y2 = ln(h, lp["ln2_g"], lp["ln2_b"])
        z = jax.nn.gelu(y2 @ lp["ff1_w"] + lp["ff1_b"], approximate=False)
        h = z @ lp["ff2_w"] + lp["ff2_b"] + h
    return jnp.transpose(h, (0, 2, 1)).reshape(bsz, c, hgt, wdt)


# ----------------------------------------------------------------------------
# params
# ----------------------------------------------------------------------------
def build_params(key, cfg):
    dim, heads, dim_head = cfg["dim"], cfg["heads"], cfg["dim_head"]
    inner = heads * dim_head
    hid = dim * cfg["mlp_mult"]
    k = cfg["proj_kernel"]
    keys = iter(jax.random.split(key, 32 * cfg["depth"] + 8))

    def nrm(shape, s=0.05):
        return s * jax.random.normal(next(keys), shape, dtype=jnp.float32)

    layers = []
    for _ in range(cfg["depth"]):
        # BatchNorm2d in eval mode (running_mean=0, running_var=1 for this synthetic
        # init): scale = gamma/sqrt(var+eps) folds into the depthwise taps, shift =
        # beta becomes the depthwise "bias" (the convs themselves have bias=False).
        q_gamma, q_beta = 1.0 + nrm((dim,)), nrm((dim,))
        kv_gamma, kv_beta = 1.0 + nrm((dim,)), nrm((dim,))
        q_scale = (q_gamma / jnp.sqrt(1.0 + BN_EPS)).reshape(1, 1, dim)
        kv_scale = (kv_gamma / jnp.sqrt(1.0 + BN_EPS)).reshape(1, 1, dim)
        layers.append({
            "ln1_g": 1.0 + nrm((1, dim)), "ln1_b": nrm((1, dim)),
            # middle kernel column (kw = K//2) of Conv2d.weight[c, 0, :, :] (W == 1)
            "q_dw_w": nrm((k, 1, dim)) * q_scale,
            "q_dw_b": q_beta.reshape(1, dim),
            "q_pw_w": nrm((dim, inner)),                     # 1x1 conv, bias=False
            "kv_dw_w": nrm((k, 1, dim)) * kv_scale,
            "kv_dw_b": kv_beta.reshape(1, dim),
            "kv_pw_w": nrm((dim, 2 * inner)),                # bias=False
            "out_w": nrm((inner, dim)), "out_b": nrm((1, dim)),
            "ln2_g": 1.0 + nrm((1, dim)), "ln2_b": nrm((1, dim)),
            "ff1_w": nrm((dim, hid)), "ff1_b": nrm((1, hid)),
            "ff2_w": nrm((hid, dim)), "ff2_b": nrm((1, dim)),
        })
    return {"layers": layers}


if __name__ == "__main__":
    # small-but-representative TR(dim=32, proj_kernel=3, kv_proj_stride=2,
    # depth=2, heads=2, dim_head=16, mlp_mult=4)
    cfg = dict(dim=32, proj_kernel=3, kv_proj_stride=2, depth=2,
               heads=2, dim_head=16, mlp_mult=4)
    B, H, W = 2, 64, 1                        # NCHW input (W == 1, as in gnn_tr.py)

    key = jax.random.PRNGKey(0)
    pkey, xkey = jax.random.split(key)
    params = build_params(pkey, cfg)
    x = jax.random.normal(xkey, (B, cfg["dim"], H, W), dtype=jnp.float32)

    fwd = jax.jit(functools.partial(tr_forward, cfg=cfg))
    y = fwd(params, x)
    jax.block_until_ready(y)

    assert y.shape == (B, cfg["dim"], H, W), y.shape
    assert bool(jnp.all(jnp.isfinite(y)))

    # pure-JAX f32 reference (loose tolerance: MXU operands are bf16, softmax uses
    # the EUP approx reciprocal)
    y_ref = tr_forward_ref(params, x, cfg)
    err = float(jnp.max(jnp.abs(y - y_ref)))
    assert err < 1e-1, f"max abs err vs reference: {err}"
    print("KERNEL_OK")
</pallas_src>

<mosaic_0001>
module attributes {stable_mosaic.version = 11 : i64} {
  func.func @_tr_stack_kernel(%arg0: i32, %arg1: memref<64x32xf32, #tpu.memory_space<vmem>>, %arg2: memref<2x1x32xf32, #tpu.memory_space<vmem>>, %arg3: memref<2x1x32xf32, #tpu.memory_space<vmem>>, %arg4: memref<2x3x1x32xf32, #tpu.memory_space<vmem>>, %arg5: memref<2x1x32xf32, #tpu.memory_space<vmem>>, %arg6: memref<2x32x32xbf16, #tpu.memory_space<vmem>>, %arg7: memref<2x3x1x32xf32, #tpu.memory_space<vmem>>, %arg8: memref<2x1x32xf32, #tpu.memory_space<vmem>>, %arg9: memref<2x32x32xbf16, #tpu.memory_space<vmem>>, %arg10: memref<2x32x32xbf16, #tpu.memory_space<vmem>>, %arg11: memref<2x32x32xbf16, #tpu.memory_space<vmem>>, %arg12: memref<2x1x32xf32, #tpu.memory_space<vmem>>, %arg13: memref<2x1x32xf32, #tpu.memory_space<vmem>>, %arg14: memref<2x1x32xf32, #tpu.memory_space<vmem>>, %arg15: memref<2x32x128xbf16, #tpu.memory_space<vmem>>, %arg16: memref<2x1x128xf32, #tpu.memory_space<vmem>>, %arg17: memref<2x128x32xbf16, #tpu.memory_space<vmem>>, %arg18: memref<2x1x32xf32, #tpu.memory_space<vmem>>, %arg19: memref<64x32xf32, #tpu.memory_space<vmem>>) attributes {dimension_semantics = [#tpu.dimension_semantics<parallel>], iteration_bounds = array<i64: 2>, scalar_prefetch = 0 : i64, scratch_operands = 0 : i64, tpu.core_type = #tpu.core_type<tc>, window_params = [{transform_indices = @transform_0, window_bounds = array<i64: 64, 32>}, {pipeline_mode = #tpu.pipeline_mode<synchronous>, transform_indices = @transform_1, window_bounds = array<i64: 2, 1, 32>}, {pipeline_mode = #tpu.pipeline_mode<synchronous>, transform_indices = @transform_2, window_bounds = array<i64: 2, 1, 32>}, {pipeline_mode = #tpu.pipeline_mode<synchronous>, transform_indices = @transform_3, window_bounds = array<i64: 2, 3, 1, 32>}, {pipeline_mode = #tpu.pipeline_mode<synchronous>, transform_indices = @transform_4, window_bounds = array<i64: 2, 1, 32>}, {pipeline_mode = #tpu.pipeline_mode<synchronous>, transform_indices = @transform_5, window_bounds = array<i64: 2, 32, 32>}, {pipeline_mode = #tpu.pipeline_mode<synchronous>, transform_indices = @transform_6, window_bounds = array<i64: 2, 3, 1, 32>}, {pipeline_mode = #tpu.pipeline_mode<synchronous>, transform_indices = @transform_7, window_bounds = array<i64: 2, 1, 32>}, {pipeline_mode = #tpu.pipeline_mode<synchronous>, transform_indices = @transform_8, window_bounds = array<i64: 2, 32, 32>}, {pipeline_mode = #tpu.pipeline_mode<synchronous>, transform_indices = @transform_9, window_bounds = array<i64: 2, 32, 32>}, {pipeline_mode = #tpu.pipeline_mode<synchronous>, transform_indices = @transform_10, window_bounds = array<i64: 2, 32, 32>}, {pipeline_mode = #tpu.pipeline_mode<synchronous>, transform_indices = @transform_11, window_bounds = array<i64: 2, 1, 32>}, {pipeline_mode = #tpu.pipeline_mode<synchronous>, transform_indices = @transform_12, window_bounds = array<i64: 2, 1, 32>}, {pipeline_mode = #tpu.pipeline_mode<synchronous>, transform_indices = @transform_13, window_bounds = array<i64: 2, 1, 32>}, {pipeline_mode = #tpu.pipeline_mode<synchronous>, transform_indices = @transform_14, window_bounds = array<i64: 2, 32, 128>}, {pipeline_mode = #tpu.pipeline_mode<synchronous>, transform_indices = @transform_15, window_bounds = array<i64: 2, 1, 128>}, {pipeline_mode = #tpu.pipeline_mode<synchronous>, transform_indices = @transform_16, window_bounds = array<i64: 2, 128, 32>}, {pipeline_mode = #tpu.pipeline_mode<synchronous>, transform_indices = @transform_17, window_bounds = array<i64: 2, 1, 32>}, {transform_indices = @transform_18, window_bounds = array<i64: 64, 32>}]} {
    %c0 = arith.constant 0 : index
    %c0_0 = arith.constant 0 : index
    %0 = vector.load %arg1[%c0, %c0_0] : memref<64x32xf32, #tpu.memory_space<vmem>>, vector<64x32xf32>
    %1 = tpu.iota {dimensions = array<i32: 0>} : vector<64x32xi32>
    %c1_i32 = arith.constant 1 : i32
    %2 = vector.broadcast %c1_i32 : i32 to vector<64x32xi32>
    %3 = arith.cmpi sge, %1, %2 : vector<64x32xi32>
    %c63_i32 = arith.constant 63 : i32
    %4 = vector.broadcast %c63_i32 : i32 to vector<64x32xi32>
    %5 = arith.cmpi slt, %1, %4 : vector<64x32xi32>
    %6 = tpu.iota {dimensions = array<i32: 0>} : vector<1x32x64xi32>
    %7 = tpu.iota {dimensions = array<i32: 1>} : vector<1x32x64xi32>
    %8 = tpu.iota {dimensions = array<i32: 2>} : vector<1x32x64xi32>
    %c64_i32 = arith.constant 64 : i32
    %9 = vector.broadcast %c64_i32 : i32 to vector<1x32x64xi32>
    %10 = arith.muli %6, %9 : vector<1x32x64xi32>
    %c2_i32 = arith.constant 2 : i32
    %11 = vector.broadcast %c2_i32 : i32 to vector<1x32x64xi32>
    %12 = arith.muli %7, %11 : vector<1x32x64xi32>
    %13 = arith.addi %10, %12 : vector<1x32x64xi32>
    %14 = arith.cmpi eq, %8, %13 : vector<1x32x64xi32>
    %cst = arith.constant 1.000000e+00 : f32
    %cst_1 = arith.constant 0.000000e+00 : f32
    %15 = vector.broadcast %cst : f32 to vector<1x32x64xf32>
    %16 = vector.broadcast %cst_1 : f32 to vector<1x32x64xf32>
    %17 = arith.select %14, %15, %16 : vector<1x32x64xi1>, vector<1x32x64xf32>
    %18 = vector.shape_cast %17 : vector<1x32x64xf32> to vector<32x64xf32>
    %19 = arith.truncf %18 : vector<32x64xf32> to vector<32x64xbf16>
    %c0_2 = arith.constant 0 : index
    %c0_3 = arith.constant 0 : index
    %c0_4 = arith.constant 0 : index
    %20 = vector.load %arg2[%c0_2, %c0_3, %c0_4] : memref<2x1x32xf32, #tpu.memory_space<vmem>>, vector<1x1x32xf32>
    %21 = vector.shape_cast %20 : vector<1x1x32xf32> to vector<1x32xf32>
    %c0_5 = arith.constant 0 : index
    %c0_6 = arith.constant 0 : index
    %c0_7 = arith.constant 0 : index
    %22 = vector.load %arg3[%c0_5, %c0_6, %c0_7] : memref<2x1x32xf32, #tpu.memory_space<vmem>>, vector<1x1x32xf32>
    %23 = vector.shape_cast %22 : vector<1x1x32xf32> to vector<1x32xf32>
    %cst_8 = arith.constant dense<0.000000e+00> : vector<64xf32>
    %24 = vector.multi_reduction <add>, %0, %cst_8 [1] : vector<64x32xf32> to vector<64xf32>
    %25 = vector.shape_cast %24 : vector<64xf32> to vector<64x1xf32>
    %cst_9 = arith.constant 3.200000e+01 : f32
    %26 = vector.broadcast %cst_9 : f32 to vector<64x1xf32>
    %27 = arith.divf %25, %26 : vector<64x1xf32>
    %28 = vector.broadcast %27 : vector<64x1xf32> to vector<64x32xf32>
    %29 = arith.subf %0, %28 : vector<64x32xf32>
    %30 = arith.mulf %29, %29 : vector<64x32xf32>
    %cst_10 = arith.constant dense<0.000000e+00> : vector<64xf32>
    %31 = vector.multi_reduction <add>, %30, %cst_10 [1] : vector<64x32xf32> to vector<64xf32>
    %32 = vector.shape_cast %31 : vector<64xf32> to vector<64x1xf32>
    %cst_11 = arith.constant 3.200000e+01 : f32
    %33 = vector.broadcast %cst_11 : f32 to vector<64x1xf32>
    %34 = arith.divf %32, %33 : vector<64x1xf32>
    %35 = vector.broadcast %27 : vector<64x1xf32> to vector<64x32xf32>
    %36 = arith.subf %0, %35 : vector<64x32xf32>
    %cst_12 = arith.constant 9.99999974E-6 : f32
    %37 = vector.broadcast %cst_12 : f32 to vector<64x1xf32>
    %38 = arith.addf %34, %37 : vector<64x1xf32>
    %39 = math.rsqrt %38 : vector<64x1xf32>
    %40 = vector.broadcast %39 : vector<64x1xf32> to vector<64x32xf32>
    %41 = arith.mulf %36, %40 : vector<64x32xf32>
    %42 = vector.broadcast %21 : vector<1x32xf32> to vector<64x32xf32>
    %43 = arith.mulf %41, %42 : vector<64x32xf32>
    %44 = vector.broadcast %23 : vector<1x32xf32> to vector<64x32xf32>
    %45 = arith.addf %43, %44 : vector<64x32xf32>
    %c0_13 = arith.constant 0 : index
    %c0_14 = arith.constant 0 : index
    %c0_15 = arith.constant 0 : index
    %c0_16 = arith.constant 0 : index
    %46 = vector.load %arg4[%c0_13, %c0_14, %c0_15, %c0_16] : memref<2x3x1x32xf32, #tpu.memory_space<vmem>>, vector<1x3x1x32xf32>
    %47 = vector.shape_cast %46 : vector<1x3x1x32xf32> to vector<3x1x32xf32>
    %c0_17 = arith.constant 0 : index
    %c0_18 = arith.constant 0 : index
    %c0_19 = arith.constant 0 : index
    %48 = vector.load %arg5[%c0_17, %c0_18, %c0_19] : memref<2x1x32xf32, #tpu.memory_space<vmem>>, vector<1x1x32xf32>
    %49 = vector.shape_cast %48 : vector<1x1x32xf32> to vector<1x32xf32>
    %50 = vector.extract_strided_slice %47 {offsets = [1, 0, 0], sizes = [1, 1, 32], strides = [1, 1, 1]} : vector<3x1x32xf32> to vector<1x1x32xf32>
    %51 = vector.shape_cast %50 : vector<1x1x32xf32> to vector<1x32xf32>
    %52 = vector.broadcast %51 : vector<1x32xf32> to vector<64x32xf32>
    %53 = arith.mulf %45, %52 : vector<64x32xf32>
    %c1_i32_20 = arith.constant 1 : i32
    %54 = tpu.dynamic_rotate %45 by %c1_i32_20 dim 0 : vector<64x32xf32>, i32 -> vector<64x32xf32>
    %cst_21 = arith.constant 0.000000e+00 : f32
    %55 = vector.broadcast %cst_21 : f32 to vector<64x32xf32>
    %56 = arith.select %3, %54, %55 : vector<64x32xi1>, vector<64x32xf32>
    %57 = vector.extract_strided_slice %47 {offsets = [0, 0, 0], sizes = [1, 1, 32], strides = [1, 1, 1]} : vector<3x1x32xf32> to vector<1x1x32xf32>
    %58 = vector.shape_cast %57 : vector<1x1x32xf32> to vector<1x32xf32>
    %59 = vector.broadcast %58 : vector<1x32xf32> to vector<64x32xf32>
    %60 = arith.mulf %56, %59 : vector<64x32xf32>
    %61 = arith.addf %53, %60 : vector<64x32xf32>
    %c63_i32_22 = arith.constant 63 : i32
    %62 = tpu.dynamic_rotate %45 by %c63_i32_22 dim 0 : vector<64x32xf32>, i32 -> vector<64x32xf32>
    %cst_23 = arith.constant 0.000000e+00 : f32
    %63 = vector.broadcast %cst_23 : f32 to vector<64x32xf32>
    %64 = arith.select %5, %62, %63 : vector<64x32xi1>, vector<64x32xf32>
    %65 = vector.extract_strided_slice %47 {offsets = [2, 0, 0], sizes = [1, 1, 32], strides = [1, 1, 1]} : vector<3x1x32xf32> to vector<1x1x32xf32>
    %66 = vector.shape_cast %65 : vector<1x1x32xf32> to vector<1x32xf32>
    %67 = vector.broadcast %66 : vector<1x32xf32> to vector<64x32xf32>
    %68 = arith.mulf %64, %67 : vector<64x32xf32>
    %69 = arith.addf %61, %68 : vector<64x32xf32>
    %70 = vector.broadcast %49 : vector<1x32xf32> to vector<64x32xf32>
    %71 = arith.addf %69, %70 : vector<64x32xf32>
    %c0_24 = arith.constant 0 : index
    %c0_25 = arith.constant 0 : index
    %c0_26 = arith.constant 0 : index
    %c0_27 = arith.constant 0 : index
    %72 = vector.load %arg7[%c0_24, %c0_25, %c0_26, %c0_27] : memref<2x3x1x32xf32, #tpu.memory_space<vmem>>, vector<1x3x1x32xf32>
    %73 = vector.shape_cast %72 : vector<1x3x1x32xf32> to vector<3x1x32xf32>
    %c0_28 = arith.constant 0 : index
    %c0_29 = arith.constant 0 : index
    %c0_30 = arith.constant 0 : index
    %74 = vector.load %arg8[%c0_28, %c0_29, %c0_30] : memref<2x1x32xf32, #tpu.memory_space<vmem>>, vector<1x1x32xf32>
    %75 = vector.shape_cast %74 : vector<1x1x32xf32> to vector<1x32xf32>
    %76 = vector.extract_strided_slice %73 {offsets = [1, 0, 0], sizes = [1, 1, 32], strides = [1, 1, 1]} : vector<3x1x32xf32> to vector<1x1x32xf32>
    %77 = vector.shape_cast %76 : vector<1x1x32xf32> to vector<1x32xf32>
    %78 = vector.broadcast %77 : vector<1x32xf32> to vector<64x32xf32>
    %79 = arith.mulf %45, %78 : vector<64x32xf32>
    %c1_i32_31 = arith.constant 1 : i32
    %80 = tpu.dynamic_rotate %45 by %c1_i32_31 dim 0 : vector<64x32xf32>, i32 -> vector<64x32xf32>
    %cst_32 = arith.constant 0.000000e+00 : f32
    %81 = vector.broadcast %cst_32 : f32 to vector<64x32xf32>
    %82 = arith.select %3, %80, %81 : vector<64x32xi1>, vector<64x32xf32>
    %83 = vector.extract_strided_slice %73 {offsets = [0, 0, 0], sizes = [1, 1, 32], strides = [1, 1, 1]} : vector<3x1x32xf32> to vector<1x1x32xf32>
    %84 = vector.shape_cast %83 : vector<1x1x32xf32> to vector<1x32xf32>
    %85 = vector.broadcast %84 : vector<1x32xf32> to vector<64x32xf32>
    %86 = arith.mulf %82, %85 : vector<64x32xf32>
    %87 = arith.addf %79, %86 : vector<64x32xf32>
    %c63_i32_33 = arith.constant 63 : i32
    %88 = tpu.dynamic_rotate %45 by %c63_i32_33 dim 0 : vector<64x32xf32>, i32 -> vector<64x32xf32>
    %cst_34 = arith.constant 0.000000e+00 : f32
    %89 = vector.broadcast %cst_34 : f32 to vector<64x32xf32>
    %90 = arith.select %5, %88, %89 : vector<64x32xi1>, vector<64x32xf32>
    %91 = vector.extract_strided_slice %73 {offsets = [2, 0, 0], sizes = [1, 1, 32], strides = [1, 1, 1]} : vector<3x1x32xf32> to vector<1x1x32xf32>
    %92 = vector.shape_cast %91 : vector<1x1x32xf32> to vector<1x32xf32>
    %93 = vector.broadcast %92 : vector<1x32xf32> to vector<64x32xf32>
    %94 = arith.mulf %90, %93 : vector<64x32xf32>
    %95 = arith.addf %87, %94 : vector<64x32xf32>
    %96 = vector.broadcast %75 : vector<1x32xf32> to vector<64x32xf32>
    %97 = arith.addf %95, %96 : vector<64x32xf32>
    %98 = arith.truncf %97 : vector<64x32xf32> to vector<64x32xbf16>
    %cst_35 = arith.constant dense<0.000000e+00> : vector<32x32xf32>
    %99 = tpu.matmul %19, %98, %cst_35 {dimension_numbers = #tpu.dot_dimension_numbers<[1], [0], [0], [1], [0, 0, 1, 1], [], []>} : vector<32x64xbf16>, vector<64x32xbf16>, vector<32x32xf32> -> vector<32x32xf32>
    %c0_36 = arith.constant 0 : index
    %c0_37 = arith.constant 0 : index
    %c0_38 = arith.constant 0 : index
    %100 = vector.load %arg6[%c0_36, %c0_37, %c0_38] : memref<2x32x32xbf16, #tpu.memory_space<vmem>>, vector<1x32x32xbf16>
    %101 = vector.shape_cast %100 : vector<1x32x32xbf16> to vector<32x32xbf16>
    %102 = arith.truncf %71 : vector<64x32xf32> to vector<64x32xbf16>
    %cst_39 = arith.constant dense<0.000000e+00> : vector<64x32xf32>
    %103 = tpu.matmul %102, %101, %cst_39 {dimension_numbers = #tpu.dot_dimension_numbers<[1], [0], [0], [1], [0, 0, 1, 1], [], []>} : vector<64x32xbf16>, vector<32x32xbf16>, vector<64x32xf32> -> vector<64x32xf32>
    %c0_40 = arith.constant 0 : index
    %c0_41 = arith.constant 0 : index
    %c0_42 = arith.constant 0 : index
    %104 = vector.load %arg9[%c0_40, %c0_41, %c0_42] : memref<2x32x32xbf16, #tpu.memory_space<vmem>>, vector<1x32x32xbf16>
    %105 = vector.shape_cast %104 : vector<1x32x32xbf16> to vector<32x32xbf16>
    %106 = arith.truncf %99 : vector<32x32xf32> to vector<32x32xbf16>
    %cst_43 = arith.constant dense<0.000000e+00> : vector<32x32xf32>
    %107 = tpu.matmul %106, %105, %cst_43 {dimension_numbers = #tpu.dot_dimension_numbers<[1], [0], [0], [1], [0, 0, 1, 1], [], []>} : vector<32x32xbf16>, vector<32x32xbf16>, vector<32x32xf32> -> vector<32x32xf32>
    %c0_44 = arith.constant 0 : index
    %c0_45 = arith.constant 0 : index
    %c0_46 = arith.constant 0 : index
    %108 = vector.load %arg10[%c0_44, %c0_45, %c0_46] : memref<2x32x32xbf16, #tpu.memory_space<vmem>>, vector<1x32x32xbf16>
    %109 = vector.shape_cast %108 : vector<1x32x32xbf16> to vector<32x32xbf16>
    %110 = arith.truncf %99 : vector<32x32xf32> to vector<32x32xbf16>
    %cst_47 = arith.constant dense<0.000000e+00> : vector<32x32xf32>
    %111 = tpu.matmul %110, %109, %cst_47 {dimension_numbers = #tpu.dot_dimension_numbers<[1], [0], [0], [1], [0, 0, 1, 1], [], []>} : vector<32x32xbf16>, vector<32x32xbf16>, vector<32x32xf32> -> vector<32x32xf32>
    %112 = vector.extract_strided_slice %103 {offsets = [0, 0], sizes = [64, 16], strides = [1, 1]} : vector<64x32xf32> to vector<64x16xf32>
    %113 = arith.truncf %112 : vector<64x16xf32> to vector<64x16xbf16>
    %114 = vector.extract_strided_slice %107 {offsets = [0, 0], sizes = [32, 16], strides = [1, 1]} : vector<32x32xf32> to vector<32x16xf32>
    %115 = arith.truncf %114 : vector<32x16xf32> to vector<32x16xbf16>
    %116 = vector.extract_strided_slice %111 {offsets = [0, 0], sizes = [32, 16], strides = [1, 1]} : vector<32x32xf32> to vector<32x16xf32>
    %117 = arith.truncf %116 : vector<32x16xf32> to vector<32x16xbf16>
    %cst_48 = arith.constant dense<0.000000e+00> : vector<64x32xf32>
    %118 = tpu.matmul %113, %115, %cst_48 {dimension_numbers = #tpu.dot_dimension_numbers<[1], [1], [0], [0], [0, 0, 1, 0], [], []>} : vector<64x16xbf16>, vector<32x16xbf16>, vector<64x32xf32> -> vector<64x32xf32>
    %cst_49 = arith.constant 2.500000e-01 : f32
    %119 = vector.broadcast %cst_49 : f32 to vector<64x32xf32>
    %120 = arith.mulf %118, %119 : vector<64x32xf32>
    %cst_50 = arith.constant dense<0xFF800000> : vector<64xf32>
    %121 = vector.multi_reduction <maximumf>, %120, %cst_50 [1] : vector<64x32xf32> to vector<64xf32>
    %122 = vector.shape_cast %121 : vector<64xf32> to vector<64x1xf32>
    %123 = vector.broadcast %122 : vector<64x1xf32> to vector<64x32xf32>
    %124 = arith.subf %120, %123 : vector<64x32xf32>
    %125 = math.exp %124 : vector<64x32xf32>
    %cst_51 = arith.constant dense<0.000000e+00> : vector<64xf32>
    %126 = vector.multi_reduction <add>, %125, %cst_51 [1] : vector<64x32xf32> to vector<64xf32>
    %127 = vector.shape_cast %126 : vector<64xf32> to vector<64x1xf32>
    %128 = tpu.reciprocal %127 {approx = true} : vector<64x1xf32> -> vector<64x1xf32>
    %129 = vector.broadcast %128 : vector<64x1xf32> to vector<64x32xf32>
    %130 = arith.mulf %125, %129 : vector<64x32xf32>
    %131 = arith.truncf %130 : vector<64x32xf32> to vector<64x32xbf16>
    %cst_52 = arith.constant dense<0.000000e+00> : vector<64x16xf32>
    %132 = tpu.matmul %131, %117, %cst_52 {dimension_numbers = #tpu.dot_dimension_numbers<[1], [0], [0], [1], [0, 0, 1, 1], [], []>} : vector<64x32xbf16>, vector<32x16xbf16>, vector<64x16xf32> -> vector<64x16xf32>
    %133 = vector.extract_strided_slice %103 {offsets = [0, 16], sizes = [64, 16], strides = [1, 1]} : vector<64x32xf32> to vector<64x16xf32>
    %134 = arith.truncf %133 : vector<64x16xf32> to vector<64x16xbf16>
    %135 = vector.extract_strided_slice %107 {offsets = [0, 16], sizes = [32, 16], strides = [1, 1]} : vector<32x32xf32> to vector<32x16xf32>
    %136 = arith.truncf %135 : vector<32x16xf32> to vector<32x16xbf16>
    %137 = vector.extract_strided_slice %111 {offsets = [0, 16], sizes = [32, 16], strides = [1, 1]} : vector<32x32xf32> to vector<32x16xf32>
    %138 = arith.truncf %137 : vector<32x16xf32> to vector<32x16xbf16>
    %cst_53 = arith.constant dense<0.000000e+00> : vector<64x32xf32>
    %139 = tpu.matmul %134, %136, %cst_53 {dimension_numbers = #tpu.dot_dimension_numbers<[1], [1], [0], [0], [0, 0, 1, 0], [], []>} : vector<64x16xbf16>, vector<32x16xbf16>, vector<64x32xf32> -> vector<64x32xf32>
    %cst_54 = arith.constant 2.500000e-01 : f32
    %140 = vector.broadcast %cst_54 : f32 to vector<64x32xf32>
    %141 = arith.mulf %139, %140 : vector<64x32xf32>
    %cst_55 = arith.constant dense<0xFF800000> : vector<64xf32>
    %142 = vector.multi_reduction <maximumf>, %141, %cst_55 [1] : vector<64x32xf32> to vector<64xf32>
    %143 = vector.shape_cast %142 : vector<64xf32> to vector<64x1xf32>
    %144 = vector.broadcast %143 : vector<64x1xf32> to vector<64x32xf32>
    %145 = arith.subf %141, %144 : vector<64x32xf32>
    %146 = math.exp %145 : vector<64x32xf32>
    %cst_56 = arith.constant dense<0.000000e+00> : vector<64xf32>
    %147 = vector.multi_reduction <add>, %146, %cst_56 [1] : vector<64x32xf32> to vector<64xf32>
    %148 = vector.shape_cast %147 : vector<64xf32> to vector<64x1xf32>
    %149 = tpu.reciprocal %148 {approx = true} : vector<64x1xf32> -> vector<64x1xf32>
    %150 = vector.broadcast %149 : vector<64x1xf32> to vector<64x32xf32>
    %151 = arith.mulf %146, %150 : vector<64x32xf32>
    %152 = arith.truncf %151 : vector<64x32xf32> to vector<64x32xbf16>
    %cst_57 = arith.constant dense<0.000000e+00> : vector<64x16xf32>
    %153 = tpu.matmul %152, %138, %cst_57 {dimension_numbers = #tpu.dot_dimension_numbers<[1], [0], [0], [1], [0, 0, 1, 1], [], []>} : vector<64x32xbf16>, vector<32x16xbf16>, vector<64x16xf32> -> vector<64x16xf32>
    %154 = tpu.concatenate %132, %153 in 1 : vector<64x16xf32>, vector<64x16xf32> -> vector<64x32xf32>
    %c0_58 = arith.constant 0 : index
    %c0_59 = arith.constant 0 : index
    %c0_60 = arith.constant 0 : index
    %155 = vector.load %arg11[%c0_58, %c0_59, %c0_60] : memref<2x32x32xbf16, #tpu.memory_space<vmem>>, vector<1x32x32xbf16>
    %156 = vector.shape_cast %155 : vector<1x32x32xbf16> to vector<32x32xbf16>
    %157 = arith.truncf %154 : vector<64x32xf32> to vector<64x32xbf16>
    %cst_61 = arith.constant dense<0.000000e+00> : vector<64x32xf32>
    %158 = tpu.matmul %157, %156, %cst_61 {dimension_numbers = #tpu.dot_dimension_numbers<[1], [0], [0], [1], [0, 0, 1, 1], [], []>} : vector<64x32xbf16>, vector<32x32xbf16>, vector<64x32xf32> -> vector<64x32xf32>
    %c0_62 = arith.constant 0 : index
    %c0_63 = arith.constant 0 : index
    %c0_64 = arith.constant 0 : index
    %159 = vector.load %arg12[%c0_62, %c0_63, %c0_64] : memref<2x1x32xf32, #tpu.memory_space<vmem>>, vector<1x1x32xf32>
    %160 = vector.shape_cast %159 : vector<1x1x32xf32> to vector<1x32xf32>
    %161 = vector.broadcast %160 : vector<1x32xf32> to vector<64x32xf32>
    %162 = arith.addf %158, %161 : vector<64x32xf32>
    %163 = arith.addf %162, %0 : vector<64x32xf32>
    %c0_65 = arith.constant 0 : index
    %c0_66 = arith.constant 0 : index
    %c0_67 = arith.constant 0 : index
    %164 = vector.load %arg13[%c0_65, %c0_66, %c0_67] : memref<2x1x32xf32, #tpu.memory_space<vmem>>, vector<1x1x32xf32>
    %165 = vector.shape_cast %164 : vector<1x1x32xf32> to vector<1x32xf32>
    %c0_68 = arith.constant 0 : index
    %c0_69 = arith.constant 0 : index
    %c0_70 = arith.constant 0 : index
    %166 = vector.load %arg14[%c0_68, %c0_69, %c0_70] : memref<2x1x32xf32, #tpu.memory_space<vmem>>, vector<1x1x32xf32>
    %167 = vector.shape_cast %166 : vector<1x1x32xf32> to vector<1x32xf32>
    %cst_71 = arith.constant dense<0.000000e+00> : vector<64xf32>
    %168 = vector.multi_reduction <add>, %163, %cst_71 [1] : vector<64x32xf32> to vector<64xf32>
    %169 = vector.shape_cast %168 : vector<64xf32> to vector<64x1xf32>
    %cst_72 = arith.constant 3.200000e+01 : f32
    %170 = vector.broadcast %cst_72 : f32 to vector<64x1xf32>
    %171 = arith.divf %169, %170 : vector<64x1xf32>
    %172 = vector.broadcast %171 : vector<64x1xf32> to vector<64x32xf32>
    %173 = arith.subf %163, %172 : vector<64x32xf32>
    %174 = arith.mulf %173, %173 : vector<64x32xf32>
    %cst_73 = arith.constant dense<0.000000e+00> : vector<64xf32>
    %175 = vector.multi_reduction <add>, %174, %cst_73 [1] : vector<64x32xf32> to vector<64xf32>
    %176 = vector.shape_cast %175 : vector<64xf32> to vector<64x1xf32>
    %cst_74 = arith.constant 3.200000e+01 : f32
    %177 = vector.broadcast %cst_74 : f32 to vector<64x1xf32>
    %178 = arith.divf %176, %177 : vector<64x1xf32>
    %179 = vector.broadcast %171 : vector<64x1xf32> to vector<64x32xf32>
    %180 = arith.subf %163, %179 : vector<64x32xf32>
    %cst_75 = arith.constant 9.99999974E-6 : f32
    %181 = vector.broadcast %cst_75 : f32 to vector<64x1xf32>
    %182 = arith.addf %178, %181 : vector<64x1xf32>
    %183 = math.rsqrt %182 : vector<64x1xf32>
    %184 = vector.broadcast %183 : vector<64x1xf32> to vector<64x32xf32>
    %185 = arith.mulf %180, %184 : vector<64x32xf32>
    %186 = vector.broadcast %165 : vector<1x32xf32> to vector<64x32xf32>
    %187 = arith.mulf %185, %186 : vector<64x32xf32>
    %188 = vector.broadcast %167 : vector<1x32xf32> to vector<64x32xf32>
    %189 = arith.addf %187, %188 : vector<64x32xf32>
    %c0_76 = arith.constant 0 : index
    %c0_77 = arith.constant 0 : index
    %c0_78 = arith.constant 0 : index
    %190 = vector.load %arg15[%c0_76, %c0_77, %c0_78] : memref<2x32x128xbf16, #tpu.memory_space<vmem>>, vector<1x32x128xbf16>
    %191 = vector.shape_cast %190 : vector<1x32x128xbf16> to vector<32x128xbf16>
    %192 = arith.truncf %189 : vector<64x32xf32> to vector<64x32xbf16>
    %cst_79 = arith.constant dense<0.000000e+00> : vector<64x128xf32>
    %193 = tpu.matmul %192, %191, %cst_79 {dimension_numbers = #tpu.dot_dimension_numbers<[1], [0], [0], [1], [0, 0, 1, 1], [], []>} : vector<64x32xbf16>, vector<32x128xbf16>, vector<64x128xf32> -> vector<64x128xf32>
    %c0_80 = arith.constant 0 : index
    %c0_81 = arith.constant 0 : index
    %c0_82 = arith.constant 0 : index
    %194 = vector.load %arg16[%c0_80, %c0_81, %c0_82] : memref<2x1x128xf32, #tpu.memory_space<vmem>>, vector<1x1x128xf32>
    %195 = vector.shape_cast %194 : vector<1x1x128xf32> to vector<1x128xf32>
    %196 = vector.broadcast %195 : vector<1x128xf32> to vector<64x128xf32>
    %197 = arith.addf %193, %196 : vector<64x128xf32>
    %cst_83 = arith.constant 5.000000e-01 : f32
    %198 = vector.broadcast %cst_83 : f32 to vector<64x128xf32>
    %199 = arith.mulf %198, %197 : vector<64x128xf32>
    %cst_84 = arith.constant 0.707106769 : f32
    %200 = vector.broadcast %cst_84 : f32 to vector<64x128xf32>
    %201 = arith.mulf %197, %200 : vector<64x128xf32>
    %202 = math.absf %201 : vector<64x128xf32>
    %cst_85 = arith.constant 0.327591091 : f32
    %203 = vector.broadcast %cst_85 : f32 to vector<64x128xf32>
    %204 = arith.mulf %203, %202 : vector<64x128xf32>
    %cst_86 = arith.constant 1.000000e+00 : f32
    %205 = vector.broadcast %cst_86 : f32 to vector<64x128xf32>
    %206 = arith.addf %205, %204 : vector<64x128xf32>
    %cst_87 = arith.constant 1.000000e+00 : f32
    %207 = vector.broadcast %cst_87 : f32 to vector<64x128xf32>
    %208 = arith.divf %207, %206 : vector<64x128xf32>
    %cst_88 = arith.constant 1.06140542 : f32
    %209 = vector.broadcast %cst_88 : f32 to vector<64x128xf32>
    %210 = arith.mulf %208, %209 : vector<64x128xf32>
    %cst_89 = arith.constant -1.45315206 : f32
    %211 = vector.broadcast %cst_89 : f32 to vector<64x128xf32>
    %212 = arith.addf %211, %210 : vector<64x128xf32>
    %213 = arith.mulf %208, %212 : vector<64x128xf32>
    %cst_90 = arith.constant 1.42141378 : f32
    %214 = vector.broadcast %cst_90 : f32 to vector<64x128xf32>
    %215 = arith.addf %214, %213 : vector<64x128xf32>
    %216 = arith.mulf %208, %215 : vector<64x128xf32>
    %cst_91 = arith.constant -0.284496725 : f32
    %217 = vector.broadcast %cst_91 : f32 to vector<64x128xf32>
    %218 = arith.addf %217, %216 : vector<64x128xf32>
    %219 = arith.mulf %208, %218 : vector<64x128xf32>
    %cst_92 = arith.constant 0.254829586 : f32
    %220 = vector.broadcast %cst_92 : f32 to vector<64x128xf32>
    %221 = arith.addf %220, %219 : vector<64x128xf32>
    %222 = arith.mulf %208, %221 : vector<64x128xf32>
    %cst_93 = arith.constant 0.000000e+00 : f32
    %223 = vector.broadcast %cst_93 : f32 to vector<64x128xf32>
    %224 = arith.subf %223, %202 : vector<64x128xf32>
    %225 = arith.mulf %224, %202 : vector<64x128xf32>
    %226 = math.exp %225 : vector<64x128xf32>
    %227 = arith.mulf %222, %226 : vector<64x128xf32>
    %cst_94 = arith.constant 1.000000e+00 : f32
    %228 = vector.broadcast %cst_94 : f32 to vector<64x128xf32>
    %229 = arith.subf %228, %227 : vector<64x128xf32>
    %cst_95 = arith.constant 0.000000e+00 : f32
    %230 = vector.broadcast %cst_95 : f32 to vector<64x128xf32>
    %231 = arith.cmpf oge, %201, %230 : vector<64x128xf32>
    %cst_96 = arith.constant 0.000000e+00 : f32
    %232 = vector.broadcast %cst_96 : f32 to vector<64x128xf32>
    %233 = arith.subf %232, %229 : vector<64x128xf32>
    %234 = arith.select %231, %229, %233 : vector<64x128xi1>, vector<64x128xf32>
    %cst_97 = arith.constant 1.000000e+00 : f32
    %235 = vector.broadcast %cst_97 : f32 to vector<64x128xf32>
    %236 = arith.addf %235, %234 : vector<64x128xf32>
    %237 = arith.mulf %199, %236 : vector<64x128xf32>
    %c0_98 = arith.constant 0 : index
    %c0_99 = arith.constant 0 : index
    %c0_100 = arith.constant 0 : index
    %238 = vector.load %arg17[%c0_98, %c0_99, %c0_100] : memref<2x128x32xbf16, #tpu.memory_space<vmem>>, vector<1x128x32xbf16>
    %239 = vector.shape_cast %238 : vector<1x128x32xbf16> to vector<128x32xbf16>
    %240 = arith.truncf %237 : vector<64x128xf32> to vector<64x128xbf16>
    %cst_101 = arith.constant dense<0.000000e+00> : vector<64x32xf32>
    %241 = tpu.matmul %240, %239, %cst_101 {dimension_numbers = #tpu.dot_dimension_numbers<[1], [0], [0], [1], [0, 0, 1, 1], [], []>} : vector<64x128xbf16>, vector<128x32xbf16>, vector<64x32xf32> -> vector<64x32xf32>
    %c0_102 = arith.constant 0 : index
    %c0_103 = arith.constant 0 : index
    %c0_104 = arith.constant 0 : index
    %242 = vector.load %arg18[%c0_102, %c0_103, %c0_104] : memref<2x1x32xf32, #tpu.memory_space<vmem>>, vector<1x1x32xf32>
    %243 = vector.shape_cast %242 : vector<1x1x32xf32> to vector<1x32xf32>
    %244 = vector.broadcast %243 : vector<1x32xf32> to vector<64x32xf32>
    %245 = arith.addf %241, %244 : vector<64x32xf32>
    %246 = arith.addf %245, %163 : vector<64x32xf32>
    %c1 = arith.constant 1 : index
    %c0_105 = arith.constant 0 : index
    %c0_106 = arith.constant 0 : index
    %247 = vector.load %arg2[%c1, %c0_105, %c0_106] : memref<2x1x32xf32, #tpu.memory_space<vmem>>, vector<1x1x32xf32>
    %248 = vector.shape_cast %247 : vector<1x1x32xf32> to vector<1x32xf32>
    %c1_107 = arith.constant 1 : index
    %c0_108 = arith.constant 0 : index
    %c0_109 = arith.constant 0 : index
    %249 = vector.load %arg3[%c1_107, %c0_108, %c0_109] : memref<2x1x32xf32, #tpu.memory_space<vmem>>, vector<1x1x32xf32>
    %250 = vector.shape_cast %249 : vector<1x1x32xf32> to vector<1x32xf32>
    %cst_110 = arith.constant dense<0.000000e+00> : vector<64xf32>
    %251 = vector.multi_reduction <add>, %246, %cst_110 [1] : vector<64x32xf32> to vector<64xf32>
    %252 = vector.shape_cast %251 : vector<64xf32> to vector<64x1xf32>
    %cst_111 = arith.constant 3.200000e+01 : f32
    %253 = vector.broadcast %cst_111 : f32 to vector<64x1xf32>
    %254 = arith.divf %252, %253 : vector<64x1xf32>
    %255 = vector.broadcast %254 : vector<64x1xf32> to vector<64x32xf32>
    %256 = arith.subf %246, %255 : vector<64x32xf32>
    %257 = arith.mulf %256, %256 : vector<64x32xf32>
    %cst_112 = arith.constant dense<0.000000e+00> : vector<64xf32>
    %258 = vector.multi_reduction <add>, %257, %cst_112 [1] : vector<64x32xf32> to vector<64xf32>
    %259 = vector.shape_cast %258 : vector<64xf32> to vector<64x1xf32>
    %cst_113 = arith.constant 3.200000e+01 : f32
    %260 = vector.broadcast %cst_113 : f32 to vector<64x1xf32>
    %261 = arith.divf %259, %260 : vector<64x1xf32>
    %262 = vector.broadcast %254 : vector<64x1xf32> to vector<64x32xf32>
    %263 = arith.subf %246, %262 : vector<64x32xf32>
    %cst_114 = arith.constant 9.99999974E-6 : f32
    %264 = vector.broadcast %cst_114 : f32 to vector<64x1xf32>
    %265 = arith.addf %261, %264 : vector<64x1xf32>
    %266 = math.rsqrt %265 : vector<64x1xf32>
    %267 = vector.broadcast %266 : vector<64x1xf32> to vector<64x32xf32>
    %268 = arith.mulf %263, %267 : vector<64x32xf32>
    %269 = vector.broadcast %248 : vector<1x32xf32> to vector<64x32xf32>
    %270 = arith.mulf %268, %269 : vector<64x32xf32>
    %271 = vector.broadcast %250 : vector<1x32xf32> to vector<64x32xf32>
    %272 = arith.addf %270, %271 : vector<64x32xf32>
    %c1_115 = arith.constant 1 : index
    %c0_116 = arith.constant 0 : index
    %c0_117 = arith.constant 0 : index
    %c0_118 = arith.constant 0 : index
    %273 = vector.load %arg4[%c1_115, %c0_116, %c0_117, %c0_118] : memref<2x3x1x32xf32, #tpu.memory_space<vmem>>, vector<1x3x1x32xf32>
    %274 = vector.shape_cast %273 : vector<1x3x1x32xf32> to vector<3x1x32xf32>
    %c1_119 = arith.constant 1 : index
    %c0_120 = arith.constant 0 : index
    %c0_121 = arith.constant 0 : index
    %275 = vector.load %arg5[%c1_119, %c0_120, %c0_121] : memref<2x1x32xf32, #tpu.memory_space<vmem>>, vector<1x1x32xf32>
    %276 = vector.shape_cast %275 : vector<1x1x32xf32> to vector<1x32xf32>
    %277 = vector.extract_strided_slice %274 {offsets = [1, 0, 0], sizes = [1, 1, 32], strides = [1, 1, 1]} : vector<3x1x32xf32> to vector<1x1x32xf32>
    %278 = vector.shape_cast %277 : vector<1x1x32xf32> to vector<1x32xf32>
    %279 = vector.broadcast %278 : vector<1x32xf32> to vector<64x32xf32>
    %280 = arith.mulf %272, %279 : vector<64x32xf32>
    %c1_i32_122 = arith.constant 1 : i32
    %281 = tpu.dynamic_rotate %272 by %c1_i32_122 dim 0 : vector<64x32xf32>, i32 -> vector<64x32xf32>
    %cst_123 = arith.constant 0.000000e+00 : f32
    %282 = vector.broadcast %cst_123 : f32 to vector<64x32xf32>
    %283 = arith.select %3, %281, %282 : vector<64x32xi1>, vector<64x32xf32>
    %284 = vector.extract_strided_slice %274 {offsets = [0, 0, 0], sizes = [1, 1, 32], strides = [1, 1, 1]} : vector<3x1x32xf32> to vector<1x1x32xf32>
    %285 = vector.shape_cast %284 : vector<1x1x32xf32> to vector<1x32xf32>
    %286 = vector.broadcast %285 : vector<1x32xf32> to vector<64x32xf32>
    %287 = arith.mulf %283, %286 : vector<64x32xf32>
    %288 = arith.addf %280, %287 : vector<64x32xf32>
    %c63_i32_124 = arith.constant 63 : i32
    %289 = tpu.dynamic_rotate %272 by %c63_i32_124 dim 0 : vector<64x32xf32>, i32 -> vector<64x32xf32>
    %cst_125 = arith.constant 0.000000e+00 : f32
    %290 = vector.broadcast %cst_125 : f32 to vector<64x32xf32>
    %291 = arith.select %5, %289, %290 : vector<64x32xi1>, vector<64x32xf32>
    %292 = vector.extract_strided_slice %274 {offsets = [2, 0, 0], sizes = [1, 1, 32], strides = [1, 1, 1]} : vector<3x1x32xf32> to vector<1x1x32xf32>
    %293 = vector.shape_cast %292 : vector<1x1x32xf32> to vector<1x32xf32>
    %294 = vector.broadcast %293 : vector<1x32xf32> to vector<64x32xf32>
    %295 = arith.mulf %291, %294 : vector<64x32xf32>
    %296 = arith.addf %288, %295 : vector<64x32xf32>
    %297 = vector.broadcast %276 : vector<1x32xf32> to vector<64x32xf32>
    %298 = arith.addf %296, %297 : vector<64x32xf32>
    %c1_126 = arith.constant 1 : index
    %c0_127 = arith.constant 0 : index
    %c0_128 = arith.constant 0 : index
    %c0_129 = arith.constant 0 : index
    %299 = vector.load %arg7[%c1_126, %c0_127, %c0_128, %c0_129] : memref<2x3x1x32xf32, #tpu.memory_space<vmem>>, vector<1x3x1x32xf32>
    %300 = vector.shape_cast %299 : vector<1x3x1x32xf32> to vector<3x1x32xf32>
    %c1_130 = arith.constant 1 : index
    %c0_131 = arith.constant 0 : index
    %c0_132 = arith.constant 0 : index
    %301 = vector.load %arg8[%c1_130, %c0_131, %c0_132] : memref<2x1x32xf32, #tpu.memory_space<vmem>>, vector<1x1x32xf32>
    %302 = vector.shape_cast %301 : vector<1x1x32xf32> to vector<1x32xf32>
    %303 = vector.extract_strided_slice %300 {offsets = [1, 0, 0], sizes = [1, 1, 32], strides = [1, 1, 1]} : vector<3x1x32xf32> to vector<1x1x32xf32>
    %304 = vector.shape_cast %303 : vector<1x1x32xf32> to vector<1x32xf32>
    %305 = vector.broadcast %304 : vector<1x32xf32> to vector<64x32xf32>
    %306 = arith.mulf %272, %305 : vector<64x32xf32>
    %c1_i32_133 = arith.constant 1 : i32
    %307 = tpu.dynamic_rotate %272 by %c1_i32_133 dim 0 : vector<64x32xf32>, i32 -> vector<64x32xf32>
    %cst_134 = arith.constant 0.000000e+00 : f32
    %308 = vector.broadcast %cst_134 : f32 to vector<64x32xf32>
    %309 = arith.select %3, %307, %308 : vector<64x32xi1>, vector<64x32xf32>
    %310 = vector.extract_strided_slice %300 {offsets = [0, 0, 0], sizes = [1, 1, 32], strides = [1, 1, 1]} : vector<3x1x32xf32> to vector<1x1x32xf32>
    %311 = vector.shape_cast %310 : vector<1x1x32xf32> to vector<1x32xf32>
    %312 = vector.broadcast %311 : vector<1x32xf32> to vector<64x32xf32>
    %313 = arith.mulf %309, %312 : vector<64x32xf32>
    %314 = arith.addf %306, %313 : vector<64x32xf32>
    %c63_i32_135 = arith.constant 63 : i32
    %315 = tpu.dynamic_rotate %272 by %c63_i32_135 dim 0 : vector<64x32xf32>, i32 -> vector<64x32xf32>
    %cst_136 = arith.constant 0.000000e+00 : f32
    %316 = vector.broadcast %cst_136 : f32 to vector<64x32xf32>
    %317 = arith.select %5, %315, %316 : vector<64x32xi1>, vector<64x32xf32>
    %318 = vector.extract_strided_slice %300 {offsets = [2, 0, 0], sizes = [1, 1, 32], strides = [1, 1, 1]} : vector<3x1x32xf32> to vector<1x1x32xf32>
    %319 = vector.shape_cast %318 : vector<1x1x32xf32> to vector<1x32xf32>
    %320 = vector.broadcast %319 : vector<1x32xf32> to vector<64x32xf32>
    %321 = arith.mulf %317, %320 : vector<64x32xf32>
    %322 = arith.addf %314, %321 : vector<64x32xf32>
    %323 = vector.broadcast %302 : vector<1x32xf32> to vector<64x32xf32>
    %324 = arith.addf %322, %323 : vector<64x32xf32>
    %325 = arith.truncf %324 : vector<64x32xf32> to vector<64x32xbf16>
    %cst_137 = arith.constant dense<0.000000e+00> : vector<32x32xf32>
    %326 = tpu.matmul %19, %325, %cst_137 {dimension_numbers = #tpu.dot_dimension_numbers<[1], [0], [0], [1], [0, 0, 1, 1], [], []>} : vector<32x64xbf16>, vector<64x32xbf16>, vector<32x32xf32> -> vector<32x32xf32>
    %c1_138 = arith.constant 1 : index
    %c0_139 = arith.constant 0 : index
    %c0_140 = arith.constant 0 : index
    %327 = vector.load %arg6[%c1_138, %c0_139, %c0_140] : memref<2x32x32xbf16, #tpu.memory_space<vmem>>, vector<1x32x32xbf16>
    %328 = vector.shape_cast %327 : vector<1x32x32xbf16> to vector<32x32xbf16>
    %329 = arith.truncf %298 : vector<64x32xf32> to vector<64x32xbf16>
    %cst_141 = arith.constant dense<0.000000e+00> : vector<64x32xf32>
    %330 = tpu.matmul %329, %328, %cst_141 {dimension_numbers = #tpu.dot_dimension_numbers<[1], [0], [0], [1], [0, 0, 1, 1], [], []>} : vector<64x32xbf16>, vector<32x32xbf16>, vector<64x32xf32> -> vector<64x32xf32>
    %c1_142 = arith.constant 1 : index
    %c0_143 = arith.constant 0 : index
    %c0_144 = arith.constant 0 : index
    %331 = vector.load %arg9[%c1_142, %c0_143, %c0_144] : memref<2x32x32xbf16, #tpu.memory_space<vmem>>, vector<1x32x32xbf16>
    %332 = vector.shape_cast %331 : vector<1x32x32xbf16> to vector<32x32xbf16>
    %333 = arith.truncf %326 : vector<32x32xf32> to vector<32x32xbf16>
    %cst_145 = arith.constant dense<0.000000e+00> : vector<32x32xf32>
    %334 = tpu.matmul %333, %332, %cst_145 {dimension_numbers = #tpu.dot_dimension_numbers<[1], [0], [0], [1], [0, 0, 1, 1], [], []>} : vector<32x32xbf16>, vector<32x32xbf16>, vector<32x32xf32> -> vector<32x32xf32>
    %c1_146 = arith.constant 1 : index
    %c0_147 = arith.constant 0 : index
    %c0_148 = arith.constant 0 : index
    %335 = vector.load %arg10[%c1_146, %c0_147, %c0_148] : memref<2x32x32xbf16, #tpu.memory_space<vmem>>, vector<1x32x32xbf16>
    %336 = vector.shape_cast %335 : vector<1x32x32xbf16> to vector<32x32xbf16>
    %337 = arith.truncf %326 : vector<32x32xf32> to vector<32x32xbf16>
    %cst_149 = arith.constant dense<0.000000e+00> : vector<32x32xf32>
    %338 = tpu.matmul %337, %336, %cst_149 {dimension_numbers = #tpu.dot_dimension_numbers<[1], [0], [0], [1], [0, 0, 1, 1], [], []>} : vector<32x32xbf16>, vector<32x32xbf16>, vector<32x32xf32> -> vector<32x32xf32>
    %339 = vector.extract_strided_slice %330 {offsets = [0, 0], sizes = [64, 16], strides = [1, 1]} : vector<64x32xf32> to vector<64x16xf32>
    %340 = arith.truncf %339 : vector<64x16xf32> to vector<64x16xbf16>
    %341 = vector.extract_strided_slice %334 {offsets = [0, 0], sizes = [32, 16], strides = [1, 1]} : vector<32x32xf32> to vector<32x16xf32>
    %342 = arith.truncf %341 : vector<32x16xf32> to vector<32x16xbf16>
    %343 = vector.extract_strided_slice %338 {offsets = [0, 0], sizes = [32, 16], strides = [1, 1]} : vector<32x32xf32> to vector<32x16xf32>
    %344 = arith.truncf %343 : vector<32x16xf32> to vector<32x16xbf16>
    %cst_150 = arith.constant dense<0.000000e+00> : vector<64x32xf32>
    %345 = tpu.matmul %340, %342, %cst_150 {dimension_numbers = #tpu.dot_dimension_numbers<[1], [1], [0], [0], [0, 0, 1, 0], [], []>} : vector<64x16xbf16>, vector<32x16xbf16>, vector<64x32xf32> -> vector<64x32xf32>
    %cst_151 = arith.constant 2.500000e-01 : f32
    %346 = vector.broadcast %cst_151 : f32 to vector<64x32xf32>
    %347 = arith.mulf %345, %346 : vector<64x32xf32>
    %cst_152 = arith.constant dense<0xFF800000> : vector<64xf32>
    %348 = vector.multi_reduction <maximumf>, %347, %cst_152 [1] : vector<64x32xf32> to vector<64xf32>
    %349 = vector.shape_cast %348 : vector<64xf32> to vector<64x1xf32>
    %350 = vector.broadcast %349 : vector<64x1xf32> to vector<64x32xf32>
    %351 = arith.subf %347, %350 : vector<64x32xf32>
    %352 = math.exp %351 : vector<64x32xf32>
    %cst_153 = arith.constant dense<0.000000e+00> : vector<64xf32>
    %353 = vector.multi_reduction <add>, %352, %cst_153 [1] : vector<64x32xf32> to vector<64xf32>
    %354 = vector.shape_cast %353 : vector<64xf32> to vector<64x1xf32>
    %355 = tpu.reciprocal %354 {approx = true} : vector<64x1xf32> -> vector<64x1xf32>
    %356 = vector.broadcast %355 : vector<64x1xf32> to vector<64x32xf32>
    %357 = arith.mulf %352, %356 : vector<64x32xf32>
    %358 = arith.truncf %357 : vector<64x32xf32> to vector<64x32xbf16>
    %cst_154 = arith.constant dense<0.000000e+00> : vector<64x16xf32>
    %359 = tpu.matmul %358, %344, %cst_154 {dimension_numbers = #tpu.dot_dimension_numbers<[1], [0], [0], [1], [0, 0, 1, 1], [], []>} : vector<64x32xbf16>, vector<32x16xbf16>, vector<64x16xf32> -> vector<64x16xf32>
    %360 = vector.extract_strided_slice %330 {offsets = [0, 16], sizes = [64, 16], strides = [1, 1]} : vector<64x32xf32> to vector<64x16xf32>
    %361 = arith.truncf %360 : vector<64x16xf32> to vector<64x16xbf16>
    %362 = vector.extract_strided_slice %334 {offsets = [0, 16], sizes = [32, 16], strides = [1, 1]} : vector<32x32xf32> to vector<32x16xf32>
    %363 = arith.truncf %362 : vector<32x16xf32> to vector<32x16xbf16>
    %364 = vector.extract_strided_slice %338 {offsets = [0, 16], sizes = [32, 16], strides = [1, 1]} : vector<32x32xf32> to vector<32x16xf32>
    %365 = arith.truncf %364 : vector<32x16xf32> to vector<32x16xbf16>
    %cst_155 = arith.constant dense<0.000000e+00> : vector<64x32xf32>
    %366 = tpu.matmul %361, %363, %cst_155 {dimension_numbers = #tpu.dot_dimension_numbers<[1], [1], [0], [0], [0, 0, 1, 0], [], []>} : vector<64x16xbf16>, vector<32x16xbf16>, vector<64x32xf32> -> vector<64x32xf32>
    %cst_156 = arith.constant 2.500000e-01 : f32
    %367 = vector.broadcast %cst_156 : f32 to vector<64x32xf32>
    %368 = arith.mulf %366, %367 : vector<64x32xf32>
    %cst_157 = arith.constant dense<0xFF800000> : vector<64xf32>
    %369 = vector.multi_reduction <maximumf>, %368, %cst_157 [1] : vector<64x32xf32> to vector<64xf32>
    %370 = vector.shape_cast %369 : vector<64xf32> to vector<64x1xf32>
    %371 = vector.broadcast %370 : vector<64x1xf32> to vector<64x32xf32>
    %372 = arith.subf %368, %371 : vector<64x32xf32>
    %373 = math.exp %372 : vector<64x32xf32>
    %cst_158 = arith.constant dense<0.000000e+00> : vector<64xf32>
    %374 = vector.multi_reduction <add>, %373, %cst_158 [1] : vector<64x32xf32> to vector<64xf32>
    %375 = vector.shape_cast %374 : vector<64xf32> to vector<64x1xf32>
    %376 = tpu.reciprocal %375 {approx = true} : vector<64x1xf32> -> vector<64x1xf32>
    %377 = vector.broadcast %376 : vector<64x1xf32> to vector<64x32xf32>
    %378 = arith.mulf %373, %377 : vector<64x32xf32>
    %379 = arith.truncf %378 : vector<64x32xf32> to vector<64x32xbf16>
    %cst_159 = arith.constant dense<0.000000e+00> : vector<64x16xf32>
    %380 = tpu.matmul %379, %365, %cst_159 {dimension_numbers = #tpu.dot_dimension_numbers<[1], [0], [0], [1], [0, 0, 1, 1], [], []>} : vector<64x32xbf16>, vector<32x16xbf16>, vector<64x16xf32> -> vector<64x16xf32>
    %381 = tpu.concatenate %359, %380 in 1 : vector<64x16xf32>, vector<64x16xf32> -> vector<64x32xf32>
    %c1_160 = arith.constant 1 : index
    %c0_161 = arith.constant 0 : index
    %c0_162 = arith.constant 0 : index
    %382 = vector.load %arg11[%c1_160, %c0_161, %c0_162] : memref<2x32x32xbf16, #tpu.memory_space<vmem>>, vector<1x32x32xbf16>
    %383 = vector.shape_cast %382 : vector<1x32x32xbf16> to vector<32x32xbf16>
    %384 = arith.truncf %381 : vector<64x32xf32> to vector<64x32xbf16>
    %cst_163 = arith.constant dense<0.000000e+00> : vector<64x32xf32>
    %385 = tpu.matmul %384, %383, %cst_163 {dimension_numbers = #tpu.dot_dimension_numbers<[1], [0], [0], [1], [0, 0, 1, 1], [], []>} : vector<64x32xbf16>, vector<32x32xbf16>, vector<64x32xf32> -> vector<64x32xf32>
    %c1_164 = arith.constant 1 : index
    %c0_165 = arith.constant 0 : index
    %c0_166 = arith.constant 0 : index
    %386 = vector.load %arg12[%c1_164, %c0_165, %c0_166] : memref<2x1x32xf32, #tpu.memory_space<vmem>>, vector<1x1x32xf32>
    %387 = vector.shape_cast %386 : vector<1x1x32xf32> to vector<1x32xf32>
    %388 = vector.broadcast %387 : vector<1x32xf32> to vector<64x32xf32>
    %389 = arith.addf %385, %388 : vector<64x32xf32>
    %390 = arith.addf %389, %246 : vector<64x32xf32>
    %c1_167 = arith.constant 1 : index
    %c0_168 = arith.constant 0 : index
    %c0_169 = arith.constant 0 : index
    %391 = vector.load %arg13[%c1_167, %c0_168, %c0_169] : memref<2x1x32xf32, #tpu.memory_space<vmem>>, vector<1x1x32xf32>
    %392 = vector.shape_cast %391 : vector<1x1x32xf32> to vector<1x32xf32>
    %c1_170 = arith.constant 1 : index
    %c0_171 = arith.constant 0 : index
    %c0_172 = arith.constant 0 : index
    %393 = vector.load %arg14[%c1_170, %c0_171, %c0_172] : memref<2x1x32xf32, #tpu.memory_space<vmem>>, vector<1x1x32xf32>
    %394 = vector.shape_cast %393 : vector<1x1x32xf32> to vector<1x32xf32>
    %cst_173 = arith.constant dense<0.000000e+00> : vector<64xf32>
    %395 = vector.multi_reduction <add>, %390, %cst_173 [1] : vector<64x32xf32> to vector<64xf32>
    %396 = vector.shape_cast %395 : vector<64xf32> to vector<64x1xf32>
    %cst_174 = arith.constant 3.200000e+01 : f32
    %397 = vector.broadcast %cst_174 : f32 to vector<64x1xf32>
    %398 = arith.divf %396, %397 : vector<64x1xf32>
    %399 = vector.broadcast %398 : vector<64x1xf32> to vector<64x32xf32>
    %400 = arith.subf %390, %399 : vector<64x32xf32>
    %401 = arith.mulf %400, %400 : vector<64x32xf32>
    %cst_175 = arith.constant dense<0.000000e+00> : vector<64xf32>
    %402 = vector.multi_reduction <add>, %401, %cst_175 [1] : vector<64x32xf32> to vector<64xf32>
    %403 = vector.shape_cast %402 : vector<64xf32> to vector<64x1xf32>
    %cst_176 = arith.constant 3.200000e+01 : f32
    %404 = vector.broadcast %cst_176 : f32 to vector<64x1xf32>
    %405 = arith.divf %403, %404 : vector<64x1xf32>
    %406 = vector.broadcast %398 : vector<64x1xf32> to vector<64x32xf32>
    %407 = arith.subf %390, %406 : vector<64x32xf32>
    %cst_177 = arith.constant 9.99999974E-6 : f32
    %408 = vector.broadcast %cst_177 : f32 to vector<64x1xf32>
    %409 = arith.addf %405, %408 : vector<64x1xf32>
    %410 = math.rsqrt %409 : vector<64x1xf32>
    %411 = vector.broadcast %410 : vector<64x1xf32> to vector<64x32xf32>
    %412 = arith.mulf %407, %411 : vector<64x32xf32>
    %413 = vector.broadcast %392 : vector<1x32xf32> to vector<64x32xf32>
    %414 = arith.mulf %412, %413 : vector<64x32xf32>
    %415 = vector.broadcast %394 : vector<1x32xf32> to vector<64x32xf32>
    %416 = arith.addf %414, %415 : vector<64x32xf32>
    %c1_178 = arith.constant 1 : index
    %c0_179 = arith.constant 0 : index
    %c0_180 = arith.constant 0 : index
    %417 = vector.load %arg15[%c1_178, %c0_179, %c0_180] : memref<2x32x128xbf16, #tpu.memory_space<vmem>>, vector<1x32x128xbf16>
    %418 = vector.shape_cast %417 : vector<1x32x128xbf16> to vector<32x128xbf16>
    %419 = arith.truncf %416 : vector<64x32xf32> to vector<64x32xbf16>
    %cst_181 = arith.constant dense<0.000000e+00> : vector<64x128xf32>
    %420 = tpu.matmul %419, %418, %cst_181 {dimension_numbers = #tpu.dot_dimension_numbers<[1], [0], [0], [1], [0, 0, 1, 1], [], []>} : vector<64x32xbf16>, vector<32x128xbf16>, vector<64x128xf32> -> vector<64x128xf32>
    %c1_182 = arith.constant 1 : index
    %c0_183 = arith.constant 0 : index
    %c0_184 = arith.constant 0 : index
    %421 = vector.load %arg16[%c1_182, %c0_183, %c0_184] : memref<2x1x128xf32, #tpu.memory_space<vmem>>, vector<1x1x128xf32>
    %422 = vector.shape_cast %421 : vector<1x1x128xf32> to vector<1x128xf32>
    %423 = vector.broadcast %422 : vector<1x128xf32> to vector<64x128xf32>
    %424 = arith.addf %420, %423 : vector<64x128xf32>
    %cst_185 = arith.constant 5.000000e-01 : f32
    %425 = vector.broadcast %cst_185 : f32 to vector<64x128xf32>
    %426 = arith.mulf %425, %424 : vector<64x128xf32>
    %cst_186 = arith.constant 0.707106769 : f32
    %427 = vector.broadcast %cst_186 : f32 to vector<64x128xf32>
    %428 = arith.mulf %424, %427 : vector<64x128xf32>
    %429 = math.absf %428 : vector<64x128xf32>
    %cst_187 = arith.constant 0.327591091 : f32
    %430 = vector.broadcast %cst_187 : f32 to vector<64x128xf32>
    %431 = arith.mulf %430, %429 : vector<64x128xf32>
    %cst_188 = arith.constant 1.000000e+00 : f32
    %432 = vector.broadcast %cst_188 : f32 to vector<64x128xf32>
    %433 = arith.addf %432, %431 : vector<64x128xf32>
    %cst_189 = arith.constant 1.000000e+00 : f32
    %434 = vector.broadcast %cst_189 : f32 to vector<64x128xf32>
    %435 = arith.divf %434, %433 : vector<64x128xf32>
    %cst_190 = arith.constant 1.06140542 : f32
    %436 = vector.broadcast %cst_190 : f32 to vector<64x128xf32>
    %437 = arith.mulf %435, %436 : vector<64x128xf32>
    %cst_191 = arith.constant -1.45315206 : f32
    %438 = vector.broadcast %cst_191 : f32 to vector<64x128xf32>
    %439 = arith.addf %438, %437 : vector<64x128xf32>
    %440 = arith.mulf %435, %439 : vector<64x128xf32>
    %cst_192 = arith.constant 1.42141378 : f32
    %441 = vector.broadcast %cst_192 : f32 to vector<64x128xf32>
    %442 = arith.addf %441, %440 : vector<64x128xf32>
    %443 = arith.mulf %435, %442 : vector<64x128xf32>
    %cst_193 = arith.constant -0.284496725 : f32
    %444 = vector.broadcast %cst_193 : f32 to vector<64x128xf32>
    %445 = arith.addf %444, %443 : vector<64x128xf32>
    %446 = arith.mulf %435, %445 : vector<64x128xf32>
    %cst_194 = arith.constant 0.254829586 : f32
    %447 = vector.broadcast %cst_194 : f32 to vector<64x128xf32>
    %448 = arith.addf %447, %446 : vector<64x128xf32>
    %449 = arith.mulf %435, %448 : vector<64x128xf32>
    %cst_195 = arith.constant 0.000000e+00 : f32
    %450 = vector.broadcast %cst_195 : f32 to vector<64x128xf32>
    %451 = arith.subf %450, %429 : vector<64x128xf32>
    %452 = arith.mulf %451, %429 : vector<64x128xf32>
    %453 = math.exp %452 : vector<64x128xf32>
    %454 = arith.mulf %449, %453 : vector<64x128xf32>
    %cst_196 = arith.constant 1.000000e+00 : f32
    %455 = vector.broadcast %cst_196 : f32 to vector<64x128xf32>
    %456 = arith.subf %455, %454 : vector<64x128xf32>
    %cst_197 = arith.constant 0.000000e+00 : f32
    %457 = vector.broadcast %cst_197 : f32 to vector<64x128xf32>
    %458 = arith.cmpf oge, %428, %457 : vector<64x128xf32>
    %cst_198 = arith.constant 0.000000e+00 : f32
    %459 = vector.broadcast %cst_198 : f32 to vector<64x128xf32>
    %460 = arith.subf %459, %456 : vector<64x128xf32>
    %461 = arith.select %458, %456, %460 : vector<64x128xi1>, vector<64x128xf32>
    %cst_199 = arith.constant 1.000000e+00 : f32
    %462 = vector.broadcast %cst_199 : f32 to vector<64x128xf32>
    %463 = arith.addf %462, %461 : vector<64x128xf32>
    %464 = arith.mulf %426, %463 : vector<64x128xf32>
    %c1_200 = arith.constant 1 : index
    %c0_201 = arith.constant 0 : index
    %c0_202 = arith.constant 0 : index
    %465 = vector.load %arg17[%c1_200, %c0_201, %c0_202] : memref<2x128x32xbf16, #tpu.memory_space<vmem>>, vector<1x128x32xbf16>
    %466 = vector.shape_cast %465 : vector<1x128x32xbf16> to vector<128x32xbf16>
    %467 = arith.truncf %464 : vector<64x128xf32> to vector<64x128xbf16>
    %cst_203 = arith.constant dense<0.000000e+00> : vector<64x32xf32>
    %468 = tpu.matmul %467, %466, %cst_203 {dimension_numbers = #tpu.dot_dimension_numbers<[1], [0], [0], [1], [0, 0, 1, 1], [], []>} : vector<64x128xbf16>, vector<128x32xbf16>, vector<64x32xf32> -> vector<64x32xf32>
    %c1_204 = arith.constant 1 : index
    %c0_205 = arith.constant 0 : index
    %c0_206 = arith.constant 0 : index
    %469 = vector.load %arg18[%c1_204, %c0_205, %c0_206] : memref<2x1x32xf32, #tpu.memory_space<vmem>>, vector<1x1x32xf32>
    %470 = vector.shape_cast %469 : vector<1x1x32xf32> to vector<1x32xf32>
    %471 = vector.broadcast %470 : vector<1x32xf32> to vector<64x32xf32>
    %472 = arith.addf %468, %471 : vector<64x32xf32>
    %473 = arith.addf %472, %390 : vector<64x32xf32>
    %c0_207 = arith.constant 0 : index
    %c0_208 = arith.constant 0 : index
    %474 = vector.load %arg19[%c0_207, %c0_208] : memref<64x32xf32, #tpu.memory_space<vmem>>, vector<64x32xf32>
    tpu.vector_store %arg19[%c0_207, %c0_208], %473 {strides = array<i32>} : memref<64x32xf32, #tpu.memory_space<vmem>>, vector<64x32xf32>,
    return
  }
  func.func @transform_0(%arg0: i32) -> (i32, i32) {
    %c0_i32 = arith.constant 0 : i32
    %c0_i32_0 = arith.constant 0 : i32
    return %arg0, %c0_i32 : i32, i32
  }
  func.func @transform_1(%arg0: i32) -> (i32, i32, i32) {
    %c0_i32 = arith.constant 0 : i32
    %c0_i32_0 = arith.constant 0 : i32
    %c0_i32_1 = arith.constant 0 : i32
    %c0_i32_2 = arith.constant 0 : i32
    return %c0_i32, %c0_i32_0, %c0_i32_1 : i32, i32, i32
  }
  func.func @transform_2(%arg0: i32) -> (i32, i32, i32) {
    %c0_i32 = arith.constant 0 : i32
    %c0_i32_0 = arith.constant 0 : i32
    %c0_i32_1 = arith.constant 0 : i32
    %c0_i32_2 = arith.constant 0 : i32
    return %c0_i32, %c0_i32_0, %c0_i32_1 : i32, i32, i32
  }
  func.func @transform_3(%arg0: i32) -> (i32, i32, i32, i32) {
    %c0_i32 = arith.constant 0 : i32
    %c0_i32_0 = arith.constant 0 : i32
    %c0_i32_1 = arith.constant 0 : i32
    %c0_i32_2 = arith.constant 0 : i32
    %c0_i32_3 = arith.constant 0 : i32
    return %c0_i32, %c0_i32_0, %c0_i32_1, %c0_i32_2 : i32, i32, i32, i32
  }
  func.func @transform_4(%arg0: i32) -> (i32, i32, i32) {
    %c0_i32 = arith.constant 0 : i32
    %c0_i32_0 = arith.constant 0 : i32
    %c0_i32_1 = arith.constant 0 : i32
    %c0_i32_2 = arith.constant 0 : i32
    return %c0_i32, %c0_i32_0, %c0_i32_1 : i32, i32, i32
  }
  func.func @transform_5(%arg0: i32) -> (i32, i32, i32) {
    %c0_i32 = arith.constant 0 : i32
    %c0_i32_0 = arith.constant 0 : i32
    %c0_i32_1 = arith.constant 0 : i32
    %c0_i32_2 = arith.constant 0 : i32
    return %c0_i32, %c0_i32_0, %c0_i32_1 : i32, i32, i32
  }
  func.func @transform_6(%arg0: i32) -> (i32, i32, i32, i32) {
    %c0_i32 = arith.constant 0 : i32
    %c0_i32_0 = arith.constant 0 : i32
    %c0_i32_1 = arith.constant 0 : i32
    %c0_i32_2 = arith.constant 0 : i32
    %c0_i32_3 = arith.constant 0 : i32
    return %c0_i32, %c0_i32_0, %c0_i32_1, %c0_i32_2 : i32, i32, i32, i32
  }
  func.func @transform_7(%arg0: i32) -> (i32, i32, i32) {
    %c0_i32 = arith.constant 0 : i32
    %c0_i32_0 = arith.constant 0 : i32
    %c0_i32_1 = arith.constant 0 : i32
    %c0_i32_2 = arith.constant 0 : i32
    return %c0_i32, %c0_i32_0, %c0_i32_1 : i32, i32, i32
  }
  func.func @transform_8(%arg0: i32) -> (i32, i32, i32) {
    %c0_i32 = arith.constant 0 : i32
    %c0_i32_0 = arith.constant 0 : i32
    %c0_i32_1 = arith.constant 0 : i32
    %c0_i32_2 = arith.constant 0 : i32
    return %c0_i32, %c0_i32_0, %c0_i32_1 : i32, i32, i32
  }
  func.func @transform_9(%arg0: i32) -> (i32, i32, i32) {
    %c0_i32 = arith.constant 0 : i32
    %c0_i32_0 = arith.constant 0 : i32
    %c0_i32_1 = arith.constant 0 : i32
    %c0_i32_2 = arith.constant 0 : i32
    return %c0_i32, %c0_i32_0, %c0_i32_1 : i32, i32, i32
  }
  func.func @transform_10(%arg0: i32) -> (i32, i32, i32) {
    %c0_i32 = arith.constant 0 : i32
    %c0_i32_0 = arith.constant 0 : i32
    %c0_i32_1 = arith.constant 0 : i32
    %c0_i32_2 = arith.constant 0 : i32
    return %c0_i32, %c0_i32_0, %c0_i32_1 : i32, i32, i32
  }
  func.func @transform_11(%arg0: i32) -> (i32, i32, i32) {
    %c0_i32 = arith.constant 0 : i32
    %c0_i32_0 = arith.constant 0 : i32
    %c0_i32_1 = arith.constant 0 : i32
    %c0_i32_2 = arith.constant 0 : i32
    return %c0_i32, %c0_i32_0, %c0_i32_1 : i32, i32, i32
  }
  func.func @transform_12(%arg0: i32) -> (i32, i32, i32) {
    %c0_i32 = arith.constant 0 : i32
    %c0_i32_0 = arith.constant 0 : i32
    %c0_i32_1 = arith.constant 0 : i32
    %c0_i32_2 = arith.constant 0 : i32
    return %c0_i32, %c0_i32_0, %c0_i32_1 : i32, i32, i32
  }
  func.func @transform_13(%arg0: i32) -> (i32, i32, i32) {
    %c0_i32 = arith.constant 0 : i32
    %c0_i32_0 = arith.constant 0 : i32
    %c0_i32_1 = arith.constant 0 : i32
    %c0_i32_2 = arith.constant 0 : i32
    return %c0_i32, %c0_i32_0, %c0_i32_1 : i32, i32, i32
  }
  func.func @transform_14(%arg0: i32) -> (i32, i32, i32) {
    %c0_i32 = arith.constant 0 : i32
    %c0_i32_0 = arith.constant 0 : i32
    %c0_i32_1 = arith.constant 0 : i32
    %c0_i32_2 = arith.constant 0 : i32
    return %c0_i32, %c0_i32_0, %c0_i32_1 : i32, i32, i32
  }
  func.func @transform_15(%arg0: i32) -> (i32, i32, i32) {
    %c0_i32 = arith.constant 0 : i32
    %c0_i32_0 = arith.constant 0 : i32
    %c0_i32_1 = arith.constant 0 : i32
    %c0_i32_2 = arith.constant 0 : i32
    return %c0_i32, %c0_i32_0, %c0_i32_1 : i32, i32, i32
  }
  func.func @transform_16(%arg0: i32) -> (i32, i32, i32) {
    %c0_i32 = arith.constant 0 : i32
    %c0_i32_0 = arith.constant 0 : i32
    %c0_i32_1 = arith.constant 0 : i32
    %c0_i32_2 = arith.constant 0 : i32
    return %c0_i32, %c0_i32_0, %c0_i32_1 : i32, i32, i32
  }
  func.func @transform_17(%arg0: i32) -> (i32, i32, i32) {
    %c0_i32 = arith.constant 0 : i32
    %c0_i32_0 = arith.constant 0 : i32
    %c0_i32_1 = arith.constant 0 : i32
    %c0_i32_2 = arith.constant 0 : i32
    return %c0_i32, %c0_i32_0, %c0_i32_1 : i32, i32, i32
  }
  func.func @transform_18(%arg0: i32) -> (i32, i32) {
    %c0_i32 = arith.constant 0 : i32
    %c0_i32_0 = arith.constant 0 : i32
    return %arg0, %c0_i32 : i32, i32
  }
}

</mosaic_0001>

<bundles_post_ra>
// kernel: tr_forward.1
= control target key start
LH: loop header
LB: loop body
LE: loop exit
PB: predicated region body
PF: predicated region fallthrough
CT: control target
= control target key end

     0   :  { %s5651_s27 = smov 0   ;;  %s7304_s0 = inlined_call_operand.vmem [shape: f32[128,32], index: 0, kind: input, shape index: {}]   ;;  %s7305_s1 = inlined_call_operand.vmem [shape: f32[2,1,32], index: 1, kind: input, shape index: {}]   ;;  %s7306_s2 = inlined_call_operand.vmem [shape: f32[2,1,32], index: 2, kind: input, shape index: {}]   ;;  %s7307_s3 = inlined_call_operand.vmem [shape: f32[2,3,1,32], index: 3, kind: input, shape index: {}]   ;;  %s7308_s4 = inlined_call_operand.vmem [shape: f32[2,1,32], index: 4, kind: input, shape index: {}]   ;;  %s7309_s5 = inlined_call_operand.vmem [shape: bf16[2,32,32], index: 5, kind: input, shape index: {}]   ;;  %s7310_s6 = inlined_call_operand.vmem [shape: f32[2,3,1,32], index: 6, kind: input, shape index: {}]   ;;  %s7311_s7 = inlined_call_operand.vmem [shape: f32[2,1,32], index: 7, kind: input, shape index: {}]   ;;  %s7312_s8 = inlined_call_operand.vmem [shape: bf16[2,32,32], index: 8, kind: input, shape index: {}]   ;;  %s7313_s9 = inlined_call_operand.vmem [shape: bf16[2,32,32], index: 9, kind: input, shape index: {}]   ;;  %s7314_s10 = inlined_call_operand.vmem [shape: bf16[2,32,32], index: 10, kind: input, shape index: {}]   ;;  %s7315_s11 = inlined_call_operand.vmem [shape: f32[2,1,32], index: 11, kind: input, shape index: {}]   ;;  %s7316_s12 = inlined_call_operand.vmem [shape: f32[2,1,32], index: 12, kind: input, shape index: {}]   ;;  %s7317_s13 = inlined_call_operand.vmem [shape: f32[2,1,32], index: 13, kind: input, shape index: {}]   ;;  %s7318_s14 = inlined_call_operand.vmem [shape: bf16[2,32,128], index: 14, kind: input, shape index: {}]   ;;  %s7319_s15 = inlined_call_operand.vmem [shape: f32[2,1,128], index: 15, kind: input, shape index: {}]   ;;  %s7320_s16 = inlined_call_operand.vmem [shape: bf16[2,128,32], index: 16, kind: input, shape index: {}]   ;;  %s7321_s17 = inlined_call_operand.vmem [shape: f32[2,1,32], index: 17, kind: input, shape index: {}]   ;;  %s7322_s18 = inlined_call_operand.vmem [shape: f32[128,32], index: 18, kind: output, shape index: {}]  }
   0x1   :  { %7325 = sst [smem:[#allocation2_spill]] %s7304_s0 }
   0x2   :  { %7326 = sst [smem:[#allocation3_spill]] %s7305_s1 }
   0x3   :  { %7327 = sst [smem:[#allocation4_spill]] %s7306_s2 }
   0x4 LB: > { %s4582_s28 = sadd.s32 4294967295, %s5551_s27   ;;  %p4586_p0 = scmp.ge.s32.totalorder %s5551_s27, 1  ;;  %s5551_s27 = sphi %s5651_s27, %s28_s27  }
   0x5   : > { %p513_p1 = scmp.lt.s32.totalorder %s5551_s27, 3 }
   0x7   : > { %p514_p2 = pnand %p4586_p0, %p513_p1 }
   0x8   : > { %s4587_s29 = sshll.u32 (!%p514_p2), %s4582_s28, 3  ;;  %vm631_vm0 = vcmask (!%p514_p2), 261120   ;;  %s7328_s1 = sld [smem:[#allocation2_spill]] (!%p514_p2)  ;;  %v588_v56 = vlaneseq (!%p514_p2)  ;;  %vm971_vm3 = vcmask (!%p514_p2), 523264   ;;  %vm1270_vm10 = vcmask (!%p514_p2), 130048  }
   0x9   : > { %517 = sbr.rel (%p514_p2) target bundleno = 6700 (0x1a2c), region = 92  ;;  %p568_p3 = scmp.lt.s32.totalorder (!%p514_p2), %s4587_s29, 15 }
   0xa   : > { %v5725_v57 = vshrl.u32 (!%p514_p2), %v588_v56, 7  ;;  %v614_v59 = vand.u32 (!%p514_p2), 127, %v588_v56  ;;  %s7329_s24 = sld [smem:[#allocation3_spill]] (!%p514_p2)  ;;  %s7330_s28 = sld [smem:[#allocation4_spill]] (!%p514_p2) }
   0xb   : > { %s5554_s26 = smov (!%p514_p2), 112   ;;  %s5555_s22 = smov (!%p514_p2), 16  }
   0xc   : > { %v590_v58 = vadd.s32 (!%p514_p2), 8, %v5725_v57  ;;  %v615_v60 = vmul.u32 (!%p514_p2), 2, %v5725_v57  ;;  %v591_v61 = vadd.s32 (!%p514_p2), 16, %v5725_v57  ;;  %v592_v62 = vadd.s32 (!%p514_p2), 24, %v5725_v57 }
   0xd   : > { %vm791_vm6 = vcmp.lt.s32.totalorder (!%p514_p2), %v5725_v57, 1  ;;  %vm597_vm7 = vcmp.ge.s32.totalorder (!%p514_p2), %v5725_v57, 1  ;;  %vm838_vm8 = vcmp.lt.s32.totalorder (!%p514_p2), %v5725_v57, 7 }
   0xe   : > { %v616_v63 = vmul.u32 (!%p514_p2), 2, %v590_v58  ;;  %vm619_vm1 = vcmp.eq.s32.totalorder (!%p514_p2), %v614_v59, %v615_v60 }
  0x10   : > { %s7332_s29 = smov (!%p568_p3, %s4587_s29), 15  ;;  %vm620_vm2 = vcmp.eq.s32.totalorder %v614_v59, %v616_v63  ;;  %v5778_v63 = vld [vmem:[%s7310_s6 + $0x1] ss:$0 sm:$0xff] }
  0x11   : > { %s4588_s30 = sshll.u32 %s7332_s29, 3 }
  0x12   : > { %s5667_s20 = scalar_lea.vmem %s7328_s1, %s4588_s30 }
  0x13   : > { %v580_v0 = vld [vmem:[%s5667_s20] sm:$0xff]  ;;  %v581_v1 = vld [vmem:[%s5667_s20 + $0x8] sm:$0xff]  ;;  %v587_v2 = vld [vmem:[%s5667_s20 + $0x38] sm:$0xff] }
  0x14   : > { %v632_v3 = vsel %vm631_vm0, %v580_v0, 0.0  ;;  %v635_v4 = vsel %vm631_vm0, %v581_v1, 0.0  ;;  %v582_v5 = vld [vmem:[%s5667_s20 + $0x10] sm:$0xff]  ;;  %v583_v6 = vld [vmem:[%s5667_s20 + $0x18] sm:$0xff]  ;;  %v584_v7 = vld [vmem:[%s5667_s20 + $0x20] sm:$0xff]  ;;  %v653_v8 = vsel %vm631_vm0, %v587_v2, 0.0 }
  0x15   : > { %633 = vadd.xlane.f32.xlu0 %v632_v3  ;;  %636 = vadd.xlane.f32.xlu1 %v635_v4  ;;  %v638_v9 = vsel %vm631_vm0, %v582_v5, 0.0  ;;  %v641_v10 = vsel %vm631_vm0, %v583_v6, 0.0  ;;  %v644_v11 = vsel %vm631_vm0, %v584_v7, 0.0  ;;  %v585_v12 = vld [vmem:[%s5667_s20 + $0x28] sm:$0xff]  ;;  %v586_v13 = vld [vmem:[%s5667_s20 + $0x30] sm:$0xff]  ;;  %v618_v3 = vmul.u32 2, %v592_v62 }
  0x16   : > { %v647_v14 = vsel %vm631_vm0, %v585_v12, 0.0  ;;  %v650_v15 = vsel %vm631_vm0, %v586_v13, 0.0 }
  0x17   : > { %vm622_vm5 = vcmp.eq.s32.totalorder %v614_v59, %v618_v3 }
  0x19   : > { %654 = vadd.xlane.f32.xlu0 %v653_v8  ;;  %639 = vadd.xlane.f32.xlu1 %v638_v9  ;;  %v5248_v9 = vld [vmem:[%s7313_s9] sm:$0xff]  }
  0x1a   : > { %4946 = vmatprep.subr.bf16.mxu1 %v5248_v9 }
  0x1b   : > { %4947 = vmatpush3.bf16.msra.mxu1 %v5248_v9 }
  0x1d   : > { %642 = vadd.xlane.f32.xlu0 %v641_v10  ;;  %645 = vadd.xlane.f32.xlu1 %v644_v11 }
  0x21   : > { %648 = vadd.xlane.f32.xlu0 %v647_v14  ;;  %651 = vadd.xlane.f32.xlu1 %v650_v15 }
  0xa2   : > { %v634_v16 = vpop.xlane.xlu0 %633  ;;  %v637_v17 = vpop.xlane.xlu1 %636 }
  0xa3   : > { %v657_v18 = vmul.f32 0.03125, %v634_v16  ;;  %v658_v19 = vmul.f32 0.03125, %v637_v17 }
  0xa5   : > { %v5685_v20 = vsub.f32 %v580_v0, %v657_v18  ;;  %v5687_v21 = vsub.f32 %v581_v1, %v658_v19  ;;  %v5553_v0 = vmov 0.0  }
  0xa6   : > { %v655_v22 = vpop.xlane.xlu0 %654  ;;  %v640_v23 = vpop.xlane.xlu1 %639  ;;  %v623_v1 = vsel %vm619_vm1, 1.0, %v5553_v0  ;;  %v624_v4 = vsel %vm620_vm2, 1.0, %v5553_v0 }
  0xa7   : > { %v664_v24 = vmul.f32 0.03125, %v655_v22  ;;  %v659_v25 = vmul.f32 0.03125, %v640_v23  ;;  %v673_v26 = vmul.f32 %v5685_v20, %v5685_v20  ;;  %v674_v27 = vmul.f32 %v5687_v21, %v5687_v21 }
  0xa9   : > { %v5693_v28 = vsub.f32 %v587_v2, %v664_v24  ;;  %v5695_v29 = vsub.f32 %v582_v5, %v659_v25  ;;  %v681_v30 = vsel %vm631_vm0, %v673_v26, 0.0  ;;  %v684_v33 = vsel %vm631_vm0, %v674_v27, 0.0 }
  0xaa   : > { %682 = vadd.xlane.f32.xlu0 %v681_v30  ;;  %v643_v31 = vpop.xlane.xlu0 %642  ;;  %v646_v32 = vpop.xlane.xlu1 %645  ;;  %v617_v2 = vmul.u32 2, %v591_v61  ;;  %v5731_v5 = vpack.c.bf16 %v624_v4, %v623_v1  ;;  %v5792_v4 = vld [vmem:[%s7310_s6] ss:$0 sm:$0xff] }
  0xab   : > { %v660_v34 = vmul.f32 0.03125, %v643_v31  ;;  %v661_v35 = vmul.f32 0.03125, %v646_v32  ;;  %v680_v36 = vmul.f32 %v5693_v28, %v5693_v28  ;;  %v675_v37 = vmul.f32 %v5695_v29, %v5695_v29 }
  0xac   : > { %vm621_vm4 = vcmp.eq.s32.totalorder %v614_v59, %v617_v2  ;;  %4922 = vmatprep.mubr.msk.bf16.mxu0 %vm971_vm3, %v5731_v5 }
  0xad   : > { %v5703_v38 = vsub.f32 %v583_v6, %v660_v34  ;;  %v5705_v39 = vsub.f32 %v584_v7, %v661_v35  ;;  %v702_v40 = vsel %vm631_vm0, %v680_v36, 0.0  ;;  %v687_v43 = vsel %vm631_vm0, %v675_v37, 0.0  ;;  %v5743_v34 = vld [vmem:[%s7329_s24] ss:$0 sm:$0xff] }
  0xae   : > { %685 = vadd.xlane.f32.xlu0 %v684_v33  ;;  %703 = vadd.xlane.f32.xlu1 %v702_v40  ;;  %v649_v41 = vpop.xlane.xlu0 %648  ;;  %v652_v42 = vpop.xlane.xlu1 %651  ;;  %v625_v6 = vsel %vm621_vm4, 1.0, %v5553_v0  ;;  %v626_v7 = vsel %vm622_vm5, 1.0, %v5553_v0 }
  0xaf   : > { %v662_v44 = vmul.f32 0.03125, %v649_v41  ;;  %v663_v45 = vmul.f32 0.03125, %v652_v42  ;;  %v676_v46 = vmul.f32 %v5703_v38, %v5703_v38  ;;  %v677_v47 = vmul.f32 %v5705_v39, %v5705_v39 }
  0xb0   : > { %v5733_v8 = vpack.c.bf16 %v626_v7, %v625_v6 }
  0xb1   : > { %v5713_v48 = vsub.f32 %v585_v12, %v662_v44  ;;  %v5715_v49 = vsub.f32 %v586_v13, %v663_v45  ;;  %v690_v50 = vsel %vm631_vm0, %v676_v46, 0.0  ;;  %v693_v51 = vsel %vm631_vm0, %v677_v47, 0.0  ;;  %v5750_v44 = vld [vmem:[%s7330_s28] ss:$0 sm:$0xff] }
  0xb2   : > { %688 = vadd.xlane.f32.xlu1 %v687_v43  ;;  %691 = vadd.xlane.f32.xlu0 %v690_v50 }
  0xb3   : > { %v678_v52 = vmul.f32 %v5713_v48, %v5713_v48  ;;  %v679_v53 = vmul.f32 %v5715_v49, %v5715_v49 }
  0xb5   : > { %v696_v54 = vsel %vm631_vm0, %v678_v52, 0.0  ;;  %v699_v55 = vsel %vm631_vm0, %v679_v53, 0.0 }
  0xb6   : > { %694 = vadd.xlane.f32.xlu1 %v693_v51  ;;  %697 = vadd.xlane.f32.xlu0 %v696_v54 }
  0xba   : > { %700 = vadd.xlane.f32.xlu1 %v699_v55 }
 0x137   : > { %v683_v10 = vpop.xlane.xlu0 %682 }
 0x138   : > { %v705_v11 = vmul.f32 0.03125, %v683_v10 }
 0x13a   : > { %v713_v12 = vadd.f32 1e-05, %v705_v11 }
 0x13b   : > { %v704_v13 = vpop.xlane.xlu1 %703  ;;  %v686_v14 = vpop.xlane.xlu0 %685 }
 0x13c   : > { %5281 = vrsqrt.f32 %v713_v12  ;;  %v712_v15 = vmul.f32 0.03125, %v704_v13  ;;  %v706_v16 = vmul.f32 0.03125, %v686_v14 }
 0x13e   : > { %v720_v17 = vadd.f32 1e-05, %v712_v15  ;;  %v714_v18 = vadd.f32 1e-05, %v706_v16  ;;  %v5820_v15 = vld [vmem:[%s7310_s6 + $0x2] ss:$0 sm:$0xff] }
 0x13f   : > { %v689_v19 = vpop.xlane.xlu1 %688  ;;  %v692_v22 = vpop.xlane.xlu0 %691 }
 0x140   : > { %5283 = vrsqrt.f32 %v720_v17  ;;  %v707_v23 = vmul.f32 0.03125, %v689_v19  ;;  %v708_v24 = vmul.f32 0.03125, %v692_v22 }
 0x141   : > { %5285 = vrsqrt.f32 %v714_v18 }
 0x142   : > { %v715_v25 = vadd.f32 1e-05, %v707_v23  ;;  %v716_v26 = vadd.f32 1e-05, %v708_v24 }
 0x143   : > { %v695_v27 = vpop.xlane.xlu1 %694  ;;  %v698_v30 = vpop.xlane.xlu0 %697 }
 0x144   : > { %5287 = vrsqrt.f32 %v715_v25  ;;  %v709_v31 = vmul.f32 0.03125, %v695_v27  ;;  %v710_v32 = vmul.f32 0.03125, %v698_v30 }
 0x145   : > { %5289 = vrsqrt.f32 %v716_v26 }
 0x146   : > { %v5282_v33 = vpop.eup %5281  ;;  %v717_v35 = vadd.f32 1e-05, %v709_v31  ;;  %v718_v36 = vadd.f32 1e-05, %v710_v32 }
 0x147   : > { %v729_v37 = vmul.f32 %v5282_v33, %v5685_v20  ;;  %v701_v40 = vpop.xlane.xlu1 %700 }
 0x148   : > { %5291 = vrsqrt.f32 %v717_v35  ;;  %v711_v41 = vmul.f32 0.03125, %v701_v40 }
 0x149   : > { %v743_v42 = vmul.f32 %v5743_v34, %v729_v37  ;;  %5293 = vrsqrt.f32 %v718_v36 }
 0x14a   : > { %v5284_v43 = vpop.eup %5283  ;;  %v719_v45 = vadd.f32 1e-05, %v711_v41 }
 0x14b   : > { %v5286_v46 = vpop.eup %5285  ;;  %v736_v47 = vmul.f32 %v5284_v43, %v5693_v28  ;;  %v5756_v51 = vadd.f32 %v5750_v44, %v743_v42 }
 0x14c   : > { %v730_v50 = vmul.f32 %v5286_v46, %v5687_v21  ;;  %5295 = vrsqrt.f32 %v719_v45 }
 0x14d   : > { %v750_v20 = vmul.f32 %v5743_v34, %v736_v47  ;;  %v783_v59 = vrot.slane %v5756_v51, 7  ;;  %v830_v9 = vrot.slane %v5756_v51, 1  ;;  %v901_v12 = vmul.f32 %v5778_v63, %v5756_v51 }
 0x14e   : > { %v5288_v52 = vpop.eup %5287  ;;  %v744_v53 = vmul.f32 %v5743_v34, %v730_v50 }
 0x14f   : > { %v5290_v54 = vpop.eup %5289  ;;  %v5760_v55 = vadd.f32 %v5750_v44, %v750_v20  ;;  %v731_v56 = vmul.f32 %v5288_v52, %v5695_v29 }
 0x150   : > { %v732_v58 = vmul.f32 %v5290_v54, %v5703_v38  ;;  %v5765_v28 = vadd.f32 %v5750_v44, %v744_v53 }
 0x151   : > { %v745_v21 = vmul.f32 %v5743_v34, %v731_v56  ;;  %v790_v60 = vrot.slane %v5760_v55, 7  ;;  %v5882_v56 = vadd.s32 56, %v5725_v57 }
 0x152   : > { %v5292_v61 = vpop.eup %5291  ;;  %v746_v62 = vmul.f32 %v5743_v34, %v732_v58  ;;  %v784_v29 = vrot.slane %v5765_v28, 7  ;;  %v831_v38 = vrot.slane %v5765_v28, 1  ;;  %v902_v23 = vmul.f32 %v5778_v63, %v5765_v28 }
 0x153   : > { %v5294_v0 = vpop.eup %5293  ;;  %v5781_v1 = vadd.f32 %v5750_v44, %v745_v21  ;;  %v733_v2 = vmul.f32 %v5292_v61, %v5705_v39  ;;  %v799_v3 = vsel %vm791_vm6, %v790_v60, %v783_v59  ;;  %vm612_vm9 = vcmp.lt.s32.totalorder %v5882_v56, 63 }
 0x154   : > { %v734_v6 = vmul.f32 %v5294_v0, %v5713_v48  ;;  %v5797_v7 = vsel %vm791_vm6, %v783_v59, %v784_v29  ;;  %v5801_v39 = vsel %vm597_vm7, %v799_v3, 0.0  ;;  %v5809_v48 = vadd.f32 %v5750_v44, %v746_v62 }
 0x155   : > { %v747_v10 = vmul.f32 %v5743_v34, %v733_v2  ;;  %v832_v11 = vrot.slane %v5781_v1, 1  ;;  %v5815_v14 = vsel %vm838_vm8, %v830_v9, %v831_v38  ;;  %v915_v16 = vmul.f32 %v5792_v4, %v5801_v39 }
 0x156   : > { %v5296_v13 = vpop.eup %5295  ;;  %v916_v17 = vmul.f32 %v5792_v4, %v5797_v7  ;;  %v748_v24 = vmul.f32 %v5743_v34, %v734_v6  ;;  %v937_v27 = vmul.f32 %v5820_v15, %v5815_v14  ;;  %v785_v32 = vrot.slane %v5781_v1, 7 }
 0x157   : > { %v5827_v18 = vadd.f32 %v5750_v44, %v747_v10  ;;  %v735_v19 = vmul.f32 %v5296_v13, %v5715_v49  ;;  %v5832_v22 = vsel %vm838_vm8, %v831_v38, %v832_v11  ;;  %v923_v25 = vadd.f32 %v915_v16, %v901_v12  ;;  %v5845_v49 = vld [vmem:[%s7311_s7] ss:$0 sm:$0xff] }
 0x158   : > { %v924_v26 = vadd.f32 %v916_v17, %v902_v23  ;;  %v938_v30 = vmul.f32 %v5820_v15, %v5832_v22  ;;  %v786_v33 = vrot.slane %v5809_v48, 7  ;;  %v833_v35 = vrot.slane %v5809_v48, 1  ;;  %v5907_v16 = vld [vmem:[%s7307_s3] ss:$0 sm:$0xff]  ;;  %v5912_v17 = vld [vmem:[%s7307_s3 + $0x1] ss:$0 sm:$0xff] }
 0x159   : > { %v749_v31 = vmul.f32 %v5743_v34, %v735_v19  ;;  %v945_v36 = vadd.f32 %v937_v27, %v923_v25  ;;  %v834_v40 = vrot.slane %v5827_v18, 1  ;;  %v5852_v41 = vadd.f32 %v5750_v44, %v748_v24 }
 0x15a   : > { %v946_v37 = vadd.f32 %v938_v30, %v924_v26  ;;  %v5856_v34 = vsel %vm791_vm6, %v784_v29, %v785_v32  ;;  %v5862_v45 = vsel %vm791_vm6, %v785_v32, %v786_v33  ;;  %v5866_v46 = vsel %vm838_vm8, %v832_v11, %v833_v35 }
 0x15b   : > { %v959_v42 = vadd.f32 %v5845_v49, %v945_v36  ;;  %v5869_v47 = vadd.f32 %v5750_v44, %v749_v31  ;;  %v5873_v50 = vsel %vm838_vm8, %v833_v35, %v834_v40  ;;  %v903_v20 = vmul.f32 %v5778_v63, %v5781_v1 }
 0x15c   : > { %v960_v43 = vadd.f32 %v5845_v49, %v946_v37  ;;  %v917_v52 = vmul.f32 %v5792_v4, %v5856_v34  ;;  %v904_v54 = vmul.f32 %v5778_v63, %v5809_v48  ;;  %v918_v44 = vmul.f32 %v5792_v4, %v5862_v45 }
 0x15d   : > { %v939_v21 = vmul.f32 %v5820_v15, %v5866_v46  ;;  %v940_v59 = vmul.f32 %v5820_v15, %v5873_v50  ;;  %v787_v61 = vrot.slane %v5827_v18, 7  ;;  %v788_v62 = vrot.slane %v5852_v41, 7 }
 0x15e   : > { %v967_v53 = vpack.c.bf16 %v960_v43, %v959_v42  ;;  %v925_v58 = vadd.f32 %v917_v52, %v903_v20  ;;  %v837_v29 = vrot.slane %v5760_v55, 1  ;;  %v926_v38 = vadd.f32 %v918_v44, %v904_v54 }
 0x15f   : > { %v835_v2 = vrot.slane %v5852_v41, 1  ;;  %v836_v3 = vrot.slane %v5869_v47, 1  ;;  %v794_v6 = vsel %vm791_vm6, %v787_v61, %v788_v62  ;;  %v795_v10 = vsel %vm791_vm6, %v786_v33, %v787_v61 }
 0x160   : > { %4914 = vmatprep.subr.bf16.mxu0 %v967_v53  ;;  %v947_v0 = vadd.f32 %v939_v21, %v925_v58  ;;  %v948_v11 = vadd.f32 %v940_v59, %v926_v38  ;;  %v905_v12 = vmul.f32 %v5778_v63, %v5827_v18  ;;  %v906_v13 = vmul.f32 %v5778_v63, %v5852_v41 }
 0x161   : > { %4915 = vmatpush3.bf16.msra.mxu0 %v967_v53  ;;  %v840_v19 = vsel %vm838_vm8, %v835_v2, %v836_v3  ;;  %v5918_v23 = vsel %vm838_vm8, %v834_v40, %v835_v2  ;;  %v919_v24 = vmul.f32 %v5792_v4, %v795_v10  ;;  %v920_v25 = vmul.f32 %v5792_v4, %v794_v6 }
 0x162   : > { %v961_v26 = vadd.f32 %v5845_v49, %v947_v0  ;;  %v962_v27 = vadd.f32 %v5845_v49, %v948_v11  ;;  %v941_v30 = vmul.f32 %v5820_v15, %v5918_v23  ;;  %v846_v31 = vsel %vm838_vm8, %v837_v29, %v830_v9 }
 0x163   : > { %v927_v32 = vadd.f32 %v919_v24, %v905_v12  ;;  %v928_v33 = vadd.f32 %v920_v25, %v906_v13  ;;  %v942_v35 = vmul.f32 %v5820_v15, %v840_v19  ;;  %v789_v36 = vrot.slane %v5869_v47, 7 }
 0x164   : > { %v814_v37 = vmul.f32 %v5907_v16, %v5801_v39  ;;  %v968_v40 = vpack.c.bf16 %v962_v27, %v961_v26  ;;  %v5936_v42 = vsel %vm838_vm8, %v836_v3, %v837_v29  ;;  %v775_v43 = vmul.f32 %v5912_v17, %v5756_v51 }
 0x165   : > { %v949_v20 = vadd.f32 %v941_v30, %v927_v32  ;;  %v950_v52 = vadd.f32 %v942_v35, %v928_v33  ;;  %v792_v9 = vsel %vm791_vm6, %v789_v36, %v790_v60  ;;  %v793_v53 = vsel %vm791_vm6, %v788_v62, %v789_v36  ;;  %v5959_v60 = vld [vmem:[%s7307_s3 + $0x2] ss:$0 sm:$0xff] }
 0x166   : > { %v815_v39 = vmul.f32 %v5907_v16, %v5797_v7  ;;  %4916 = vmatprep.subr.bf16.mxu0 %v968_v40  ;;  %v5950_v54 = vsel %vm612_vm9, %v846_v31, 0.0  ;;  %v907_v51 = vmul.f32 %v5778_v63, %v5869_v47  ;;  %v908_v44 = vmul.f32 %v5778_v63, %v5760_v55  ;;  %v5245_v33 = vld [vmem:[%s7309_s5] sm:$0xff]  }
 0x167   : > { %4917 = vmatpush3.bf16.msra.mxu0 %v968_v40  ;;  %v963_v58 = vadd.f32 %v5845_v49, %v949_v20  ;;  %v964_v7 = vadd.f32 %v5845_v49, %v950_v52  ;;  %v921_v21 = vmul.f32 %v5792_v4, %v793_v53  ;;  %v922_v59 = vmul.f32 %v5792_v4, %v792_v9 }
 0x168   : > { %v862_v61 = vmul.f32 %v5959_v60, %v5832_v22  ;;  %v943_v63 = vmul.f32 %v5820_v15, %v5936_v42  ;;  %v776_v62 = vmul.f32 %v5912_v17, %v5765_v28  ;;  %v822_v29 = vadd.f32 %v814_v37, %v775_v43 }
 0x169   : > { %v969_v38 = vpack.c.bf16 %v964_v7, %v963_v58  ;;  %v929_v0 = vadd.f32 %v921_v21, %v907_v51  ;;  %v930_v2 = vadd.f32 %v922_v59, %v908_v44  ;;  %v944_v3 = vmul.f32 %v5820_v15, %v5950_v54  ;;  %v5247_v58 = vld [vmem:[%s7312_s8] sm:$0xff]  }
 0x16a   : > { %v861_v11 = vmul.f32 %v5959_v60, %v5815_v14  ;;  %v823_v4 = vadd.f32 %v815_v39, %v776_v62  ;;  %v816_v28 = vmul.f32 %v5907_v16, %v5856_v34  ;;  %v817_v25 = vmul.f32 %v5907_v16, %v5862_v45  ;;  %v4596_v14 = vld [vmem:[%s7308_s4] ss:$0 sm:$0xff] }
 0x16b   : > { %4918 = vmatprep.subr.bf16.mxu0 %v969_v38  ;;  %v951_v12 = vadd.f32 %v943_v63, %v929_v0  ;;  %v952_v22 = vadd.f32 %v944_v3, %v930_v2  ;;  %v777_v27 = vmul.f32 %v5912_v17, %v5781_v1  ;;  %v818_v30 = vmul.f32 %v5907_v16, %v795_v10 }
 0x16c   : > { %4919 = vmatpush3.bf16.msra.mxu0 %v969_v38  ;;  %v869_v13 = vadd.f32 %v861_v11, %v822_v29  ;;  %v870_v24 = vadd.f32 %v862_v61, %v823_v4  ;;  %v819_v31 = vmul.f32 %v5907_v16, %v794_v6  ;;  %v778_v34 = vmul.f32 %v5912_v17, %v5809_v48 }
 0x16d   : > { %v965_v26 = vadd.f32 %v5845_v49, %v951_v12  ;;  %v966_v15 = vadd.f32 %v5845_v49, %v952_v22  ;;  %v864_v45 = vmul.f32 %v5959_v60, %v5873_v50  ;;  %v866_v32 = vmul.f32 %v5959_v60, %v840_v19 }
 0x16e   : > { %v883_v35 = vadd.f32 %v4596_v14, %v869_v13  ;;  %v884_v36 = vadd.f32 %v4596_v14, %v870_v24  ;;  %v779_v1 = vmul.f32 %v5912_v17, %v5827_v18  ;;  %v780_v6 = vmul.f32 %v5912_v17, %v5852_v41  ;;  %v5246_v18 = vld [vmem:[%s7309_s5 + $0x8] sm:$0xff]  }
 0x16f   : > { %v970_v49 = vpack.c.bf16 %v966_v15, %v965_v26  ;;  %v824_v10 = vadd.f32 %v816_v28, %v777_v27  ;;  %v825_v48 = vadd.f32 %v817_v25, %v778_v34  ;;  %v863_v19 = vmul.f32 %v5959_v60, %v5866_v46 }
 0x170   : > { %v826_v50 = vadd.f32 %v818_v30, %v779_v1  ;;  %v827_v37 = vadd.f32 %v819_v31, %v780_v6  ;;  %v820_v43 = vmul.f32 %v5907_v16, %v793_v53  ;;  %v821_v20 = vmul.f32 %v5907_v16, %v792_v9 }
 0x171   : > { %4920 = vmatprep.subr.bf16.mxu0 %v970_v49  ;;  %v872_v40 = vadd.f32 %v864_v45, %v825_v48  ;;  %v865_v41 = vmul.f32 %v5959_v60, %v5918_v23  ;;  %v1031_v52 = vpack.c.bf16 %v884_v36, %v883_v35  ;;  %v871_v51 = vadd.f32 %v863_v19, %v824_v10 }
 0x172   : > { %4921 = vmatpush3.bf16.msra.mxu0 %v970_v49  ;;  %v874_v39 = vadd.f32 %v866_v32, %v827_v37  ;;  %v781_v46 = vmul.f32 %v5912_v17, %v5869_v47  ;;  %v782_v16 = vmul.f32 %v5912_v17, %v5760_v55  ;;  %v867_v21 = vmul.f32 %v5959_v60, %v5936_v42  ;;  %v5249_v42 = vld [vmem:[%s7312_s8 + $0x8] sm:$0xff]  }
 0x173   : > { %4926 = vmatprep.subr.bf16.mxu0 %v5245_v33  ;;  %v873_v9 = vadd.f32 %v865_v41, %v826_v50  ;;  %v886_v53 = vadd.f32 %v4596_v14, %v872_v40  ;;  %v868_v47 = vmul.f32 %v5959_v60, %v5950_v54  ;;  %v885_v55 = vadd.f32 %v4596_v14, %v871_v51  ;;  %v5250_v54 = vld [vmem:[%s7313_s9 + $0x8] sm:$0xff]  }
 0x174   : > { %v828_v44 = vadd.f32 %v820_v43, %v781_v46  ;;  %v829_v23 = vadd.f32 %v821_v20, %v782_v16  ;;  %v888_v7 = vadd.f32 %v4596_v14, %v874_v39  ;;  %4948 = vmatprep.subr.bf16.mxu1 %v5250_v54 }
 0x175   : > { %4923 = vmatmul.mubr.msk.bf16.vlgmr.msra.gmra.mrb[0].mxu0 %vm971_vm3, %v5733_v8  ;;  %v887_v17 = vadd.f32 %v4596_v14, %v873_v9  ;;  %v1032_v59 = vpack.c.bf16 %v886_v53, %v885_v55  ;;  %4949 = vmatpush3.bf16.msra.mxu1 %v5250_v54 }
 0x176   : > { %4927 = vmatpush3.bf16.msra.mxu0 %v5245_v33  ;;  %4930 = vmatprep.mubr.msk.bf16.mxu0 %vm631_vm0, %v1031_v52  ;;  %v875_v61 = vadd.f32 %v867_v21, %v828_v44  ;;  %v876_v63 = vadd.f32 %v868_v47, %v829_v23 }
 0x177   : > { %4928 = vmatprep.subr.bf16.mxu0 %v5246_v18  ;;  %v1033_v62 = vpack.c.bf16 %v888_v7, %v887_v17 }
 0x178   : > { %v889_v29 = vadd.f32 %v4596_v14, %v875_v61  ;;  %v890_v38 = vadd.f32 %v4596_v14, %v876_v63 }
 0x17a   : > { %4929 = vmatpush3.bf16.msra.mxu0 %v5246_v18  ;;  %v1034_v0 = vpack.c.bf16 %v890_v38, %v889_v29 }
 0x17b   : > { %4938 = vmatprep.subr.bf16.mxu0 %v5247_v58 }
 0x17d   : > { %4931 = vmatmul.mubr.msk.bf16.vlgmr.msra.gmra.mrb[4].mxu0 %vm631_vm0, %v1032_v59 }
 0x17e   : > { %4934 = vmatprep.mubr.msk.bf16.mxu0 %vm631_vm0, %v1033_v62  ;;  %4939 = vmatpush3.bf16.msra.mxu0 %v5247_v58 }
 0x17f   : > { %4940 = vmatprep.subr.bf16.mxu0 %v5249_v42 }
 0x182   : > { %4941 = vmatpush3.bf16.msra.mxu0 %v5249_v42 }
 0x185   : > { %4935 = vmatmul.mubr.msk.bf16.gmra.mrb[8].mxu0 %vm631_vm0, %v1034_v0 }
 0x248   : > { %v4924_v60 = vpop.f32.mrb[0].mxu0 }
 0x249   : > { %v1012_v2 = vpop.f32.mrb[1].mxu0 }
 0x24a   : > { %v4925_v3 = vpop.f32.mrb[2].mxu0 }
 0x24b   : > { %v1129_v11 = vpack.c.bf16 %v4925_v3, %v4924_v60  ;;  %v1015_v4 = vpop.f32.mrb[3].mxu0 }
 0x24c   : > { %v1128_v12 = vpack.c.bf16 %v1015_v4, %v1012_v2 }
 0x24e   : > { %4942 = vmatprep.mubr.msk.bf16.mxu0 %vm631_vm0, %v1128_v12  ;;  %4950 = vmatprep.mubr.msk.bf16.mxu1 %vm631_vm0, %v1128_v12 }
 0x24f   : > { %4943 = vmatmul.mubr.msk.bf16.vlgmr.msra.gmra.mrb[12].mxu0 %vm631_vm0, %v1129_v11  ;;  %4951 = vmatmul.mubr.msk.bf16.vlgmr.msra.gmra.mrb[0].mxu1 %vm631_vm0, %v1129_v11 }
 0x250   : > { %v4932_v22 = vpop.f32.mrb[4].mxu0 }
 0x251   : > { %v1093_v13 = vpop.f32.mrb[5].mxu0 }
 0x252   : > { %v4933_v24 = vpop.f32.mrb[6].mxu0 }
 0x253   : > { %v6036_v28 = vpack.c.bf16 %v4933_v24, %v4932_v22  ;;  %v1096_v25 = vpop.f32.mrb[7].mxu0 }
 0x254   : > { %v6038_v26 = vpack.c.bf16 %v1096_v25, %v1093_v13 }
 0x256   : > { %4958 = vmatprep.mubr.msk.bf16.mxu0 %vm1270_vm10, %v6038_v26 }
 0x258   : > { %v4936_v15 = vpop.f32.mrb[8].mxu0 }
 0x259   : > { %v1109_v14 = vpop.f32.mrb[9].mxu0 }
 0x25a   : > { %v4937_v27 = vpop.f32.mrb[10].mxu0 }
 0x25b   : > { %v6042_v30 = vpack.c.bf16 %v4937_v27, %v4936_v15  ;;  %v1112_v31 = vpop.f32.mrb[11].mxu0 }
 0x25c   : > { %v6044_v34 = vpack.c.bf16 %v1112_v31, %v1109_v14 }
 0x322   : > { %v4944_v45 = vpop.f32.mrb[12].mxu0  ;;  %v4952_v32 = vpop.f32.mrb[0].mxu1 }
 0x323   : > { %v1182_v49 = vpop.f32.mrb[13].mxu0  ;;  %v1247_v33 = vpop.f32.mrb[1].mxu1 }
 0x324   : > { %v4945_v35 = vpop.f32.mrb[14].mxu0  ;;  %v4953_v36 = vpop.f32.mrb[2].mxu1 }
 0x325   : > { %v6046_v1 = vpack.c.bf16 %v4945_v35, %v4944_v45  ;;  %v6048_v6 = vpack.c.bf16 %v4953_v36, %v4952_v32  ;;  %v1185_v10 = vpop.f32.mrb[15].mxu0  ;;  %v1250_v48 = vpop.f32.mrb[3].mxu1 }
 0x326   : > { %v6050_v50 = vpack.c.bf16 %v1185_v10, %v1182_v49  ;;  %v6052_v37 = vpack.c.bf16 %v1250_v48, %v1247_v33 }
 0x327   : > { %v1287_v40 = vsel %vm1270_vm10, %v6046_v1, 0 }
 0x328   : > { %5186 = vmatprep.subr.msk.bf16.mxu0 %vm1270_vm10, %v6050_v50  ;;  %4966 = vmatprep.subr.bf16.mxu1 %v6052_v37  ;;  %v1284_v19 = vsel %vm1270_vm10, %v6050_v50, 0 }
 0x329   : > { %4955 = vmatpush3.bf16.xpose.msra.mxu0 %v1284_v19  ;;  %4967 = vmatpush3.bf16.msra.mxu1 %v6052_v37 }
 0x32a   : > { %5187 = vmatprep.subr.msk.bf16.mxu0 %vm1270_vm10, %v6046_v1  ;;  %4968 = vmatprep.subr.bf16.mxu1 %v6048_v6 }
 0x32d   : > { %4969 = vmatpush3.bf16.msra.mxu1 %v6048_v6 }
 0x331   : > { %4957 = vmatpush3.bf16.xpose.msra.mxu0 %v1287_v40 }
 0x338   : > { %4959 = vmatmul.mubr.msk.bf16.vlgmr.msra.gmra.mrb[16].mxu0 %vm1270_vm10, %v6036_v28 }
 0x339   : > { %4962 = vmatprep.mubr.msk.bf16.mxu0 %vm1270_vm10, %v6044_v34 }
 0x340   : > { %4963 = vmatmul.mubr.msk.bf16.gmra.mrb[20].mxu0 %vm1270_vm10, %v6042_v30 }
 0x40b   : > { %v4960_v43 = vpop.f32.mrb[16].mxu0 }
 0x40c   : > { %v1323_v20 = vpop.f32.mrb[17].mxu0  ;;  %v1356_v39 = vmul.f32 0.25, %v4960_v43 }
 0x40d   : > { %v1354_v18 = vmul.f32 0.25, %v1323_v20  ;;  %v4961_v41 = vpop.f32.mrb[18].mxu0 }
 0x40e   : > { %v1326_v52 = vpop.f32.mrb[19].mxu0  ;;  %v1357_v16 = vmul.f32 0.25, %v4961_v41  ;;  %v1368_v44 = vsel %vm631_vm0, %v1356_v39, -inf }
 0x40f   : > { %v1355_v51 = vmul.f32 0.25, %v1326_v52  ;;  %v1362_v46 = vsel %vm631_vm0, %v1354_v18, -inf }
 0x410   : > { %1363 = vmax.xlane.f32.xlu0 %v1362_v46  ;;  %v1371_v21 = vsel %vm631_vm0, %v1357_v16, -inf }
 0x411   : > { %v1365_v9 = vsel %vm631_vm0, %v1355_v51, -inf }
 0x412   : > { %1366 = vmax.xlane.f32.xlu1 %v1365_v9 }
 0x413   : > { %v4964_v53 = vpop.f32.mrb[20].mxu0 }
 0x414   : > { %1369 = vmax.xlane.f32.xlu0 %v1368_v44  ;;  %v1339_v23 = vpop.f32.mrb[21].mxu0  ;;  %v1360_v55 = vmul.f32 0.25, %v4964_v53 }
 0x415   : > { %v1358_v58 = vmul.f32 0.25, %v1339_v23  ;;  %v4965_v7 = vpop.f32.mrb[22].mxu0 }
 0x416   : > { %1372 = vmax.xlane.f32.xlu1 %v1371_v21  ;;  %v1342_v47 = vpop.f32.mrb[23].mxu0  ;;  %v1361_v61 = vmul.f32 0.25, %v4965_v7  ;;  %v1380_v62 = vsel %vm631_vm0, %v1360_v55, -inf }
 0x417   : > { %v1359_v17 = vmul.f32 0.25, %v1342_v47  ;;  %v1374_v59 = vsel %vm631_vm0, %v1358_v58, -inf }
 0x418   : > { %1375 = vmax.xlane.f32.xlu0 %v1374_v59  ;;  %v1383_v29 = vsel %vm631_vm0, %v1361_v61, -inf }
 0x419   : > { %v1377_v63 = vsel %vm631_vm0, %v1359_v17, -inf }
 0x41a   : > { %1378 = vmax.xlane.f32.xlu1 %v1377_v63 }
 0x41c   : > { %1381 = vmax.xlane.f32.xlu0 %v1380_v62 }
 0x41e   : > { %1384 = vmax.xlane.f32.xlu1 %v1383_v29 }
 0x49d   : > { %v1364_v38 = vpop.xlane.xlu0 %1363 }
 0x49e   : > { %v1386_v0 = vsub.f32 %v1354_v18, %v1364_v38 }
 0x49f   : > { %v1367_v42 = vpop.xlane.xlu1 %1366 }
 0x4a0   : > { %v1387_v60 = vsub.f32 %v1355_v51, %v1367_v42  ;;  %v1394_v3 = vmul.f32 1.442695, %v1386_v0 }
 0x4a1   : > { %v1370_v54 = vpop.xlane.xlu0 %1369 }
 0x4a2   : > { %v1388_v2 = vsub.f32 %v1356_v39, %v1370_v54  ;;  %v1396_v13 = vmul.f32 1.442695, %v1387_v60 }
 0x4a3   : > { %v1373_v11 = vpop.xlane.xlu1 %1372 }
 0x4a4   : > { %v1398_v4 = vmul.f32 1.442695, %v1388_v2  ;;  %v1389_v12 = vsub.f32 %v1357_v16, %v1373_v11 }
 0x4a5   : > { %v1376_v22 = vpop.xlane.xlu0 %1375 }
 0x4a6   : > { %5297 = vpow2.f32 %v1398_v4  ;;  %v1400_v24 = vmul.f32 1.442695, %v1389_v12  ;;  %v1390_v25 = vsub.f32 %v1358_v58, %v1376_v22 }
 0x4a7   : > { %5299 = vpow2.f32 %v1394_v3  ;;  %v1379_v18 = vpop.xlane.xlu1 %1378 }
 0x4a8   : > { %5301 = vpow2.f32 %v1400_v24  ;;  %v1402_v27 = vmul.f32 1.442695, %v1390_v25  ;;  %v1391_v39 = vsub.f32 %v1359_v17, %v1379_v18 }
 0x4a9   : > { %v1382_v15 = vpop.xlane.xlu0 %1381  ;;  %5303 = vpow2.f32 %v1396_v13 }
 0x4aa   : > { %v1392_v14 = vsub.f32 %v1360_v55, %v1382_v15  ;;  %v1404_v46 = vmul.f32 1.442695, %v1391_v39 }
 0x4ab   : > { %v1385_v41 = vpop.xlane.xlu1 %1384 }
 0x4ac   : > { %v1406_v31 = vmul.f32 1.442695, %v1392_v14  ;;  %v1393_v52 = vsub.f32 %v1361_v61, %v1385_v41 }
 0x4ae   : > { %5305 = vpow2.f32 %v1406_v31  ;;  %v1408_v51 = vmul.f32 1.442695, %v1393_v52 }
 0x4af   : > { %5307 = vpow2.f32 %v1402_v27 }
 0x4b0   : > { %v5298_v45 = vpop.eup %5297  ;;  %5309 = vpow2.f32 %v1408_v51 }
 0x4b1   : > { %v5300_v32 = vpop.eup %5299  ;;  %v1416_v49 = vsel %vm631_vm0, %v5298_v45, 0.0  ;;  %5311 = vpow2.f32 %v1404_v46 }
 0x4b2   : > { %v5302_v33 = vpop.eup %5301  ;;  %1417 = vadd.xlane.f32.xlu0 %v1416_v49  ;;  %v1410_v10 = vsel %vm631_vm0, %v5300_v32, 0.0 }
 0x4b3   : > { %v1419_v35 = vsel %vm631_vm0, %v5302_v33, 0.0  ;;  %v5304_v36 = vpop.eup %5303 }
 0x4b4   : > { %1420 = vadd.xlane.f32.xlu1 %v1419_v35  ;;  %v1413_v48 = vsel %vm631_vm0, %v5304_v36, 0.0 }
 0x4b6   : > { %1411 = vadd.xlane.f32.xlu0 %v1410_v10 }
 0x4b8   : > { %v6084_v19 = vpop.eup %5305  ;;  %1414 = vadd.xlane.f32.xlu1 %v1413_v48 }
 0x4b9   : > { %v1428_v40 = vsel %vm631_vm0, %v6084_v19, 0.0  ;;  %v6088_v43 = vpop.eup %5307 }
 0x4ba   : > { %1429 = vadd.xlane.f32.xlu0 %v1428_v40  ;;  %v1422_v20 = vsel %vm631_vm0, %v6088_v43, 0.0  ;;  %v5310_v16 = vpop.eup %5309 }
 0x4bb   : > { %v1431_v9 = vsel %vm631_vm0, %v5310_v16, 0.0  ;;  %v5312_v53 = vpop.eup %5311 }
 0x4be   : > { %1423 = vadd.xlane.f32.xlu0 %v1422_v20 }
 0x4c9   : > { %1547 = vrot.lane.b32.xlu1 %v6046_v1, %s5554_s26  ;;  %v1425_v1 = vsel %vm631_vm0, %v5312_v53, 0.0 }
 0x4d4   : > { %1545 = vrot.lane.b32.xlu0 %v6050_v50, %s5554_s26 }
 0x4d8   : > { %1539 = vrot.lane.b32.xlu0 %v6044_v34, %s5554_s26 }
 0x4ed   : > { %1432 = vadd.xlane.f32.xlu1 %v1431_v9 }
 0x4f1   : > { %1426 = vadd.xlane.f32.xlu1 %v1425_v1 }
 0x502   : > { %1535 = vrot.lane.b32.xlu1 %v6038_v26, %s5554_s26 }
 0x506   : > { %1537 = vrot.lane.b32.xlu1 %v6036_v28, %s5554_s26 }
 0x50a   : > { %1541 = vrot.lane.b32.xlu1 %v6042_v30, %s5554_s26 }
 0x53f   : > { %v1418_v34 = vpop.xlane.xlu0 %1417 }
 0x541   : > { %v1421_v50 = vpop.xlane.xlu1 %1420 }
 0x542   : > { %5313 = vrcp.f32 %v1421_v50 }
 0x543   : > { %v1412_v44 = vpop.xlane.xlu0 %1411 }
 0x544   : > { %5315 = vrcp.f32 %v1412_v44 }
 0x545   : > { %5317 = vrcp.f32 %v1418_v34  ;;  %v1415_v23 = vpop.xlane.xlu1 %1414 }
 0x546   : > { %5319 = vrcp.f32 %v1415_v23 }
 0x547   : > { %v1430_v58 = vpop.xlane.xlu0 %1429 }
 0x549   : > { %v1548_v38 = vpop.permute.xlu1 %1547 }
 0x54a   : > { %v1565_v0 = vsel %vm1270_vm10, %v1548_v38, 0 }
 0x54b   : > { %v1424_v7 = vpop.xlane.xlu0 %1423 }
 0x54c   : > { %v5314_v21 = vpop.eup %5313 }
 0x54d   : > { %v1445_v59 = vmul.f32 %v5314_v21, %v5302_v33 }
 0x54e   : > { %v5316_v47 = vpop.eup %5315 }
 0x54f   : > { %v5318_v55 = vpop.eup %5317  ;;  %v1546_v26 = vpop.permute.xlu0 %1545  ;;  %v1442_v28 = vmul.f32 %v5316_v47, %v5300_v32 }
 0x550   : > { %v5320_v17 = vpop.eup %5319  ;;  %5188 = vmatprep.subr.msk.bf16.mxu1 %vm1270_vm10, %v1546_v26  ;;  %v1444_v61 = vmul.f32 %v5318_v55, %v5298_v45  ;;  %v1562_v29 = vsel %vm1270_vm10, %v1546_v26, 0 }
 0x551   : > { %v1443_v30 = vmul.f32 %v5320_v17, %v5304_v36 }
 0x552   : > { %v1451_v62 = vpack.c.bf16 %v1445_v59, %v1444_v61 }
 0x553   : > { %v1450_v63 = vpack.c.bf16 %v1443_v30, %v1442_v28  ;;  %v1540_v27 = vpop.permute.xlu0 %1539 }
 0x555   : > { %4970 = vmatprep.mubr.msk.bf16.mxu1 %vm631_vm0, %v1450_v63 }
 0x556   : > { %4971 = vmatmul.mubr.msk.bf16.vlgmr.msra.gmra.mrb[4].mxu1 %vm631_vm0, %v1451_v62 }
 0x557   : > { %4979 = vmatpush3.bf16.xpose.msra.mxu1 %v1562_v29 }
 0x558   : > { %5189 = vmatprep.subr.msk.bf16.mxu1 %vm1270_vm10, %v1548_v38 }
 0x55f   : > { %4981 = vmatpush3.bf16.xpose.msra.mxu1 %v1565_v0 }
 0x57a   : > { %v1433_v42 = vpop.xlane.xlu1 %1432 }
 0x57b   : > { %5321 = vrcp.f32 %v1433_v42 }
 0x57c   : > { %5323 = vrcp.f32 %v1424_v7 }
 0x57d   : > { %5325 = vrcp.f32 %v1430_v58 }
 0x57e   : > { %v1427_v54 = vpop.xlane.xlu1 %1426 }
 0x57f   : > { %5327 = vrcp.f32 %v1427_v54 }
 0x582   : > { %v1536_v15 = vpop.permute.xlu1 %1535 }
 0x585   : > { %v5322_v60 = vpop.eup %5321 }
 0x586   : > { %v5324_v2 = vpop.eup %5323  ;;  %v1449_v4 = vmul.f32 %v5322_v60, %v5310_v16  ;;  %v1538_v14 = vpop.permute.xlu1 %1537 }
 0x587   : > { %v5326_v3 = vpop.eup %5325  ;;  %v1446_v12 = vmul.f32 %v5324_v2, %v6088_v43 }
 0x588   : > { %v1448_v13 = vmul.f32 %v5326_v3, %v6084_v19 }
 0x589   : > { %v5328_v11 = vpop.eup %5327 }
 0x58a   : > { %v1447_v22 = vmul.f32 %v5328_v11, %v5312_v53  ;;  %v1453_v25 = vpack.c.bf16 %v1449_v4, %v1448_v13  ;;  %v1542_v31 = vpop.permute.xlu1 %1541 }
 0x58c   : > { %v1452_v24 = vpack.c.bf16 %v1447_v22, %v1446_v12 }
 0x58e   : > { %4974 = vmatprep.mubr.msk.bf16.mxu1 %vm631_vm0, %v1452_v24 }
 0x58f   : > { %4975 = vmatmul.mubr.msk.bf16.gmra.mrb[8].mxu1 %vm631_vm0, %v1453_v25 }
 0x590   : > { %4982 = vmatprep.mubr.msk.bf16.mxu1 %vm1270_vm10, %v1536_v15 }
 0x597   : > { %4983 = vmatmul.mubr.msk.bf16.vlgmr.msra.gmra.mrb[12].mxu1 %vm1270_vm10, %v1538_v14 }
 0x598   : > { %4986 = vmatprep.mubr.msk.bf16.mxu1 %vm1270_vm10, %v1540_v27 }
 0x59f   : > { %4987 = vmatmul.mubr.msk.bf16.gmra.mrb[16].mxu1 %vm1270_vm10, %v1542_v31 }
 0x629   : > { %v6120_v45 = vpop.f32.mrb[4].mxu1 }
 0x62a   : > { %v6122_v32 = vpop.f32.mrb[5].mxu1 }
 0x62b   : > { %v6124_v49 = vpop.f32.mrb[6].mxu1 }
 0x62c   : > { %v6126_v33 = vpop.f32.mrb[7].mxu1 }
 0x662   : > { %v6128_v35 = vpop.f32.mrb[8].mxu1 }
 0x663   : > { %v6130_v36 = vpop.f32.mrb[9].mxu1 }
 0x664   : > { %v6132_v10 = vpop.f32.mrb[10].mxu1 }
 0x665   : > { %v6134_v48 = vpop.f32.mrb[11].mxu1 }
 0x66a   : > { %v4984_v19 = vpop.f32.mrb[12].mxu1 }
 0x66b   : > { %v1601_v40 = vpop.f32.mrb[13].mxu1  ;;  %v1634_v41 = vmul.f32 0.25, %v4984_v19 }
 0x66c   : > { %v1632_v43 = vmul.f32 0.25, %v1601_v40  ;;  %v4985_v20 = vpop.f32.mrb[14].mxu1 }
 0x66d   : > { %v1604_v18 = vpop.f32.mrb[15].mxu1  ;;  %v1635_v46 = vmul.f32 0.25, %v4985_v20  ;;  %v1646_v9 = vsel %vm631_vm0, %v1634_v41, -inf }
 0x66e   : > { %v1633_v52 = vmul.f32 0.25, %v1604_v18  ;;  %v1640_v39 = vsel %vm631_vm0, %v1632_v43, -inf }
 0x66f   : > { %1641 = vmax.xlane.f32.xlu0 %v1640_v39  ;;  %v1649_v23 = vsel %vm631_vm0, %v1635_v46, -inf }
 0x670   : > { %v1643_v51 = vsel %vm631_vm0, %v1633_v52, -inf }
 0x671   : > { %1644 = vmax.xlane.f32.xlu1 %v1643_v51 }
 0x672   : > { %v4988_v16 = vpop.f32.mrb[16].mxu1 }
 0x673   : > { %1647 = vmax.xlane.f32.xlu0 %v1646_v9  ;;  %v1617_v53 = vpop.f32.mrb[17].mxu1  ;;  %v1638_v21 = vmul.f32 0.25, %v4988_v16 }
 0x674   : > { %v4989_v1 = vpop.f32.mrb[18].mxu1  ;;  %v1636_v50 = vmul.f32 0.25, %v1617_v53 }
 0x675   : > { %v1620_v34 = vpop.f32.mrb[19].mxu1  ;;  %v1639_v58 = vmul.f32 0.25, %v4989_v1  ;;  %v1658_v26 = vsel %vm631_vm0, %v1638_v21, -inf }
 0x676   : > { %v1637_v44 = vmul.f32 0.25, %v1620_v34  ;;  %v1652_v47 = vsel %vm631_vm0, %v1636_v50, -inf }
 0x677   : > { %1650 = vmax.xlane.f32.xlu0 %v1649_v23  ;;  %v1661_v55 = vsel %vm631_vm0, %v1639_v58, -inf }
 0x678   : > { %v1655_v7 = vsel %vm631_vm0, %v1637_v44, -inf }
 0x679   : > { %1656 = vmax.xlane.f32.xlu1 %v1655_v7 }
 0x67b   : > { %1653 = vmax.xlane.f32.xlu0 %v1652_v47 }
 0x67d   : > { %1662 = vmax.xlane.f32.xlu1 %v1661_v55 }
 0x67f   : > { %1659 = vmax.xlane.f32.xlu0 %v1658_v26 }
 0x6fc   : > { %v1642_v17 = vpop.xlane.xlu0 %1641 }
 0x6fd   : > { %v1664_v59 = vsub.f32 %v1632_v43, %v1642_v17 }
 0x6fe   : > { %v1645_v28 = vpop.xlane.xlu1 %1644 }
 0x6ff   : > { %v1672_v63 = vmul.f32 1.442695, %v1664_v59  ;;  %v1665_v62 = vsub.f32 %v1633_v52, %v1645_v28 }
 0x700   : > { %v1648_v30 = vpop.xlane.xlu0 %1647 }
 0x701   : > { %v1666_v61 = vsub.f32 %v1634_v41, %v1648_v30  ;;  %v1674_v54 = vmul.f32 1.442695, %v1665_v62 }
 0x703   : > { %v1676_v29 = vmul.f32 1.442695, %v1666_v61 }
 0x704   : > { %v1651_v38 = vpop.xlane.xlu0 %1650 }
 0x705   : > { %5329 = vpow2.f32 %v1676_v29  ;;  %v1667_v0 = vsub.f32 %v1635_v46, %v1651_v38 }
 0x706   : > { %v1657_v42 = vpop.xlane.xlu1 %1656  ;;  %5331 = vpow2.f32 %v1672_v63 }
 0x707   : > { %v1678_v60 = vmul.f32 1.442695, %v1667_v0  ;;  %v1669_v3 = vsub.f32 %v1637_v44, %v1657_v42 }
 0x708   : > { %v1654_v2 = vpop.xlane.xlu0 %1653 }
 0x709   : > { %5333 = vpow2.f32 %v1678_v60  ;;  %v1668_v4 = vsub.f32 %v1636_v50, %v1654_v2  ;;  %v1682_v25 = vmul.f32 1.442695, %v1669_v3 }
 0x70a   : > { %v1663_v11 = vpop.xlane.xlu1 %1662  ;;  %5335 = vpow2.f32 %v1674_v54 }
 0x70b   : > { %v1671_v12 = vsub.f32 %v1639_v58, %v1663_v11  ;;  %v1680_v14 = vmul.f32 1.442695, %v1668_v4 }
 0x70c   : > { %v1660_v22 = vpop.xlane.xlu0 %1659 }
 0x70d   : > { %v1686_v13 = vmul.f32 1.442695, %v1671_v12  ;;  %v1670_v24 = vsub.f32 %v1638_v21, %v1660_v22  ;;  %v5251_v22 = vld [vmem:[%s7314_s10] sm:$0xff]  }
 0x70e   : > { %5002 = vmatprep.subr.bf16.mxu1 %v5251_v22 }
 0x70f   : > { %v6144_v15 = vpop.eup %5329  ;;  %5337 = vpow2.f32 %v1686_v13  ;;  %v1684_v27 = vmul.f32 1.442695, %v1670_v24  ;;  %5003 = vmatpush3.bf16.msra.mxu1 %v5251_v22  ;;  %v5252_v24 = vld [vmem:[%s7314_s10 + $0x8] sm:$0xff]  }
 0x710   : > { %v1694_v31 = vsel %vm631_vm0, %v6144_v15, 0.0  ;;  %v5332_v19 = vpop.eup %5331  ;;  %5004 = vmatprep.subr.bf16.mxu1 %v5252_v24 }
 0x711   : > { %5339 = vpow2.f32 %v1684_v27  ;;  %1695 = vadd.xlane.f32.xlu0 %v1694_v31  ;;  %v1688_v43 = vsel %vm631_vm0, %v5332_v19, 0.0 }
 0x712   : > { %5341 = vpow2.f32 %v1682_v25 }
 0x713   : > { %v5334_v40 = vpop.eup %5333  ;;  %5343 = vpow2.f32 %v1680_v14  ;;  %5005 = vmatpush3.bf16.msra.mxu1 %v5252_v24 }
 0x714   : > { %v1697_v20 = vsel %vm631_vm0, %v5334_v40, 0.0  ;;  %v5336_v18 = vpop.eup %5335 }
 0x715   : > { %1689 = vadd.xlane.f32.xlu0 %v1688_v43  ;;  %1698 = vadd.xlane.f32.xlu1 %v1697_v20  ;;  %v1691_v41 = vsel %vm631_vm0, %v5336_v18, 0.0 }
 0x719   : > { %v5338_v52 = vpop.eup %5337  ;;  %1692 = vadd.xlane.f32.xlu1 %v1691_v41 }
 0x71a   : > { %v1709_v16 = vsel %vm631_vm0, %v5338_v52, 0.0 }
 0x71b   : > { %v5340_v39 = vpop.eup %5339 }
 0x71c   : > { %v5342_v51 = vpop.eup %5341  ;;  %v1706_v46 = vsel %vm631_vm0, %v5340_v39, 0.0 }
 0x71d   : > { %v5344_v9 = vpop.eup %5343  ;;  %1707 = vadd.xlane.f32.xlu0 %v1706_v46  ;;  %1710 = vadd.xlane.f32.xlu1 %v1709_v16  ;;  %v1703_v1 = vsel %vm631_vm0, %v5342_v51, 0.0 }
 0x71e   : > { %v1700_v53 = vsel %vm631_vm0, %v5344_v9, 0.0 }
 0x721   : > { %1701 = vadd.xlane.f32.xlu0 %v1700_v53  ;;  %1704 = vadd.xlane.f32.xlu1 %v1703_v1 }
 0x732   : > { %1736 = vrot.lane.b32.xlu1 %v6048_v6, %s5554_s26 }
 0x737   : > { %1734 = vrot.lane.b32.xlu0 %v6052_v37, %s5554_s26 }
 0x79e   : > { %v1696_v34 = vpop.xlane.xlu0 %1695 }
 0x7a2   : > { %v1690_v50 = vpop.xlane.xlu0 %1689  ;;  %v1699_v44 = vpop.xlane.xlu1 %1698 }
 0x7a3   : > { %5345 = vrcp.f32 %v1690_v50 }
 0x7a6   : > { %v1693_v23 = vpop.xlane.xlu1 %1692 }
 0x7a7   : > { %5347 = vrcp.f32 %v1693_v23 }
 0x7a8   : > { %5349 = vrcp.f32 %v1699_v44 }
 0x7a9   : > { %5351 = vrcp.f32 %v1696_v34 }
 0x7aa   : > { %v1708_v58 = vpop.xlane.xlu0 %1707  ;;  %v1711_v7 = vpop.xlane.xlu1 %1710 }
 0x7ab   : > { %5353 = vrcp.f32 %v1708_v58 }
 0x7ac   : > { %5355 = vrcp.f32 %v1711_v7 }
 0x7ad   : > { %v5346_v55 = vpop.eup %5345 }
 0x7ae   : > { %v1702_v21 = vpop.xlane.xlu0 %1701  ;;  %v1705_v47 = vpop.xlane.xlu1 %1704  ;;  %v1720_v17 = vmul.f32 %v5346_v55, %v5332_v19 }
 0x7af   : > { %5357 = vrcp.f32 %v1702_v21 }
 0x7b0   : > { %5359 = vrcp.f32 %v1705_v47 }
 0x7b1   : > { %v5348_v6 = vpop.eup %5347 }
 0x7b2   : > { %v5350_v26 = vpop.eup %5349  ;;  %v1735_v37 = vpop.permute.xlu0 %1734  ;;  %v1721_v59 = vmul.f32 %v5348_v6, %v5336_v18 }
 0x7b3   : > { %4990 = vmatprep.subr.bf16.mxu0 %v1735_v37  ;;  %v5352_v28 = vpop.eup %5351  ;;  %v1737_v30 = vpop.permute.xlu1 %1736  ;;  %v1723_v63 = vmul.f32 %v5350_v26, %v5334_v40 }
 0x7b4   : > { %4991 = vmatpush3.bf16.msra.mxu0 %v1735_v37  ;;  %v1728_v61 = vpack.c.bf16 %v1721_v59, %v1720_v17  ;;  %v1722_v29 = vmul.f32 %v5352_v28, %v6144_v15 }
 0x7b5   : > { %4992 = vmatprep.subr.bf16.mxu0 %v1737_v30  ;;  %v5354_v62 = vpop.eup %5353 }
 0x7b6   : > { %4994 = vmatprep.mubr.msk.bf16.mxu0 %vm631_vm0, %v1728_v61  ;;  %v5356_v38 = vpop.eup %5355  ;;  %v1729_v42 = vpack.c.bf16 %v1723_v63, %v1722_v29  ;;  %v1726_v11 = vmul.f32 %v5354_v62, %v5340_v39  ;;  %v5537_v61 = vld [vmem:[%s5667_s20] sm:$0xff]  ;;  %v5538_v62 = vld [vmem:[%s5667_s20 + $0x10] sm:$0xff] }
 0x7b7   : > { %v1727_v4 = vmul.f32 %v5356_v38, %v5338_v52 }
 0x7b8   : > { %4993 = vmatpush3.bf16.msra.mxu0 %v1737_v30 }
 0x7b9   : > { %v5358_v0 = vpop.eup %5357  ;;  %v1731_v12 = vpack.c.bf16 %v1727_v4, %v1726_v11  ;;  %v5540_v11 = vld [vmem:[%s5667_s20 + $0x18] sm:$0xff] }
 0x7ba   : > { %v5360_v54 = vpop.eup %5359  ;;  %v1724_v60 = vmul.f32 %v5358_v0, %v5344_v9  ;;  %v5539_v0 = vld [vmem:[%s5667_s20 + $0x8] sm:$0xff] }
 0x7bb   : > { %4995 = vmatmul.mubr.msk.bf16.vlgmr.msra.gmra.mrb[24].mxu0 %vm631_vm0, %v1729_v42  ;;  %v1725_v2 = vmul.f32 %v5360_v54, %v5342_v51 }
 0x7bd   : > { %v1730_v3 = vpack.c.bf16 %v1725_v2, %v1724_v60 }
 0x7bf   : > { %4998 = vmatprep.mubr.msk.bf16.mxu0 %vm631_vm0, %v1730_v3 }
 0x7c3   : > { %4999 = vmatmul.mubr.msk.bf16.gmra.mrb[28].mxu0 %vm631_vm0, %v1731_v12 }
 0x88e   : > { %v4996_v13 = vpop.f32.mrb[24].mxu0 }
 0x88f   : > { %v1786_v25 = vpop.f32.mrb[25].mxu0 }
 0x890   : > { %v4997_v15 = vpop.f32.mrb[26].mxu0 }
 0x891   : > { %v5210_v14 = vpack.i.bf16 %v4997_v15, %v4996_v13  ;;  %v1789_v27 = vpop.f32.mrb[27].mxu0 }
 0x892   : > { %v5205_v31 = vpack.i.bf16 %v1789_v27, %v1786_v25  ;;  %v5541_v27 = vld [vmem:[%s5667_s20 + $0x20] sm:$0xff] }
 0x894   : > { %5206 = vrot.lane.b32.xlu1 %v5205_v31, %s5555_s22 }
 0x896   : > { %v5000_v19 = vpop.f32.mrb[28].mxu0 }
 0x897   : > { %v1802_v40 = vpop.f32.mrb[29].mxu0 }
 0x898   : > { %5211 = vrot.lane.b32.xlu1 %v5210_v14, %s5555_s22  ;;  %v5001_v43 = vpop.f32.mrb[30].mxu0 }
 0x899   : > { %v5220_v20 = vpack.i.bf16 %v5001_v43, %v5000_v19  ;;  %v1805_v18 = vpop.f32.mrb[31].mxu0  ;;  %v5542_v19 = vld [vmem:[%s5667_s20 + $0x28] sm:$0xff] }
 0x89a   : > { %v5215_v41 = vpack.i.bf16 %v1805_v18, %v1802_v40 }
 0x89c   : > { %5221 = vrot.lane.b32.xlu1 %v5220_v20, %s5555_s22  ;;  %5216 = vrot.lane.b32.xlu0 %v5215_v41, %s5555_s22  ;;  %v5543_v20 = vld [vmem:[%s5667_s20 + $0x38] sm:$0xff] }
 0x906   : > { %v5207_v52 = vpop.permute.xlu1 %5206 }
 0x907   : > { %v5209_v39 = vunpack.i.h.bf16 %v5207_v52  ;;  %v5208_v51 = vunpack.i.l.bf16 %v5207_v52  ;;  %v5544_v52 = vld [vmem:[%s5667_s20 + $0x30] sm:$0xff]  ;;  %s577_s20 = scalar_lea.vmem %s7322_s18, %s4588_s30 }
 0x909   : > { %v1850_v46 = vsel %vm1270_vm10, %v6126_v33, %v5209_v39  ;;  %v1849_v16 = vsel %vm1270_vm10, %v6122_v32, %v5208_v51 }
 0x90a   : > { %v1861_v9 = vpack.c.bf16 %v1850_v46, %v1849_v16  ;;  %v5212_v53 = vpop.permute.xlu1 %5211 }
 0x90b   : > { %v5214_v1 = vunpack.i.h.bf16 %v5212_v53  ;;  %v5213_v34 = vunpack.i.l.bf16 %v5212_v53 }
 0x90c   : > { %5006 = vmatprep.mubr.msk.bf16.mxu1 %vm631_vm0, %v1861_v9 }
 0x90d   : > { %v1852_v50 = vsel %vm1270_vm10, %v6124_v49, %v5214_v1  ;;  %v1851_v44 = vsel %vm1270_vm10, %v6120_v45, %v5213_v34 }
 0x90e   : > { %v1862_v23 = vpack.c.bf16 %v1852_v50, %v1851_v44  ;;  %v5222_v58 = vpop.permute.xlu1 %5221  ;;  %v5217_v7 = vpop.permute.xlu0 %5216 }
 0x90f   : > { %v5224_v21 = vunpack.i.h.bf16 %v5222_v58  ;;  %v5223_v33 = vunpack.i.l.bf16 %v5222_v58  ;;  %v5219_v47 = vunpack.i.h.bf16 %v5217_v7  ;;  %v5218_v55 = vunpack.i.l.bf16 %v5217_v7 }
 0x910   : > { %5007 = vmatmul.mubr.msk.bf16.vlgmr.msra.gmra.mrb[20].mxu1 %vm631_vm0, %v1862_v23 }
 0x911   : > { %v1856_v32 = vsel %vm1270_vm10, %v6132_v10, %v5224_v21  ;;  %v1855_v6 = vsel %vm1270_vm10, %v6128_v35, %v5223_v33  ;;  %v1854_v49 = vsel %vm1270_vm10, %v6134_v48, %v5219_v47  ;;  %v1853_v45 = vsel %vm1270_vm10, %v6130_v36, %v5218_v55  ;;  %v4633_v10 = vld [vmem:[%s7315_s11] ss:$0 sm:$0xff] }
 0x912   : > { %v1864_v26 = vpack.c.bf16 %v1856_v32, %v1855_v6  ;;  %v1863_v37 = vpack.c.bf16 %v1854_v49, %v1853_v45 }
 0x914   : > { %5010 = vmatprep.mubr.msk.bf16.mxu1 %vm631_vm0, %v1863_v37 }
 0x918   : > { %5011 = vmatmul.mubr.msk.bf16.gmra.mrb[24].mxu1 %vm631_vm0, %v1864_v26 }
 0x9e3   : > { %v5008_v17 = vpop.f32.mrb[20].mxu1 }
 0x9e4   : > { %v1930_v35 = vpop.f32.mrb[21].mxu1  ;;  %v1939_v59 = vadd.f32 %v5008_v17, %v4633_v10 }
 0x9e5   : > { %v1931_v28 = vadd.f32 %v4633_v10, %v1930_v35  ;;  %v5009_v48 = vpop.f32.mrb[22].mxu1 }
 0x9e6   : > { %v1933_v30 = vpop.f32.mrb[23].mxu1  ;;  %v6201_v29 = vadd.f32 %v5538_v62, %v1939_v59  ;;  %v1942_v38 = vadd.f32 %v5009_v48, %v4633_v10 }
 0x9e7   : > { %v6198_v36 = vadd.f32 %v5537_v61, %v1931_v28  ;;  %v1934_v63 = vadd.f32 %v4633_v10, %v1933_v30 }
 0x9e8   : > { %v6211_v4 = vadd.f32 %v5540_v11, %v1942_v38  ;;  %v1977_v13 = vsel %vm631_vm0, %v6201_v29, 0.0 }
 0x9e9   : > { %v6204_v42 = vadd.f32 %v5539_v0, %v1934_v63  ;;  %v1971_v54 = vsel %vm631_vm0, %v6198_v36, 0.0 }
 0x9ea   : > { %1972 = vadd.xlane.f32.xlu0 %v1971_v54  ;;  %v1980_v43 = vsel %vm631_vm0, %v6211_v4, 0.0 }
 0x9eb   : > { %v5012_v60 = vpop.f32.mrb[24].mxu1  ;;  %v1974_v2 = vsel %vm631_vm0, %v6204_v42, 0.0 }
 0x9ec   : > { %1975 = vadd.xlane.f32.xlu1 %v1974_v2  ;;  %v1946_v3 = vpop.f32.mrb[25].mxu1  ;;  %v1955_v14 = vadd.f32 %v5012_v60, %v4633_v10 }
 0x9ed   : > { %v1947_v12 = vadd.f32 %v4633_v10, %v1946_v3  ;;  %v5013_v22 = vpop.f32.mrb[26].mxu1 }
 0x9ee   : > { %1978 = vadd.xlane.f32.xlu0 %v1977_v13  ;;  %v1949_v24 = vpop.f32.mrb[27].mxu1  ;;  %v1958_v25 = vadd.f32 %v5013_v22, %v4633_v10  ;;  %v6229_v39 = vadd.f32 %v5544_v52, %v1955_v14 }
 0x9ef   : > { %v1950_v15 = vadd.f32 %v4633_v10, %v1949_v24  ;;  %v6216_v31 = vadd.f32 %v5541_v27, %v1947_v12 }
 0x9f0   : > { %v6224_v18 = vadd.f32 %v5543_v20, %v1958_v25  ;;  %v1989_v16 = vsel %vm631_vm0, %v6229_v39, 0.0  ;;  %v5253_v25 = vld [vmem:[%s7318_s14] sm:$0xff]  }
 0x9f1   : > { %v6219_v40 = vadd.f32 %v5542_v19, %v1950_v15  ;;  %v1983_v51 = vsel %vm631_vm0, %v6216_v31, 0.0  ;;  %v5254_v15 = vld [vmem:[%s7318_s14 + $0x8] sm:$0xff]   ;;  %5014 = vmatprep.subr.bf16.mxu0 %v5253_v25 }
 0x9f2   : > { %1981 = vadd.xlane.f32.xlu0 %v1980_v43  ;;  %v1992_v46 = vsel %vm631_vm0, %v6224_v18, 0.0  ;;  %5015 = vmatpush3.bf16.msra.mxu0 %v5253_v25 }
 0x9f3   : > { %v1986_v41 = vsel %vm631_vm0, %v6219_v40, 0.0  ;;  %5016 = vmatprep.subr.bf16.mxu0 %v5254_v15 }
 0x9f4   : > { %1987 = vadd.xlane.f32.xlu1 %v1986_v41 }
 0x9f6   : > { %1984 = vadd.xlane.f32.xlu0 %v1983_v51  ;;  %5017 = vmatpush3.bf16.msra.mxu0 %v5254_v15 }
 0x9f8   : > { %1993 = vadd.xlane.f32.xlu1 %v1992_v46 }
 0x9fa   : > { %1990 = vadd.xlane.f32.xlu0 %v1989_v16 }
 0xa77   : > { %v1973_v9 = vpop.xlane.xlu0 %1972 }
 0xa78   : > { %v1995_v53 = vmul.f32 0.03125, %v1973_v9 }
 0xa79   : > { %v1976_v1 = vpop.xlane.xlu1 %1975 }
 0xa7a   : > { %v6238_v34 = vsub.f32 %v6198_v36, %v1995_v53  ;;  %v1996_v50 = vmul.f32 0.03125, %v1976_v1 }
 0xa7b   : > { %v1979_v44 = vpop.xlane.xlu0 %1978 }
 0xa7c   : > { %v6241_v23 = vsub.f32 %v6204_v42, %v1996_v50  ;;  %v1997_v58 = vmul.f32 0.03125, %v1979_v44  ;;  %v2011_v7 = vmul.f32 %v6238_v34, %v6238_v34 }
 0xa7e   : > { %v6246_v21 = vsub.f32 %v6201_v29, %v1997_v58  ;;  %v2019_v33 = vsel %vm631_vm0, %v2011_v7, 0.0  ;;  %v2012_v47 = vmul.f32 %v6241_v23, %v6241_v23 }
 0xa7f   : > { %v1982_v55 = vpop.xlane.xlu0 %1981  ;;  %2020 = vadd.xlane.f32.xlu0 %v2019_v33  ;;  %v4640_v33 = vld [vmem:[%s7316_s12] ss:$0 sm:$0xff] }
 0xa80   : > { %v1998_v32 = vmul.f32 0.03125, %v1982_v55  ;;  %v2022_v6 = vsel %vm631_vm0, %v2012_v47, 0.0  ;;  %v2013_v49 = vmul.f32 %v6246_v21, %v6246_v21 }
 0xa81   : > { %2023 = vadd.xlane.f32.xlu1 %v2022_v6  ;;  %v1988_v45 = vpop.xlane.xlu1 %1987 }
 0xa82   : > { %v6255_v26 = vsub.f32 %v6211_v4, %v1998_v32  ;;  %v2000_v37 = vmul.f32 0.03125, %v1988_v45  ;;  %v2025_v10 = vsel %vm631_vm0, %v2013_v49, 0.0 }
 0xa83   : > { %2026 = vadd.xlane.f32.xlu0 %v2025_v10  ;;  %v1985_v17 = vpop.xlane.xlu0 %1984 }
 0xa84   : > { %v6259_v35 = vsub.f32 %v6219_v40, %v2000_v37  ;;  %v1999_v59 = vmul.f32 0.03125, %v1985_v17  ;;  %v2014_v28 = vmul.f32 %v6255_v26, %v6255_v26 }
 0xa85   : > { %v1994_v48 = vpop.xlane.xlu1 %1993 }
 0xa86   : > { %v6264_v30 = vsub.f32 %v6216_v31, %v1999_v59  ;;  %v2002_v61 = vmul.f32 0.03125, %v1994_v48  ;;  %v2028_v63 = vsel %vm631_vm0, %v2014_v28, 0.0  ;;  %v2016_v62 = vmul.f32 %v6259_v35, %v6259_v35  ;;  %v4641_v48 = vld [vmem:[%s7317_s13] ss:$0 sm:$0xff] }
 0xa87   : > { %2029 = vadd.xlane.f32.xlu1 %v2028_v63  ;;  %v1991_v38 = vpop.xlane.xlu0 %1990 }
 0xa88   : > { %v6270_v0 = vsub.f32 %v6224_v18, %v2002_v61  ;;  %v2001_v54 = vmul.f32 0.03125, %v1991_v38  ;;  %v2015_v60 = vmul.f32 %v6264_v30, %v6264_v30  ;;  %v2034_v3 = vsel %vm631_vm0, %v2016_v62, 0.0 }
 0xa8a   : > { %v6275_v2 = vsub.f32 %v6229_v39, %v2001_v54  ;;  %v2031_v11 = vsel %vm631_vm0, %v2015_v60, 0.0  ;;  %v2018_v12 = vmul.f32 %v6270_v0, %v6270_v0 }
 0xa8b   : > { %2035 = vadd.xlane.f32.xlu1 %v2034_v3  ;;  %2032 = vadd.xlane.f32.xlu0 %v2031_v11 }
 0xa8c   : > { %v2017_v22 = vmul.f32 %v6275_v2, %v6275_v2  ;;  %v2040_v13 = vsel %vm631_vm0, %v2018_v12, 0.0 }
 0xa8e   : > { %v2037_v24 = vsel %vm631_vm0, %v2017_v22, 0.0 }
 0xa8f   : > { %2041 = vadd.xlane.f32.xlu1 %v2040_v13  ;;  %2038 = vadd.xlane.f32.xlu0 %v2037_v24 }
 0xb0c   : > { %v2021_v14 = vpop.xlane.xlu0 %2020 }
 0xb0d   : > { %v2043_v27 = vmul.f32 0.03125, %v2021_v14 }
 0xb0e   : > { %v2024_v19 = vpop.xlane.xlu1 %2023 }
 0xb0f   : > { %v2051_v43 = vadd.f32 1e-05, %v2043_v27  ;;  %v2044_v20 = vmul.f32 0.03125, %v2024_v19 }
 0xb10   : > { %v2027_v41 = vpop.xlane.xlu0 %2026 }
 0xb11   : > { %5361 = vrsqrt.f32 %v2051_v43  ;;  %v2052_v52 = vadd.f32 1e-05, %v2044_v20  ;;  %v2045_v51 = vmul.f32 0.03125, %v2027_v41 }
 0xb13   : > { %5363 = vrsqrt.f32 %v2052_v52  ;;  %v2053_v46 = vadd.f32 1e-05, %v2045_v51 }
 0xb14   : > { %v2030_v16 = vpop.xlane.xlu1 %2029 }
 0xb15   : > { %5365 = vrsqrt.f32 %v2053_v46  ;;  %v2046_v9 = vmul.f32 0.03125, %v2030_v16 }
 0xb17   : > { %v2054_v53 = vadd.f32 1e-05, %v2046_v9 }
 0xb18   : > { %v2036_v1 = vpop.xlane.xlu1 %2035  ;;  %v2033_v50 = vpop.xlane.xlu0 %2032 }
 0xb19   : > { %5367 = vrsqrt.f32 %v2054_v53  ;;  %v2048_v44 = vmul.f32 0.03125, %v2036_v1  ;;  %v2047_v58 = vmul.f32 0.03125, %v2033_v50  ;;  %v5257_v1 = vld [vmem:[%s7320_s16 + $0x10] sm:$0xff]   ;;  %v5259_v50 = vld [vmem:[%s7320_s16 + $0x20] sm:$0xff]  }
 0xb1b   : > { %v5362_v7 = vpop.eup %5361  ;;  %v2056_v47 = vadd.f32 1e-05, %v2048_v44  ;;  %v2055_v55 = vadd.f32 1e-05, %v2047_v58  ;;  %v5260_v44 = vld [vmem:[%s7320_s16 + $0x28] sm:$0xff]   ;;  %v5261_v58 = vld [vmem:[%s7320_s16 + $0x30] sm:$0xff]  }
 0xb1c   : > { %v2067_v32 = vmul.f32 %v5362_v7, %v6238_v34  ;;  %v2042_v6 = vpop.xlane.xlu1 %2041  ;;  %v2039_v49 = vpop.xlane.xlu0 %2038  ;;  %v5262_v7 = vld [vmem:[%s7320_s16 + $0x38] sm:$0xff]  }
 0xb1d   : > { %v5364_v45 = vpop.eup %5363  ;;  %5369 = vrsqrt.f32 %v2056_v47  ;;  %v2050_v37 = vmul.f32 0.03125, %v2042_v6  ;;  %v2049_v10 = vmul.f32 0.03125, %v2039_v49 }
 0xb1e   : > { %v2068_v17 = vmul.f32 %v5364_v45, %v6241_v23  ;;  %5371 = vrsqrt.f32 %v2055_v55  ;;  %v2081_v59 = vmul.f32 %v4640_v33, %v2067_v32 }
 0xb1f   : > { %v5366_v28 = vpop.eup %5365  ;;  %v2058_v61 = vadd.f32 1e-05, %v2050_v37  ;;  %v2057_v63 = vadd.f32 1e-05, %v2049_v10 }
 0xb20   : > { %v2069_v62 = vmul.f32 %v5366_v28, %v6246_v21  ;;  %v2082_v34 = vmul.f32 %v4640_v33, %v2068_v17  ;;  %v2095_v38 = vadd.f32 %v4641_v48, %v2081_v59 }
 0xb21   : > { %5373 = vrsqrt.f32 %v2058_v61 }
 0xb22   : > { %5375 = vrsqrt.f32 %v2057_v63  ;;  %v2096_v54 = vadd.f32 %v4641_v48, %v2082_v34  ;;  %v2083_v3 = vmul.f32 %v4640_v33, %v2069_v62 }
 0xb23   : > { %v5368_v60 = vpop.eup %5367 }
 0xb24   : > { %v2070_v23 = vmul.f32 %v5368_v60, %v6255_v26  ;;  %v2107_v11 = vpack.c.bf16 %v2096_v54, %v2095_v38  ;;  %v2097_v24 = vadd.f32 %v4641_v48, %v2083_v3 }
 0xb26   : > { %v2084_v12 = vmul.f32 %v4640_v33, %v2070_v23  ;;  %5018 = vmatprep.mubr.msk.bf16.mxu0 %vm631_vm0, %v2107_v11 }
 0xb27   : > { %v5370_v22 = vpop.eup %5369 }
 0xb28   : > { %v5372_v13 = vpop.eup %5371  ;;  %v2098_v25 = vadd.f32 %v4641_v48, %v2084_v12  ;;  %v2072_v15 = vmul.f32 %v5370_v22, %v6259_v35 }
 0xb29   : > { %v2071_v21 = vmul.f32 %v5372_v13, %v6264_v30 }
 0xb2a   : > { %v2108_v14 = vpack.c.bf16 %v2098_v25, %v2097_v24  ;;  %v2086_v27 = vmul.f32 %v4640_v33, %v2072_v15 }
 0xb2b   : > { %v5374_v19 = vpop.eup %5373  ;;  %v2085_v43 = vmul.f32 %v4640_v33, %v2071_v21 }
 0xb2c   : > { %v5376_v20 = vpop.eup %5375  ;;  %v2074_v41 = vmul.f32 %v5374_v19, %v6270_v0  ;;  %5019 = vmatmul.mubr.msk.bf16.vlgmr.msra.gmra.mrb[32].mxu0 %vm631_vm0, %v2108_v14  ;;  %v2100_v26 = vadd.f32 %v4641_v48, %v2086_v27  ;;  %v5255_v0 = vld [vmem:[%s7320_s16] sm:$0xff]  }
 0xb2d   : > { %v2073_v52 = vmul.f32 %v5376_v20, %v6275_v2  ;;  %v2099_v51 = vadd.f32 %v4641_v48, %v2085_v43  ;;  %5026 = vmatprep.subr.bf16.mxu1 %v5255_v0  ;;  %v5256_v2 = vld [vmem:[%s7320_s16 + $0x8] sm:$0xff]  }
 0xb2e   : > { %v2088_v46 = vmul.f32 %v4640_v33, %v2074_v41  ;;  %5027 = vmatpush3.bf16.msra.mxu1 %v5255_v0 }
 0xb2f   : > { %v2109_v16 = vpack.c.bf16 %v2100_v26, %v2099_v51  ;;  %v2087_v9 = vmul.f32 %v4640_v33, %v2073_v52  ;;  %5028 = vmatprep.subr.bf16.mxu1 %v5256_v2  ;;  %v4642_v33 = vld [vmem:[%s7319_s15] ss:$0 sm:$0xff] }
 0xb30   : > { %v2102_v53 = vadd.f32 %v4641_v48, %v2088_v46 }
 0xb31   : > { %5022 = vmatprep.mubr.msk.bf16.mxu0 %vm631_vm0, %v2109_v16  ;;  %v2101_v35 = vadd.f32 %v4641_v48, %v2087_v9 }
 0xb32   : > { %5029 = vmatpush3.bf16.msra.mxu1 %v5256_v2 }
 0xb33   : > { %v2110_v30 = vpack.c.bf16 %v2102_v53, %v2101_v35  ;;  %5030 = vmatprep.subr.bf16.mxu1 %v5257_v1 }
 0xb35   : > { %5023 = vmatmul.mubr.msk.bf16.gmra.mrb[36].mxu0 %vm631_vm0, %v2110_v30 }
 0xb36   : > { %5058 = vmatprep.mubr.msk.bf16.mxu0 %vm971_vm3, %v5731_v5  ;;  %5031 = vmatpush3.bf16.msra.mxu1 %v5257_v1  ;;  %v5258_v5 = vld [vmem:[%s7320_s16 + $0x18] sm:$0xff]  }
 0xb37   : > { %5032 = vmatprep.subr.bf16.mxu1 %v5258_v5 }
 0xb3a   : > { %5033 = vmatpush3.bf16.msra.mxu1 %v5258_v5 }
 0xb3b   : > { %5034 = vmatprep.subr.bf16.mxu1 %v5259_v50 }
 0xb3e   : > { %5035 = vmatpush3.bf16.msra.mxu1 %v5259_v50 }
 0xb3f   : > { %5036 = vmatprep.subr.bf16.mxu1 %v5260_v44 }
 0xb42   : > { %5037 = vmatpush3.bf16.msra.mxu1 %v5260_v44 }
 0xb43   : > { %5038 = vmatprep.subr.bf16.mxu1 %v5261_v58 }
 0xb46   : > { %5039 = vmatpush3.bf16.msra.mxu1 %v5261_v58 }
 0xb47   : > { %5040 = vmatprep.subr.bf16.mxu1 %v5262_v7 }
 0xb4a   : > { %5041 = vmatpush3.bf16.msra.mxu1 %v5262_v7 }
 0xbff   : > { %v5020_v47 = vpop.f32.mrb[32].mxu0 }
 0xc00   : > { %v2185_v55 = vadd.f32 %v5020_v47, %v4642_v33  ;;  %v2176_v32 = vpop.f32.mrb[33].mxu0 }
 0xc01   : > { %v6338_v6 = vadd.f32 %v4642_v33, %v2176_v32  ;;  %v5021_v49 = vpop.f32.mrb[34].mxu0 }
 0xc02   : > { %v6340_v45 = vmul.f32 0.70710677, %v2185_v55  ;;  %v6342_v37 = vadd.f32 %v5021_v49, %v4642_v33  ;;  %v2179_v10 = vpop.f32.mrb[35].mxu0  ;;  %v6382_v0 = vmul.f32 0.5, %v2185_v55 }
 0xc03   : > { %v6345_v17 = vmul.f32 0.70710677, %v6338_v6  ;;  %v6347_v59 = vadd.f32 %v4642_v33, %v2179_v10 }
 0xc04   : > { %v2225_v28 = vand.u32 2147483647, %v6340_v45  ;;  %v6351_v48 = vmul.f32 0.70710677, %v6342_v37  ;;  %vm2385_vm11 = vcmp.ge.f32.partialorder %v6340_v45, 0.0 }
 0xc05   : > { %v2223_v61 = vand.u32 2147483647, %v6345_v17  ;;  %v6355_v63 = vmul.f32 0.70710677, %v6347_v59  ;;  %vm2383_vm12 = vcmp.ge.f32.partialorder %v6345_v17, 0.0 }
 0xc06   : > { %v2233_v62 = vmul.f32 0.3275911, %v2225_v28  ;;  %v2226_v34 = vand.u32 2147483647, %v6351_v48  ;;  %v2337_v20 = vsub.f32 0.0, %v2225_v28  ;;  %vm2386_vm13 = vcmp.ge.f32.partialorder %v6351_v48, 0.0 }
 0xc07   : > { %v2231_v38 = vmul.f32 0.3275911, %v2223_v61  ;;  %v2224_v54 = vand.u32 2147483647, %v6355_v63  ;;  %v2335_v52 = vsub.f32 0.0, %v2223_v61  ;;  %vm2384_vm14 = vcmp.ge.f32.partialorder %v6355_v63, 0.0 }
 0xc08   : > { %v2241_v60 = vadd.f32 1.0, %v2233_v62  ;;  %v2234_v3 = vmul.f32 0.3275911, %v2226_v34  ;;  %v5024_v23 = vpop.f32.mrb[36].mxu0  ;;  %v2338_v46 = vsub.f32 0.0, %v2226_v34  ;;  %v2345_v2 = vmul.f32 %v2337_v20, %v2225_v28 }
 0xc09   : > { %v2239_v11 = vadd.f32 1.0, %v2231_v38  ;;  %v2232_v12 = vmul.f32 0.3275911, %v2224_v54  ;;  %v2192_v22 = vpop.f32.mrb[37].mxu0  ;;  %v6359_v21 = vadd.f32 %v5024_v23, %v4642_v33  ;;  %v2336_v16 = vsub.f32 0.0, %v2224_v54 }
 0xc0a   : > { %5377 = vrcp.f32 %v2241_v60  ;;  %v2242_v13 = vadd.f32 1.0, %v2234_v3  ;;  %v5025_v24 = vpop.f32.mrb[38].mxu0  ;;  %v6361_v14 = vadd.f32 %v4642_v33, %v2192_v22  ;;  %v2343_v44 = vmul.f32 %v2335_v52, %v2223_v61 }
 0xc0b   : > { %5379 = vrcp.f32 %v2239_v11  ;;  %v2195_v25 = vpop.f32.mrb[39].mxu0  ;;  %v2240_v15 = vadd.f32 1.0, %v2232_v12  ;;  %v6363_v27 = vadd.f32 %v5025_v24, %v4642_v33  ;;  %v6366_v19 = vmul.f32 0.70710677, %v6359_v21 }
 0xc0c   : > { %5381 = vrcp.f32 %v2242_v13  ;;  %v6368_v43 = vadd.f32 %v4642_v33, %v2195_v25  ;;  %v6371_v41 = vmul.f32 0.70710677, %v6361_v14  ;;  %v2346_v49 = vmul.f32 %v2338_v46, %v2226_v34 }
 0xc0d   : > { %v6374_v26 = vmul.f32 0.70710677, %v6363_v27  ;;  %5383 = vrcp.f32 %v2240_v15  ;;  %v2229_v51 = vand.u32 2147483647, %v6366_v19  ;;  %v2344_v10 = vmul.f32 %v2336_v16, %v2224_v54 }
 0xc0e   : > { %v2227_v9 = vand.u32 2147483647, %v6371_v41  ;;  %v6380_v30 = vmul.f32 0.70710677, %v6368_v43  ;;  %v2355_v3 = vmul.f32 1.442695, %v2345_v2 }
 0xc0f   : > { %v2230_v53 = vand.u32 2147483647, %v6374_v26  ;;  %v2237_v35 = vmul.f32 0.3275911, %v2229_v51  ;;  %v2341_v7 = vsub.f32 0.0, %v2229_v51  ;;  %vm2389_vm15 = vcmp.ge.f32.partialorder %v6366_v19, 0.0 }
 0xc10   : > { %v2235_v1 = vmul.f32 0.3275911, %v2227_v9  ;;  %v2228_v33 = vand.u32 2147483647, %v6380_v30  ;;  %v2339_v28 = vsub.f32 0.0, %v2227_v9  ;;  %vm2390_vm1 = vcmp.ge.f32.partialorder %v6374_v26, 0.0 }
 0xc11   : > { %v2238_v5 = vmul.f32 0.3275911, %v2230_v53  ;;  %v2245_v58 = vadd.f32 1.0, %v2237_v35  ;;  %v2351_v12 = vmul.f32 1.442695, %v2343_v44  ;;  %v2349_v22 = vmul.f32 %v2341_v7, %v2229_v51 }
 0xc12   : > { %v2243_v62 = vadd.f32 1.0, %v2235_v1  ;;  %v2236_v61 = vmul.f32 0.3275911, %v2228_v33  ;;  %v2342_v13 = vsub.f32 0.0, %v2230_v53  ;;  %v2357_v54 = vmul.f32 1.442695, %v2346_v49 }
 0xc13   : > { %5385 = vrcp.f32 %v2245_v58  ;;  %v2246_v38 = vadd.f32 1.0, %v2238_v5  ;;  %v2353_v52 = vmul.f32 1.442695, %v2344_v10  ;;  %v2347_v46 = vmul.f32 %v2339_v28, %v2227_v9 }
 0xc14   : > { %v6384_v50 = vpop.eup %5377  ;;  %5387 = vrcp.f32 %v2243_v62  ;;  %v2244_v25 = vadd.f32 1.0, %v2236_v61  ;;  %v2363_v1 = vmul.f32 1.442695, %v2349_v22  ;;  %v2350_v5 = vmul.f32 %v2342_v13, %v2230_v53 }
 0xc15   : > { %v6387_v47 = vpop.eup %5379  ;;  %v2265_v32 = vmul.f32 1.0614054, %v6384_v50  ;;  %5389 = vrcp.f32 %v2246_v38  ;;  %v2359_v9 = vmul.f32 1.442695, %v2347_v46  ;;  %v2340_v49 = vsub.f32 0.0, %v2228_v33 }
 0xc16   : > { %v2263_v55 = vmul.f32 1.0614054, %v6387_v47  ;;  %v6391_v23 = vpop.eup %5381  ;;  %5391 = vpow2.f32 %v2355_v3  ;;  %v6406_v53 = vmul.f32 0.5, %v6338_v6  ;;  %vm2387_vm2 = vcmp.ge.f32.partialorder %v6371_v41, 0.0 }
 0xc17   : > { %v2273_v60 = vadd.f32 -1.4531521, %v2265_v32  ;;  %v2266_v34 = vmul.f32 1.0614054, %v6391_v23  ;;  %v6395_v15 = vpop.eup %5383  ;;  %5393 = vrcp.f32 %v2244_v25  ;;  %vm2388_vm4 = vcmp.ge.f32.partialorder %v6380_v30, 0.0 }
 0xc18   : > { %v2271_v11 = vadd.f32 -1.4531521, %v2263_v55  ;;  %v2264_v2 = vmul.f32 1.0614054, %v6395_v15  ;;  %5395 = vpow2.f32 %v2351_v12  ;;  %v2211_v26 = vmul.f32 0.5, %v6361_v14 }
 0xc19   : > { %v2281_v24 = vmul.f32 %v6384_v50, %v2273_v60  ;;  %v2274_v35 = vadd.f32 -1.4531521, %v2266_v34  ;;  %5397 = vpow2.f32 %v2357_v54  ;;  %v2365_v60 = vmul.f32 1.442695, %v2350_v5 }
 0xc1a   : > { %v2279_v20 = vmul.f32 %v6387_v47, %v2271_v11  ;;  %v2272_v7 = vadd.f32 -1.4531521, %v2264_v2  ;;  %5399 = vpow2.f32 %v2353_v52  ;;  %v2348_v34 = vmul.f32 %v2340_v49, %v2228_v33 }
 0xc1b   : > { %v2289_v16 = vadd.f32 1.4214138, %v2281_v24  ;;  %v2282_v58 = vmul.f32 %v6391_v23, %v2274_v35  ;;  %5401 = vpow2.f32 %v2363_v1 }
 0xc1c   : > { %v2287_v51 = vadd.f32 1.4214138, %v2279_v20  ;;  %v2280_v55 = vmul.f32 %v6395_v15, %v2272_v7  ;;  %5403 = vpow2.f32 %v2359_v9 }
 0xc1d   : > { %v2297_v44 = vmul.f32 %v6384_v50, %v2289_v16  ;;  %v2290_v62 = vadd.f32 1.4214138, %v2282_v58  ;;  %v6403_v28 = vpop.eup %5385  ;;  %v6420_v16 = vmul.f32 0.5, %v6342_v37  ;;  %5405 = vpow2.f32 %v2365_v60 }
 0xc1e   : > { %v2295_v32 = vmul.f32 %v6387_v47, %v2287_v51  ;;  %v6408_v3 = vpop.eup %5387  ;;  %v2288_v12 = vadd.f32 1.4214138, %v2280_v55  ;;  %v2269_v22 = vmul.f32 1.0614054, %v6403_v28 }
 0xc1f   : > { %v2305_v10 = vadd.f32 -0.28449672, %v2297_v44  ;;  %v2298_v11 = vmul.f32 %v6391_v23, %v2290_v62  ;;  %v2267_v24 = vmul.f32 1.0614054, %v6408_v3  ;;  %v6416_v52 = vpop.eup %5389 }
 0xc20   : > { %v2303_v38 = vadd.f32 -0.28449672, %v2295_v32  ;;  %v2296_v25 = vmul.f32 %v6395_v15, %v2288_v12  ;;  %v2277_v20 = vadd.f32 -1.4531521, %v2269_v22  ;;  %v5392_v2 = vpop.eup %5391  ;;  %v2270_v37 = vmul.f32 1.0614054, %v6416_v52 }
 0xc21   : > { %v2313_v61 = vmul.f32 %v6384_v50, %v2305_v10  ;;  %v2306_v54 = vadd.f32 -0.28449672, %v2298_v11  ;;  %v2275_v35 = vadd.f32 -1.4531521, %v2267_v24  ;;  %v6426_v44 = vpop.eup %5393  ;;  %v2361_v32 = vmul.f32 1.442695, %v2348_v34 }
 0xc22   : > { %v2311_v13 = vmul.f32 %v6387_v47, %v2303_v38  ;;  %v2304_v1 = vadd.f32 -0.28449672, %v2296_v25  ;;  %v2285_v5 = vmul.f32 %v6403_v28, %v2277_v20  ;;  %v5396_v9 = vpop.eup %5395  ;;  %v2268_v11 = vmul.f32 1.0614054, %v6426_v44 }
 0xc23   : > { %v2321_v6 = vadd.f32 0.2548296, %v2313_v61  ;;  %v2314_v33 = vmul.f32 %v6391_v23, %v2306_v54  ;;  %v2283_v7 = vmul.f32 %v6408_v3, %v2275_v35  ;;  %v5398_v55 = vpop.eup %5397  ;;  %v2278_v61 = vadd.f32 -1.4531521, %v2270_v37 }
 0xc24   : > { %v2319_v46 = vadd.f32 0.2548296, %v2311_v13  ;;  %v2293_v62 = vadd.f32 1.4214138, %v2285_v5  ;;  %v2276_v20 = vadd.f32 -1.4531521, %v2268_v11  ;;  %5407 = vpow2.f32 %v2361_v32 }
 0xc25   : > { %v2329_v51 = vmul.f32 %v6384_v50, %v2321_v6  ;;  %v2322_v10 = vadd.f32 0.2548296, %v2314_v33  ;;  %v2312_v50 = vmul.f32 %v6395_v15, %v2304_v1  ;;  %v2291_v60 = vadd.f32 1.4214138, %v2283_v7 }
 0xc26   : > { %v2327_v58 = vmul.f32 %v6387_v47, %v2319_v46  ;;  %v5400_v47 = vpop.eup %5399  ;;  %v2301_v24 = vmul.f32 %v6403_v28, %v2293_v62  ;;  %v2286_v25 = vmul.f32 %v6416_v52, %v2278_v61 }
 0xc27   : > { %v2369_v49 = vmul.f32 %v5392_v2, %v2329_v51  ;;  %v2330_v22 = vmul.f32 %v6391_v23, %v2322_v10  ;;  %v2320_v13 = vadd.f32 0.2548296, %v2312_v50  ;;  %v5402_v34 = vpop.eup %5401  ;;  %v2299_v54 = vmul.f32 %v6408_v3, %v2291_v60 }
 0xc28   : > { %v2367_v38 = vmul.f32 %v5396_v9, %v2327_v58  ;;  %v2309_v51 = vadd.f32 -0.28449672, %v2301_v24  ;;  %v5404_v33 = vpop.eup %5403  ;;  %v2294_v58 = vadd.f32 1.4214138, %v2286_v25  ;;  %v2284_v23 = vmul.f32 %v6426_v44, %v2276_v20 }
 0xc29   : > { %v2377_v12 = vsub.f32 1.0, %v2369_v49  ;;  %v2370_v35 = vmul.f32 %v5398_v55, %v2330_v22  ;;  %v2328_v2 = vmul.f32 %v6395_v15, %v2320_v13  ;;  %v2307_v5 = vadd.f32 -0.28449672, %v2299_v54  ;;  %v5406_v10 = vpop.eup %5405 }
 0xc2a   : > { %v2375_v6 = vsub.f32 1.0, %v2367_v38  ;;  %v2317_v49 = vmul.f32 %v6403_v28, %v2309_v51  ;;  %v2302_v62 = vmul.f32 %v6416_v52, %v2294_v58 }
 0xc2b   : > { %v2393_v46 = vsub.f32 0.0, %v2377_v12  ;;  %v2378_v37 = vsub.f32 1.0, %v2370_v35  ;;  %v2368_v9 = vmul.f32 %v5400_v47, %v2328_v2  ;;  %v2315_v15 = vmul.f32 %v6408_v3, %v2307_v5 }
 0xc2c   : > { %v2391_v1 = vsub.f32 0.0, %v2375_v6  ;;  %v2325_v61 = vadd.f32 0.2548296, %v2317_v49  ;;  %v2310_v11 = vadd.f32 -0.28449672, %v2302_v62 }
 0xc2d   : > { %v2401_v7 = vsel %vm2385_vm11, %v2377_v12, %v2393_v46  ;;  %v2394_v38 = vsub.f32 0.0, %v2378_v37  ;;  %v2376_v60 = vsub.f32 1.0, %v2368_v9  ;;  %v2323_v45 = vadd.f32 0.2548296, %v2315_v15 }
 0xc2e   : > { %v2399_v50 = vsel %vm2383_vm12, %v2375_v6, %v2391_v1  ;;  %v2409_v55 = vadd.f32 1.0, %v2401_v7  ;;  %v2292_v12 = vadd.f32 1.4214138, %v2284_v23  ;;  %v2333_v13 = vmul.f32 %v6403_v28, %v2325_v61 }
 0xc2f   : > { %v2407_v47 = vadd.f32 1.0, %v2399_v50  ;;  %v2402_v22 = vsel %vm2386_vm13, %v2378_v37, %v2394_v38  ;;  %v2392_v17 = vsub.f32 0.0, %v2376_v60  ;;  %v2331_v6 = vmul.f32 %v6408_v3, %v2323_v45 }
 0xc30   : > { %v2410_v24 = vadd.f32 1.0, %v2402_v22  ;;  %v2318_v54 = vmul.f32 %v6416_v52, %v2310_v11  ;;  %v2300_v25 = vmul.f32 %v6426_v44, %v2292_v12  ;;  %v2417_v20 = vmul.f32 %v2409_v55, %v6382_v0 }
 0xc31   : > { %v2208_v46 = vmul.f32 0.5, %v6347_v59  ;;  %v2400_v32 = vsel %vm2384_vm14, %v2376_v60, %v2392_v17  ;;  %v2373_v35 = vmul.f32 %v5402_v34, %v2333_v13  ;;  %v2371_v51 = vmul.f32 %v5404_v33, %v2331_v6  ;;  %v5408_v34 = vpop.eup %5407 }
 0xc32   : > { %v2418_v48 = vmul.f32 %v2410_v24, %v6420_v16  ;;  %v2408_v2 = vadd.f32 1.0, %v2400_v32  ;;  %v2326_v28 = vadd.f32 0.2548296, %v2318_v54  ;;  %v2308_v5 = vadd.f32 -0.28449672, %v2300_v25 }
 0xc33   : > { %v2381_v1 = vsub.f32 1.0, %v2373_v35  ;;  %v2415_v3 = vmul.f32 %v2407_v47, %v6406_v53  ;;  %v2379_v37 = vsub.f32 1.0, %v2371_v51  ;;  %v2213_v55 = vmul.f32 0.5, %v6359_v21 }
 0xc34   : > { %v2440_v58 = vpack.c.bf16 %v2418_v48, %v2417_v20  ;;  %v2416_v23 = vmul.f32 %v2408_v2, %v2208_v46  ;;  %v2334_v7 = vmul.f32 %v6416_v52, %v2326_v28  ;;  %v2316_v59 = vmul.f32 %v6426_v44, %v2308_v5 }
 0xc35   : > { %v2397_v0 = vsub.f32 0.0, %v2381_v1  ;;  %v2395_v50 = vsub.f32 0.0, %v2379_v37  ;;  %v2214_v38 = vmul.f32 0.5, %v6363_v27  ;;  %v2212_v21 = vmul.f32 0.5, %v6368_v43  ;;  %v4649_v27 = vld [vmem:[%s7321_s17] ss:$0 sm:$0xff] }
 0xc36   : > { %v2374_v63 = vmul.f32 %v5406_v10, %v2334_v7  ;;  %v2439_v9 = vpack.c.bf16 %v2416_v23, %v2415_v3  ;;  %v2324_v16 = vadd.f32 0.2548296, %v2316_v59 }
 0xc37   : > { %v2405_v33 = vsel %vm2389_vm15, %v2381_v1, %v2397_v0  ;;  %v2403_v19 = vsel %vm2387_vm2, %v2379_v37, %v2395_v50 }
 0xc38   : > { %v2382_v49 = vsub.f32 1.0, %v2374_v63  ;;  %5042 = vmatprep.mubr.bf16.mxu1 %v2439_v9  ;;  %v2332_v53 = vmul.f32 %v6426_v44, %v2324_v16  ;;  %v2413_v62 = vadd.f32 1.0, %v2405_v33  ;;  %v2411_v44 = vadd.f32 1.0, %v2403_v19 }
 0xc39   : > { %5043 = vmatmul.mubr.bf16.vlgmr.msra.gmra.mrb[28].mxu1 %v2440_v58 }
 0xc3a   : > { %v2398_v15 = vsub.f32 0.0, %v2382_v49  ;;  %v2372_v52 = vmul.f32 %v5408_v34, %v2332_v53  ;;  %v2421_v45 = vmul.f32 %v2413_v62, %v2213_v55  ;;  %v2419_v41 = vmul.f32 %v2411_v44, %v2211_v26 }
 0xc3c   : > { %v2406_v10 = vsel %vm2390_vm1, %v2382_v49, %v2398_v15  ;;  %v2380_v61 = vsub.f32 1.0, %v2372_v52 }
 0xc3d   : > { %v2414_v60 = vadd.f32 1.0, %v2406_v10 }
 0xc3e   : > { %v2396_v12 = vsub.f32 0.0, %v2380_v61 }
 0xc3f   : > { %v2422_v11 = vmul.f32 %v2414_v60, %v2214_v38 }
 0xc40   : > { %v2404_v47 = vsel %vm2388_vm4, %v2380_v61, %v2396_v12 }
 0xc41   : > { %v2442_v22 = vpack.c.bf16 %v2422_v11, %v2421_v45  ;;  %v2412_v17 = vadd.f32 1.0, %v2404_v47 }
 0xc43   : > { %v2420_v13 = vmul.f32 %v2412_v17, %v2212_v21 }
 0xc45   : > { %v2441_v24 = vpack.c.bf16 %v2420_v13, %v2419_v41 }
 0xc47   : > { %5046 = vmatprep.mubr.bf16.mxu1 %v2441_v24 }
 0xc48   : > { %5047 = vmatmul.mubr.bf16.gmra.mrb[32].mxu1 %v2442_v22 }
 0xd0c   : > { %v5044_v6 = vpop.f32.mrb[28].mxu1 }
 0xd0d   : > { %v2532_v54 = vpop.f32.mrb[29].mxu1 }
 0xd0e   : > { %v2533_v25 = vadd.f32 %v4649_v27, %v2532_v54  ;;  %v5045_v30 = vpop.f32.mrb[30].mxu1 }
 0xd0f   : > { %v2535_v20 = vpop.f32.mrb[31].mxu1  ;;  %v2544_v43 = vadd.f32 %v5045_v30, %v4649_v27 }
 0xd10   : > { %v6475_v46 = vadd.f32 %v2533_v25, %v6198_v36  ;;  %v2536_v14 = vadd.f32 %v4649_v27, %v2535_v20 }
 0xd11   : > { %v6483_v48 = vadd.f32 %v2544_v43, %v6211_v4 }
 0xd12   : > { %v6478_v32 = vadd.f32 %v2536_v14, %v6204_v42  ;;  %v2575_v35 = vsel %vm631_vm0, %v6475_v46, 0.0  ;;  %v2541_v42 = vadd.f32 %v5044_v6, %v4649_v27 }
 0xd13   : > { %2576 = vadd.xlane.f32.xlu0 %v2575_v35  ;;  %v2584_v36 = vsel %vm631_vm0, %v6483_v48, 0.0 }
 0xd14   : > { %v2578_v2 = vsel %vm631_vm0, %v6478_v32, 0.0  ;;  %v6496_v7 = vadd.f32 %v2541_v42, %v6201_v29 }
 0xd17   : > { %2579 = vadd.xlane.f32.xlu0 %v2578_v2 }
 0xd1b   : > { %2585 = vadd.xlane.f32.xlu0 %v2584_v36  ;;  %v5048_v51 = vpop.f32.mrb[32].mxu1 }
 0xd1c   : > { %v2548_v28 = vpop.f32.mrb[33].mxu1  ;;  %v2557_v63 = vadd.f32 %v5048_v51, %v4649_v27 }
 0xd1d   : > { %v5049_v1 = vpop.f32.mrb[34].mxu1  ;;  %v2549_v0 = vadd.f32 %v4649_v27, %v2548_v28  ;;  %v5266_v28 = vld [vmem:[%s7313_s9 + $0x10] sm:$0xff]  }
 0xd1e   : > { %v2560_v5 = vadd.f32 %v5049_v1, %v4649_v27  ;;  %v2551_v3 = vpop.f32.mrb[35].mxu1  ;;  %v6508_v29 = vadd.f32 %v2557_v63, %v6229_v39  ;;  %5082 = vmatprep.subr.bf16.mxu1 %v5266_v28 }
 0xd1f   : > { %v2552_v58 = vadd.f32 %v4649_v27, %v2551_v3  ;;  %v6503_v9 = vadd.f32 %v2549_v0, %v6216_v31  ;;  %5083 = vmatpush3.bf16.msra.mxu1 %v5266_v28 }
 0xd20   : > { %v6490_v23 = vadd.f32 %v2560_v5, %v6224_v18  ;;  %v2593_v16 = vsel %vm631_vm0, %v6508_v29, 0.0 }
 0xd21   : > { %v6493_v4 = vadd.f32 %v2552_v58, %v6219_v40  ;;  %v2581_v40 = vsel %vm631_vm0, %v6496_v7, 0.0  ;;  %v2587_v18 = vsel %vm631_vm0, %v6503_v9, 0.0 }
 0xd22   : > { %v2596_v37 = vsel %vm631_vm0, %v6490_v23, 0.0 }
 0xd23   : > { %2597 = vadd.xlane.f32.xlu1 %v2596_v37  ;;  %v2590_v59 = vsel %vm631_vm0, %v6493_v4, 0.0 }
 0xd24   : > { %2591 = vadd.xlane.f32.xlu0 %v2590_v59 }
 0xd27   : > { %2582 = vadd.xlane.f32.xlu1 %v2581_v40 }
 0xd2b   : > { %2588 = vadd.xlane.f32.xlu1 %v2587_v18 }
 0xd2f   : > { %2594 = vadd.xlane.f32.xlu1 %v2593_v16 }
 0xda0   : > { %v2577_v34 = vpop.xlane.xlu0 %2576 }
 0xda1   : > { %v2599_v33 = vmul.f32 0.03125, %v2577_v34 }
 0xda3   : > { %v6515_v31 = vsub.f32 %v6475_v46, %v2599_v33 }
 0xda4   : > { %v2580_v49 = vpop.xlane.xlu0 %2579 }
 0xda5   : > { %v2600_v50 = vmul.f32 0.03125, %v2580_v49  ;;  %v2615_v53 = vmul.f32 %v6515_v31, %v6515_v31 }
 0xda7   : > { %v6520_v39 = vsub.f32 %v6478_v32, %v2600_v50  ;;  %v2623_v15 = vsel %vm631_vm0, %v2615_v53, 0.0 }
 0xda8   : > { %2624 = vadd.xlane.f32.xlu0 %v2623_v15  ;;  %v2586_v62 = vpop.xlane.xlu0 %2585 }
 0xda9   : > { %v2602_v52 = vmul.f32 0.03125, %v2586_v62  ;;  %v2616_v55 = vmul.f32 %v6520_v39, %v6520_v39 }
 0xdab   : > { %v6526_v10 = vsub.f32 %v6483_v48, %v2602_v52  ;;  %v2626_v19 = vsel %vm631_vm0, %v2616_v55, 0.0 }
 0xdac   : > { %2627 = vadd.xlane.f32.xlu0 %v2626_v19 }
 0xdad   : > { %v2618_v38 = vmul.f32 %v6526_v10, %v6526_v10 }
 0xdaf   : > { %v2632_v60 = vsel %vm631_vm0, %v2618_v38, 0.0 }
 0xdb0   : > { %2633 = vadd.xlane.f32.xlu0 %v2632_v60  ;;  %v2598_v61 = vpop.xlane.xlu1 %2597  ;;  %v6570_v60 = vld [vmem:[%s7329_s24 + $0x1] ss:$0 sm:$0xff] }
 0xdb1   : > { %v2606_v45 = vmul.f32 0.03125, %v2598_v61  ;;  %v2592_v11 = vpop.xlane.xlu0 %2591 }
 0xdb2   : > { %v2604_v12 = vmul.f32 0.03125, %v2592_v11 }
 0xdb3   : > { %v6533_v44 = vsub.f32 %v6490_v23, %v2606_v45 }
 0xdb4   : > { %v6536_v47 = vsub.f32 %v6493_v4, %v2604_v12  ;;  %v2583_v22 = vpop.xlane.xlu1 %2582 }
 0xdb5   : > { %v2601_v26 = vmul.f32 0.03125, %v2583_v22  ;;  %v2622_v21 = vmul.f32 %v6533_v44, %v6533_v44 }
 0xdb6   : > { %v2620_v17 = vmul.f32 %v6536_v47, %v6536_v47 }
 0xdb7   : > { %v6543_v41 = vsub.f32 %v6496_v7, %v2601_v26  ;;  %v2644_v13 = vsel %vm631_vm0, %v2622_v21, 0.0 }
 0xdb8   : > { %2645 = vadd.xlane.f32.xlu1 %v2644_v13  ;;  %v2589_v24 = vpop.xlane.xlu1 %2588  ;;  %v2638_v27 = vsel %vm631_vm0, %v2620_v17, 0.0 }
 0xdb9   : > { %v2603_v6 = vmul.f32 0.03125, %v2589_v24  ;;  %2639 = vadd.xlane.f32.xlu0 %v2638_v27  ;;  %v2617_v54 = vmul.f32 %v6543_v41, %v6543_v41 }
 0xdbb   : > { %v6550_v25 = vsub.f32 %v6503_v9, %v2603_v6  ;;  %v2629_v30 = vsel %vm631_vm0, %v2617_v54, 0.0 }
 0xdbc   : > { %2630 = vadd.xlane.f32.xlu1 %v2629_v30  ;;  %v2595_v20 = vpop.xlane.xlu1 %2594 }
 0xdbd   : > { %v2605_v14 = vmul.f32 0.03125, %v2595_v20  ;;  %v2619_v43 = vmul.f32 %v6550_v25, %v6550_v25 }
 0xdbf   : > { %v6556_v35 = vsub.f32 %v6508_v29, %v2605_v14  ;;  %v2635_v2 = vsel %vm631_vm0, %v2619_v43, 0.0 }
 0xdc0   : > { %2636 = vadd.xlane.f32.xlu1 %v2635_v2 }
 0xdc1   : > { %v2621_v36 = vmul.f32 %v6556_v35, %v6556_v35 }
 0xdc3   : > { %v2641_v51 = vsel %vm631_vm0, %v2621_v36, 0.0 }
 0xdc4   : > { %2642 = vadd.xlane.f32.xlu1 %v2641_v51 }
 0xe35   : > { %v2625_v1 = vpop.xlane.xlu0 %2624 }
 0xe36   : > { %v2647_v42 = vmul.f32 0.03125, %v2625_v1 }
 0xe38   : > { %v2655_v0 = vadd.f32 1e-05, %v2647_v42 }
 0xe39   : > { %v2628_v5 = vpop.xlane.xlu0 %2627 }
 0xe3a   : > { %v2648_v3 = vmul.f32 0.03125, %v2628_v5 }
 0xe3c   : > { %v2656_v58 = vadd.f32 1e-05, %v2648_v3  ;;  %v6607_v3 = vld [vmem:[%s7310_s6 + $0x4] ss:$0 sm:$0xff] }
 0xe3d   : > { %v2634_v37 = vpop.xlane.xlu0 %2633 }
 0xe3e   : > { %5409 = vrsqrt.f32 %v2656_v58  ;;  %v2650_v59 = vmul.f32 0.03125, %v2634_v37 }
 0xe3f   : > { %5411 = vrsqrt.f32 %v2655_v0 }
 0xe40   : > { %v2658_v63 = vadd.f32 1e-05, %v2650_v59 }
 0xe42   : > { %5413 = vrsqrt.f32 %v2658_v63 }
 0xe45   : > { %v2646_v40 = vpop.xlane.xlu1 %2645 }
 0xe46   : > { %v2654_v18 = vmul.f32 0.03125, %v2646_v40  ;;  %v2640_v16 = vpop.xlane.xlu0 %2639  ;;  %v6627_v40 = vld [vmem:[%s7310_s6 + $0x5] ss:$0 sm:$0xff] }
 0xe47   : > { %v2652_v34 = vmul.f32 0.03125, %v2640_v16 }
 0xe48   : > { %v5410_v33 = vpop.eup %5409  ;;  %v2662_v49 = vadd.f32 1e-05, %v2654_v18 }
 0xe49   : > { %v2660_v50 = vadd.f32 1e-05, %v2652_v34  ;;  %v2631_v53 = vpop.xlane.xlu1 %2630  ;;  %v5412_v15 = vpop.eup %5411  ;;  %v2672_v52 = vmul.f32 %v5410_v33, %v6520_v39 }
 0xe4a   : > { %5415 = vrsqrt.f32 %v2662_v49  ;;  %v2649_v62 = vmul.f32 0.03125, %v2631_v53  ;;  %v2671_v19 = vmul.f32 %v5412_v15, %v6515_v31  ;;  %v4661_v31 = vld [vmem:[%s7330_s28 + $0x1] ss:$0 sm:$0xff] }
 0xe4b   : > { %5417 = vrsqrt.f32 %v2660_v50  ;;  %v2686_v45 = vmul.f32 %v6570_v60, %v2672_v52 }
 0xe4c   : > { %v2657_v55 = vadd.f32 1e-05, %v2649_v62  ;;  %v5414_v12 = vpop.eup %5413  ;;  %v2685_v22 = vmul.f32 %v6570_v60, %v2671_v19 }
 0xe4d   : > { %v2637_v38 = vpop.xlane.xlu1 %2636  ;;  %v6577_v21 = vadd.f32 %v4661_v31, %v2686_v45  ;;  %v2674_v13 = vmul.f32 %v5414_v12, %v6526_v10 }
 0xe4e   : > { %5419 = vrsqrt.f32 %v2657_v55  ;;  %v2651_v61 = vmul.f32 0.03125, %v2637_v38  ;;  %v6580_v27 = vadd.f32 %v4661_v31, %v2685_v22 }
 0xe4f   : > { %v2728_v20 = vrot.slane %v6577_v21, 7  ;;  %v2688_v43 = vmul.f32 %v6570_v60, %v2674_v13  ;;  %v2774_v51 = vrot.slane %v6577_v21, 1  ;;  %v2846_v15 = vmul.f32 %v6607_v3, %v6577_v21 }
 0xe50   : > { %v2659_v11 = vadd.f32 1e-05, %v2651_v61  ;;  %v2727_v10 = vrot.slane %v6580_v27, 7  ;;  %v2773_v28 = vrot.slane %v6580_v27, 1 }
 0xe51   : > { %v2643_v26 = vpop.xlane.xlu1 %2642 }
 0xe52   : > { %5421 = vrsqrt.f32 %v2659_v11  ;;  %v2653_v39 = vmul.f32 0.03125, %v2643_v26  ;;  %v6597_v5 = vsel %vm791_vm6, %v2727_v10, %v2728_v20  ;;  %v6622_v63 = vsel %vm838_vm8, %v2773_v28, %v2774_v51  ;;  %v6658_v11 = vld [vmem:[%s7311_s7 + $0x1] ss:$0 sm:$0xff] }
 0xe53   : > { %v2881_v62 = vmul.f32 %v6627_v40, %v6622_v63 }
 0xe54   : > { %v5416_v17 = vpop.eup %5415  ;;  %v2661_v24 = vadd.f32 1e-05, %v2653_v39 }
 0xe55   : > { %v2678_v6 = vmul.f32 %v5416_v17, %v6533_v44  ;;  %v5418_v54 = vpop.eup %5417 }
 0xe56   : > { %5423 = vrsqrt.f32 %v2661_v24  ;;  %v2676_v44 = vmul.f32 %v5418_v54, %v6536_v47  ;;  %v6609_v47 = vadd.f32 %v4661_v31, %v2688_v43 }
 0xe57   : > { %v2692_v30 = vmul.f32 %v6570_v60, %v2678_v6 }
 0xe58   : > { %v5420_v14 = vpop.eup %5419  ;;  %v2690_v34 = vmul.f32 %v6570_v60, %v2676_v44  ;;  %v2730_v55 = vrot.slane %v6609_v47, 7 }
 0xe59   : > { %v6586_v2 = vadd.f32 %v4661_v31, %v2692_v30  ;;  %v2673_v36 = vmul.f32 %v5420_v14, %v6543_v41  ;;  %v6602_v41 = vld [vmem:[%s7310_s6 + $0x3] ss:$0 sm:$0xff] }
 0xe5a   : > { %v2860_v16 = vmul.f32 %v6602_v41, %v6597_v5  ;;  %v6667_v39 = vadd.f32 %v4661_v31, %v2690_v34 }
 0xe5b   : > { %v2687_v1 = vmul.f32 %v6570_v60, %v2673_v36  ;;  %v2734_v42 = vrot.slane %v6586_v2, 7 }
 0xe5c   : > { %v5422_v58 = vpop.eup %5421  ;;  %v2868_v12 = vadd.f32 %v2860_v16, %v2846_v15  ;;  %v2780_v15 = vrot.slane %v6586_v2, 1 }
 0xe5d   : > { %v6611_v0 = vadd.f32 %v4661_v31, %v2687_v1  ;;  %v2675_v37 = vmul.f32 %v5422_v58, %v6550_v25  ;;  %v2742_v59 = vsel %vm791_vm6, %v2734_v42, %v2727_v10  ;;  %v2845_v25 = vmul.f32 %v6607_v3, %v6580_v27 }
 0xe5e   : > { %v6631_v18 = vsel %vm597_vm7, %v2742_v59, 0.0  ;;  %v6707_v59 = vld [vmem:[%s7307_s3 + $0x3] ss:$0 sm:$0xff] }
 0xe5f   : > { %v2689_v33 = vmul.f32 %v6570_v60, %v2675_v37  ;;  %v2775_v49 = vrot.slane %v6611_v0, 1  ;;  %v2859_v50 = vmul.f32 %v6602_v41, %v6631_v18  ;;  %v2729_v52 = vrot.slane %v6611_v0, 7 }
 0xe60   : > { %v5424_v53 = vpop.eup %5423 }
 0xe61   : > { %v6648_v19 = vadd.f32 %v4661_v31, %v2689_v33  ;;  %v2677_v38 = vmul.f32 %v5424_v53, %v6556_v35  ;;  %v6653_v61 = vsel %vm838_vm8, %v2774_v51, %v2775_v49  ;;  %v2867_v45 = vadd.f32 %v2859_v50, %v2845_v25 }
 0xe62   : > { %v2882_v22 = vmul.f32 %v6627_v40, %v6653_v61  ;;  %v6664_v26 = vsel %vm791_vm6, %v2728_v20, %v2729_v52  ;;  %v2776_v35 = vrot.slane %v6609_v47, 1  ;;  %v6672_v24 = vsel %vm791_vm6, %v2729_v52, %v2730_v55 }
 0xe63   : > { %v2691_v17 = vmul.f32 %v6570_v60, %v2677_v38  ;;  %v2889_v13 = vadd.f32 %v2881_v62, %v2867_v45  ;;  %v2777_v54 = vrot.slane %v6648_v19, 1  ;;  %v2861_v20 = vmul.f32 %v6602_v41, %v6664_v26 }
 0xe64   : > { %v2890_v6 = vadd.f32 %v2882_v22, %v2868_v12  ;;  %v6677_v30 = vsel %vm838_vm8, %v2775_v49, %v2776_v35  ;;  %v2847_v60 = vmul.f32 %v6607_v3, %v6611_v0  ;;  %v2848_v51 = vmul.f32 %v6607_v3, %v6609_v47 }
 0xe65   : > { %v6681_v14 = vadd.f32 %v4661_v31, %v2691_v17  ;;  %v2903_v43 = vadd.f32 %v6658_v11, %v2889_v13  ;;  %v6689_v10 = vsel %vm838_vm8, %v2776_v35, %v2777_v54  ;;  %v2862_v44 = vmul.f32 %v6602_v41, %v6672_v24  ;;  %v6698_v31 = vld [vmem:[%s7307_s3 + $0x4] ss:$0 sm:$0xff] }
 0xe66   : > { %v2904_v36 = vadd.f32 %v6658_v11, %v2890_v6  ;;  %v2869_v1 = vadd.f32 %v2861_v20, %v2847_v60  ;;  %v2883_v58 = vmul.f32 %v6627_v40, %v6677_v30  ;;  %v2884_v37 = vmul.f32 %v6627_v40, %v6689_v10 }
 0xe67   : > { %v2870_v16 = vadd.f32 %v2862_v44, %v2848_v51  ;;  %v2731_v34 = vrot.slane %v6648_v19, 7  ;;  %v2732_v33 = vrot.slane %v6667_v39, 7  ;;  %v2778_v50 = vrot.slane %v6667_v39, 1 }
 0xe68   : > { %v2911_v25 = vpack.c.bf16 %v2904_v36, %v2903_v43  ;;  %v2891_v49 = vadd.f32 %v2883_v58, %v2869_v1  ;;  %v2779_v53 = vrot.slane %v6681_v14, 1  ;;  %v2719_v45 = vmul.f32 %v6698_v31, %v6580_v27 }
 0xe69   : > { %v2892_v62 = vadd.f32 %v2884_v37, %v2870_v16  ;;  %v2737_v52 = vsel %vm791_vm6, %v2731_v34, %v2732_v33  ;;  %v2738_v38 = vsel %vm791_vm6, %v2730_v55, %v2731_v34  ;;  %v2758_v12 = vmul.f32 %v6707_v59, %v6597_v5 }
 0xe6a   : > { %5050 = vmatprep.subr.bf16.mxu0 %v2911_v25  ;;  %v2782_v22 = vsel %vm838_vm8, %v2778_v50, %v2779_v53  ;;  %v6726_v35 = vsel %vm838_vm8, %v2777_v54, %v2778_v50  ;;  %v2850_v17 = vmul.f32 %v6607_v3, %v6667_v39  ;;  %v2905_v13 = vadd.f32 %v6658_v11, %v2891_v49 }
 0xe6b   : > { %5051 = vmatpush3.bf16.msra.mxu0 %v2911_v25  ;;  %v2906_v55 = vadd.f32 %v6658_v11, %v2892_v62  ;;  %v2849_v6 = vmul.f32 %v6607_v3, %v6648_v19  ;;  %v2863_v5 = vmul.f32 %v6602_v41, %v2738_v38  ;;  %v2864_v20 = vmul.f32 %v6602_v41, %v2737_v52 }
 0xe6c   : > { %v2886_v43 = vmul.f32 %v6627_v40, %v2782_v22  ;;  %v2733_v60 = vrot.slane %v6681_v14, 7  ;;  %v2788_v54 = vsel %vm838_vm8, %v2780_v15, %v2773_v28  ;;  %v2757_v36 = vmul.f32 %v6707_v59, %v6631_v18 }
 0xe6d   : > { %v2912_v51 = vpack.c.bf16 %v2906_v55, %v2905_v13  ;;  %v2871_v44 = vadd.f32 %v2863_v5, %v2849_v6  ;;  %v2885_v1 = vmul.f32 %v6627_v40, %v6726_v35  ;;  %v2872_v58 = vadd.f32 %v2864_v20, %v2850_v17 }
 0xe6e   : > { %v2735_v37 = vsel %vm791_vm6, %v2733_v60, %v2734_v42  ;;  %v2736_v27 = vsel %vm791_vm6, %v2732_v33, %v2733_v60  ;;  %v6754_v28 = vsel %vm838_vm8, %v2779_v53, %v2780_v15  ;;  %v6758_v25 = vsel %vm612_vm9, %v2788_v54, 0.0  ;;  %v6766_v42 = vld [vmem:[%s7307_s3 + $0x5] ss:$0 sm:$0xff] }
 0xe6f   : > { %5052 = vmatprep.subr.bf16.mxu0 %v2912_v51  ;;  %v2893_v18 = vadd.f32 %v2885_v1, %v2871_v44  ;;  %v2851_v16 = vmul.f32 %v6607_v3, %v6681_v14  ;;  %v2865_v34 = vmul.f32 %v6602_v41, %v2736_v27  ;;  %v2894_v57 = vadd.f32 %v2886_v43, %v2872_v58 }
 0xe70   : > { %5053 = vmatpush3.bf16.msra.mxu0 %v2912_v51  ;;  %v2852_v33 = vmul.f32 %v6607_v3, %v6586_v2  ;;  %v2866_v49 = vmul.f32 %v6602_v41, %v2735_v37  ;;  %v2720_v56 = vmul.f32 %v6698_v31, %v6577_v21  ;;  %v2804_v50 = vmul.f32 %v6766_v42, %v6653_v61 }
 0xe71   : > { %v2873_v53 = vadd.f32 %v2865_v34, %v2851_v16  ;;  %v2887_v15 = vmul.f32 %v6627_v40, %v6754_v28  ;;  %v2765_v62 = vadd.f32 %v2757_v36, %v2719_v45  ;;  %v2907_v17 = vadd.f32 %v6658_v11, %v2893_v18 }
 0xe72   : > { %v2908_v13 = vadd.f32 %v6658_v11, %v2894_v57  ;;  %v2874_v55 = vadd.f32 %v2866_v49, %v2852_v33  ;;  %v2888_v3 = vmul.f32 %v6627_v40, %v6758_v25  ;;  %v2803_v41 = vmul.f32 %v6766_v42, %v6622_v63  ;;  %v4669_v63 = vld [vmem:[%s7308_s4 + $0x1] ss:$0 sm:$0xff] }
 0xe73   : > { %v2895_v21 = vadd.f32 %v2887_v15, %v2873_v53  ;;  %v2766_v6 = vadd.f32 %v2758_v12, %v2720_v56  ;;  %v2759_v45 = vmul.f32 %v6707_v59, %v6664_v26  ;;  %v2760_v54 = vmul.f32 %v6707_v59, %v6672_v24  ;;  %v5265_v15 = vld [vmem:[%s7312_s8 + $0x10] sm:$0xff]  }
 0xe74   : > { %v2913_v5 = vpack.c.bf16 %v2908_v13, %v2907_v17  ;;  %v2896_v61 = vadd.f32 %v2888_v3, %v2874_v55  ;;  %v2811_v43 = vadd.f32 %v2803_v41, %v2765_v62  ;;  %v2722_v12 = vmul.f32 %v6698_v31, %v6609_v47 }
 0xe75   : > { %v2909_v20 = vadd.f32 %v6658_v11, %v2895_v21  ;;  %v2812_v60 = vadd.f32 %v2804_v50, %v2766_v6  ;;  %v2761_v36 = vmul.f32 %v6707_v59, %v2738_v38  ;;  %v2762_v51 = vmul.f32 %v6707_v59, %v2737_v52 }
 0xe76   : > { %5054 = vmatprep.subr.bf16.mxu0 %v2913_v5  ;;  %v2910_v40 = vadd.f32 %v6658_v11, %v2896_v61  ;;  %v2721_v26 = vmul.f32 %v6698_v31, %v6611_v0  ;;  %v2806_v24 = vmul.f32 %v6766_v42, %v6689_v10  ;;  %v5263_v11 = vld [vmem:[%s7309_s5 + $0x10] sm:$0xff]   ;;  %v2724_v1 = vmul.f32 %v6698_v31, %v6667_v39 }
 0xe77   : > { %5055 = vmatpush3.bf16.msra.mxu0 %v2913_v5  ;;  %v2808_v47 = vmul.f32 %v6766_v42, %v2782_v22  ;;  %v2825_v38 = vadd.f32 %v4669_v63, %v2811_v43  ;;  %v2826_v58 = vadd.f32 %v4669_v63, %v2812_v60  ;;  %v2723_v52 = vmul.f32 %v6698_v31, %v6648_v19  ;;  %v5264_v22 = vld [vmem:[%s7309_s5 + $0x18] sm:$0xff]  }
 0xe78   : > { %v2914_v44 = vpack.c.bf16 %v2910_v40, %v2909_v20  ;;  %v2767_v18 = vadd.f32 %v2759_v45, %v2721_v26  ;;  %v2768_v0 = vadd.f32 %v2760_v54, %v2722_v12  ;;  %v2770_v16 = vadd.f32 %v2762_v51, %v2724_v1 }
 0xe79   : > { %v2769_v10 = vadd.f32 %v2761_v36, %v2723_v52  ;;  %v2805_v34 = vmul.f32 %v6766_v42, %v6677_v30  ;;  %v2763_v33 = vmul.f32 %v6707_v59, %v2736_v27  ;;  %v2764_v39 = vmul.f32 %v6707_v59, %v2735_v37 }
 0xe7a   : > { %5056 = vmatprep.subr.bf16.mxu0 %v2914_v44  ;;  %v2814_v57 = vadd.f32 %v2806_v24, %v2768_v0  ;;  %v2807_v19 = vmul.f32 %v6766_v42, %v6726_v35  ;;  %v2969_v49 = vpack.c.bf16 %v2826_v58, %v2825_v38  ;;  %v2816_v56 = vadd.f32 %v2808_v47, %v2770_v16 }
 0xe7b   : > { %5057 = vmatpush3.bf16.msra.mxu0 %v2914_v44  ;;  %v2813_v50 = vadd.f32 %v2805_v34, %v2767_v18  ;;  %v2725_v30 = vmul.f32 %v6698_v31, %v6681_v14  ;;  %v2726_v59 = vmul.f32 %v6698_v31, %v6586_v2  ;;  %v2810_v14 = vmul.f32 %v6766_v42, %v6758_v25  ;;  %v5268_v25 = vld [vmem:[%s7313_s9 + $0x18] sm:$0xff]  }
 0xe7c   : > { %5062 = vmatprep.subr.bf16.mxu0 %v5263_v11  ;;  %v2815_v37 = vadd.f32 %v2807_v19, %v2769_v10  ;;  %v2828_v27 = vadd.f32 %v4669_v63, %v2814_v57  ;;  %v2830_v62 = vadd.f32 %v4669_v63, %v2816_v56  ;;  %5084 = vmatprep.subr.bf16.mxu1 %v5268_v25 }
 0xe7d   : > { %v2771_v53 = vadd.f32 %v2763_v33, %v2725_v30  ;;  %v2772_v35 = vadd.f32 %v2764_v39, %v2726_v59  ;;  %v2827_v2 = vadd.f32 %v4669_v63, %v2813_v50  ;;  %5085 = vmatpush3.bf16.msra.mxu1 %v5268_v25 }
 0xe7e   : > { %5059 = vmatmul.mubr.msk.bf16.vlgmr.msra.gmra.mrb[40].mxu0 %vm971_vm3, %v5733_v8  ;;  %v2809_v8 = vmul.f32 %v6766_v42, %v6754_v28  ;;  %v2829_v31 = vadd.f32 %v4669_v63, %v2815_v37  ;;  %v5267_v28 = vld [vmem:[%s7312_s8 + $0x18] sm:$0xff]  }
 0xe7f   : > { %5063 = vmatpush3.bf16.msra.mxu0 %v5263_v11  ;;  %5066 = vmatprep.mubr.msk.bf16.mxu0 %vm631_vm0, %v2969_v49  ;;  %v2970_v17 = vpack.c.bf16 %v2828_v27, %v2827_v2  ;;  %v2818_v55 = vadd.f32 %v2810_v14, %v2772_v35 }
 0xe80   : > { %5064 = vmatprep.subr.bf16.mxu0 %v5264_v22  ;;  %v2817_v13 = vadd.f32 %v2809_v8, %v2771_v53  ;;  %v2971_v3 = vpack.c.bf16 %v2830_v62, %v2829_v31 }
 0xe81   : > { %v2832_v21 = vadd.f32 %v4669_v63, %v2818_v55 }
 0xe82   : > { %v2831_v41 = vadd.f32 %v4669_v63, %v2817_v13 }
 0xe83   : > { %5065 = vmatpush3.bf16.msra.mxu0 %v5264_v22 }
 0xe84   : > { %5074 = vmatprep.subr.bf16.mxu0 %v5265_v15  ;;  %v2972_v6 = vpack.c.bf16 %v2832_v21, %v2831_v41 }
 0xe86   : > { %5067 = vmatmul.mubr.msk.bf16.vlgmr.msra.gmra.mrb[44].mxu0 %vm631_vm0, %v2970_v17 }
 0xe87   : > { %5070 = vmatprep.mubr.msk.bf16.mxu0 %vm631_vm0, %v2971_v3  ;;  %5075 = vmatpush3.bf16.msra.mxu0 %v5265_v15 }
 0xe88   : > { %5076 = vmatprep.subr.bf16.mxu0 %v5267_v28 }
 0xe8b   : > { %5077 = vmatpush3.bf16.msra.mxu0 %v5267_v28 }
 0xe8e   : > { %5071 = vmatmul.mubr.msk.bf16.gmra.mrb[48].mxu0 %vm631_vm0, %v2972_v6 }
 0xf51   : > { %v5060_v42 = vpop.f32.mrb[40].mxu0 }
 0xf52   : > { %v2949_v5 = vpop.f32.mrb[41].mxu0 }
 0xf53   : > { %v5061_v61 = vpop.f32.mrb[42].mxu0 }
 0xf54   : > { %v3068_v20 = vpack.c.bf16 %v5061_v61, %v5060_v42  ;;  %v2952_v43 = vpop.f32.mrb[43].mxu0 }
 0xf55   : > { %v3067_v60 = vpack.c.bf16 %v2952_v43, %v2949_v5 }
 0xf57   : > { %5078 = vmatprep.mubr.msk.bf16.mxu0 %vm631_vm0, %v3067_v60  ;;  %5086 = vmatprep.mubr.msk.bf16.mxu1 %vm631_vm0, %v3067_v60 }
 0xf58   : > { %5079 = vmatmul.mubr.msk.bf16.vlgmr.msra.gmra.mrb[52].mxu0 %vm631_vm0, %v3068_v20  ;;  %5087 = vmatmul.mubr.msk.bf16.vlgmr.msra.gmra.mrb[36].mxu1 %vm631_vm0, %v3068_v20 }
 0xf59   : > { %v5068_v45 = vpop.f32.mrb[44].mxu0 }
 0xf5a   : > { %v3031_v54 = vpop.f32.mrb[45].mxu0 }
 0xf5b   : > { %v5069_v40 = vpop.f32.mrb[46].mxu0 }
 0xf5c   : > { %v6844_v63 = vpack.c.bf16 %v5069_v40, %v5068_v45  ;;  %v3034_v12 = vpop.f32.mrb[47].mxu0 }
 0xf5d   : > { %v6846_v36 = vpack.c.bf16 %v3034_v12, %v3031_v54 }
 0xf5f   : > { %5094 = vmatprep.mubr.msk.bf16.mxu0 %vm1270_vm10, %v6846_v36 }
 0xf61   : > { %v5072_v51 = vpop.f32.mrb[48].mxu0 }
 0xf62   : > { %v3047_v26 = vpop.f32.mrb[49].mxu0 }
 0xf63   : > { %v5073_v24 = vpop.f32.mrb[50].mxu0 }
 0xf64   : > { %v6850_v44 = vpack.c.bf16 %v5073_v24, %v5072_v51  ;;  %v3050_v11 = vpop.f32.mrb[51].mxu0 }
 0xf65   : > { %v6852_v1 = vpack.c.bf16 %v3050_v11, %v3047_v26 }
0x102b   : > { %v5080_v47 = vpop.f32.mrb[52].mxu0  ;;  %v5088_v38 = vpop.f32.mrb[36].mxu1 }
0x102c   : > { %v3121_v58 = vpop.f32.mrb[53].mxu0  ;;  %v3187_v52 = vpop.f32.mrb[37].mxu1 }
0x102d   : > { %v5081_v18 = vpop.f32.mrb[54].mxu0  ;;  %v5089_v0 = vpop.f32.mrb[38].mxu1 }
0x102e   : > { %v6854_v10 = vpack.c.bf16 %v5081_v18, %v5080_v47  ;;  %v6856_v16 = vpack.c.bf16 %v5089_v0, %v5088_v38  ;;  %v3124_v34 = vpop.f32.mrb[55].mxu0  ;;  %v3190_v57 = vpop.f32.mrb[39].mxu1 }
0x102f   : > { %v6858_v33 = vpack.c.bf16 %v3124_v34, %v3121_v58  ;;  %v6860_v39 = vpack.c.bf16 %v3190_v57, %v3187_v52 }
0x1030   : > { %v3226_v19 = vsel %vm1270_vm10, %v6854_v10, 0 }
0x1031   : > { %5190 = vmatprep.subr.msk.bf16.mxu0 %vm1270_vm10, %v6858_v33  ;;  %5102 = vmatprep.subr.bf16.mxu1 %v6860_v39  ;;  %v3223_v22 = vsel %vm1270_vm10, %v6858_v33, 0 }
0x1032   : > { %5091 = vmatpush3.bf16.xpose.msra.mxu0 %v3223_v22  ;;  %5103 = vmatpush3.bf16.msra.mxu1 %v6860_v39 }
0x1033   : > { %5191 = vmatprep.subr.msk.bf16.mxu0 %vm1270_vm10, %v6854_v10  ;;  %5104 = vmatprep.subr.bf16.mxu1 %v6856_v16 }
0x1036   : > { %5105 = vmatpush3.bf16.msra.mxu1 %v6856_v16 }
0x103a   : > { %5093 = vmatpush3.bf16.xpose.msra.mxu0 %v3226_v19 }
0x1041   : > { %5095 = vmatmul.mubr.msk.bf16.vlgmr.msra.gmra.mrb[56].mxu0 %vm1270_vm10, %v6844_v63 }
0x1042   : > { %5098 = vmatprep.mubr.msk.bf16.mxu0 %vm1270_vm10, %v6852_v1 }
0x1049   : > { %5099 = vmatmul.mubr.msk.bf16.gmra.mrb[60].mxu0 %vm1270_vm10, %v6850_v44 }
0x1114   : > { %v5096_v49 = vpop.f32.mrb[56].mxu0 }
0x1115   : > { %v3262_v56 = vpop.f32.mrb[57].mxu0  ;;  %v3295_v37 = vmul.f32 0.25, %v5096_v49 }
0x1116   : > { %v3293_v50 = vmul.f32 0.25, %v3262_v56  ;;  %v5097_v30 = vpop.f32.mrb[58].mxu0 }
0x1117   : > { %v3265_v59 = vpop.f32.mrb[59].mxu0  ;;  %v3296_v35 = vmul.f32 0.25, %v5097_v30  ;;  %v3307_v8 = vsel %vm631_vm0, %v3295_v37, -inf }
0x1118   : > { %v3294_v27 = vmul.f32 0.25, %v3265_v59  ;;  %v3301_v53 = vsel %vm631_vm0, %v3293_v50, -inf }
0x1119   : > { %3302 = vmax.xlane.f32.xlu0 %v3301_v53  ;;  %v3310_v17 = vsel %vm631_vm0, %v3296_v35, -inf }
0x111a   : > { %v3304_v15 = vsel %vm631_vm0, %v3294_v27, -inf }
0x111b   : > { %3305 = vmax.xlane.f32.xlu1 %v3304_v15 }
0x111c   : > { %v5100_v62 = vpop.f32.mrb[60].mxu0 }
0x111d   : > { %3308 = vmax.xlane.f32.xlu0 %v3307_v8  ;;  %v3278_v14 = vpop.f32.mrb[61].mxu0  ;;  %v3299_v55 = vmul.f32 0.25, %v5100_v62 }
0x111e   : > { %v3297_v2 = vmul.f32 0.25, %v3278_v14  ;;  %v5101_v31 = vpop.f32.mrb[62].mxu0 }
0x111f   : > { %3311 = vmax.xlane.f32.xlu1 %v3310_v17  ;;  %v3281_v13 = vpop.f32.mrb[63].mxu0  ;;  %v3300_v21 = vmul.f32 0.25, %v5101_v31  ;;  %v3319_v28 = vsel %vm631_vm0, %v3299_v55, -inf }
0x1120   : > { %v3298_v3 = vmul.f32 0.25, %v3281_v13  ;;  %v3313_v41 = vsel %vm631_vm0, %v3297_v2, -inf }
0x1121   : > { %3314 = vmax.xlane.f32.xlu0 %v3313_v41  ;;  %v3322_v25 = vsel %vm631_vm0, %v3300_v21, -inf }
0x1122   : > { %v3316_v6 = vsel %vm631_vm0, %v3298_v3, -inf }
0x1123   : > { %3317 = vmax.xlane.f32.xlu1 %v3316_v6 }
0x1125   : > { %3320 = vmax.xlane.f32.xlu0 %v3319_v28 }
0x1127   : > { %3323 = vmax.xlane.f32.xlu1 %v3322_v25 }
0x11a6   : > { %v3303_v42 = vpop.xlane.xlu0 %3302 }
0x11a7   : > { %v3325_v5 = vsub.f32 %v3293_v50, %v3303_v42 }
0x11a8   : > { %v3306_v61 = vpop.xlane.xlu1 %3305 }
0x11a9   : > { %v3326_v43 = vsub.f32 %v3294_v27, %v3306_v61  ;;  %v3333_v45 = vmul.f32 1.442695, %v3325_v5 }
0x11aa   : > { %v3309_v20 = vpop.xlane.xlu0 %3308 }
0x11ab   : > { %v3327_v60 = vsub.f32 %v3295_v37, %v3309_v20  ;;  %v3335_v26 = vmul.f32 1.442695, %v3326_v43 }
0x11ac   : > { %v3312_v54 = vpop.xlane.xlu1 %3311 }
0x11ad   : > { %v3337_v40 = vmul.f32 1.442695, %v3327_v60  ;;  %v3328_v12 = vsub.f32 %v3296_v35, %v3312_v54 }
0x11ae   : > { %v3315_v51 = vpop.xlane.xlu0 %3314 }
0x11af   : > { %5425 = vpow2.f32 %v3337_v40  ;;  %v3339_v24 = vmul.f32 1.442695, %v3328_v12  ;;  %v3329_v11 = vsub.f32 %v3297_v2, %v3315_v51 }
0x11b0   : > { %5427 = vpow2.f32 %v3333_v45  ;;  %v3318_v27 = vpop.xlane.xlu1 %3317 }
0x11b1   : > { %5429 = vpow2.f32 %v3339_v24  ;;  %v3341_v58 = vmul.f32 1.442695, %v3329_v11  ;;  %v3330_v15 = vsub.f32 %v3298_v3, %v3318_v27 }
0x11b2   : > { %v3321_v47 = vpop.xlane.xlu0 %3320  ;;  %5431 = vpow2.f32 %v3335_v26 }
0x11b3   : > { %v3331_v38 = vsub.f32 %v3299_v55, %v3321_v47  ;;  %v3343_v8 = vmul.f32 1.442695, %v3330_v15 }
0x11b4   : > { %v3324_v53 = vpop.xlane.xlu1 %3323 }
0x11b5   : > { %v3345_v52 = vmul.f32 1.442695, %v3331_v38  ;;  %v3332_v35 = vsub.f32 %v3300_v21, %v3324_v53 }
0x11b7   : > { %5433 = vpow2.f32 %v3345_v52  ;;  %v3347_v62 = vmul.f32 1.442695, %v3332_v35 }
0x11b8   : > { %5435 = vpow2.f32 %v3341_v58 }
0x11b9   : > { %v5426_v18 = vpop.eup %5425  ;;  %5437 = vpow2.f32 %v3347_v62 }
0x11ba   : > { %v5428_v0 = vpop.eup %5427  ;;  %v3355_v34 = vsel %vm631_vm0, %v5426_v18, 0.0  ;;  %5439 = vpow2.f32 %v3343_v8 }
0x11bb   : > { %v5430_v57 = vpop.eup %5429  ;;  %3356 = vadd.xlane.f32.xlu0 %v3355_v34  ;;  %v3349_v49 = vsel %vm631_vm0, %v5428_v0, 0.0 }
0x11bc   : > { %v3358_v22 = vsel %vm631_vm0, %v5430_v57, 0.0  ;;  %v5432_v19 = vpop.eup %5431 }
0x11bd   : > { %3359 = vadd.xlane.f32.xlu1 %v3358_v22  ;;  %v3352_v56 = vsel %vm631_vm0, %v5432_v19, 0.0 }
0x11bf   : > { %3350 = vadd.xlane.f32.xlu0 %v3349_v49 }
0x11c1   : > { %v6892_v50 = vpop.eup %5433  ;;  %3353 = vadd.xlane.f32.xlu1 %v3352_v56 }
0x11c2   : > { %v3367_v30 = vsel %vm631_vm0, %v6892_v50, 0.0  ;;  %v6896_v59 = vpop.eup %5435 }
0x11c3   : > { %3368 = vadd.xlane.f32.xlu0 %v3367_v30  ;;  %v3361_v37 = vsel %vm631_vm0, %v6896_v59, 0.0  ;;  %v5438_v14 = vpop.eup %5437 }
0x11c4   : > { %v3370_v2 = vsel %vm631_vm0, %v5438_v14, 0.0  ;;  %v5440_v31 = vpop.eup %5439 }
0x11c7   : > { %3362 = vadd.xlane.f32.xlu0 %v3361_v37 }
0x11d2   : > { %3486 = vrot.lane.b32.xlu1 %v6854_v10, %s5554_s26  ;;  %v3364_v10 = vsel %vm631_vm0, %v5440_v31, 0.0 }
0x11dd   : > { %3484 = vrot.lane.b32.xlu0 %v6858_v33, %s5554_s26 }
0x11e1   : > { %3478 = vrot.lane.b32.xlu0 %v6852_v1, %s5554_s26 }
0x11f6   : > { %3371 = vadd.xlane.f32.xlu1 %v3370_v2 }
0x11fa   : > { %3365 = vadd.xlane.f32.xlu1 %v3364_v10 }
0x120b   : > { %3474 = vrot.lane.b32.xlu1 %v6846_v36, %s5554_s26 }
0x120f   : > { %3476 = vrot.lane.b32.xlu1 %v6844_v63, %s5554_s26 }
0x1213   : > { %3480 = vrot.lane.b32.xlu1 %v6850_v44, %s5554_s26 }
0x1248   : > { %v3357_v1 = vpop.xlane.xlu0 %3356 }
0x124a   : > { %v3360_v33 = vpop.xlane.xlu1 %3359 }
0x124b   : > { %5441 = vrcp.f32 %v3360_v33 }
0x124c   : > { %v3351_v17 = vpop.xlane.xlu0 %3350 }
0x124d   : > { %5443 = vrcp.f32 %v3351_v17 }
0x124e   : > { %5445 = vrcp.f32 %v3357_v1  ;;  %v3354_v13 = vpop.xlane.xlu1 %3353 }
0x124f   : > { %5447 = vrcp.f32 %v3354_v13 }
0x1250   : > { %v3369_v55 = vpop.xlane.xlu0 %3368 }
0x1252   : > { %v3487_v43 = vpop.permute.xlu1 %3486 }
0x1253   : > { %v3504_v60 = vsel %vm1270_vm10, %v3487_v43, 0 }
0x1254   : > { %v3363_v3 = vpop.xlane.xlu0 %3362 }
0x1255   : > { %v5442_v41 = vpop.eup %5441 }
0x1256   : > { %v3384_v25 = vmul.f32 %v5442_v41, %v5430_v57 }
0x1257   : > { %v5444_v21 = vpop.eup %5443 }
0x1258   : > { %v5446_v6 = vpop.eup %5445  ;;  %v3485_v36 = vpop.permute.xlu0 %3484  ;;  %v3381_v63 = vmul.f32 %v5444_v21, %v5428_v0 }
0x1259   : > { %v5448_v28 = vpop.eup %5447  ;;  %5192 = vmatprep.subr.msk.bf16.mxu1 %vm1270_vm10, %v3485_v36  ;;  %v3383_v42 = vmul.f32 %v5446_v6, %v5426_v18  ;;  %v3501_v20 = vsel %vm1270_vm10, %v3485_v36, 0 }
0x125a   : > { %v3382_v44 = vmul.f32 %v5448_v28, %v5432_v19 }
0x125b   : > { %v3390_v61 = vpack.c.bf16 %v3384_v25, %v3383_v42 }
0x125c   : > { %v3389_v5 = vpack.c.bf16 %v3382_v44, %v3381_v63  ;;  %v3479_v34 = vpop.permute.xlu0 %3478 }
0x125e   : > { %5106 = vmatprep.mubr.msk.bf16.mxu1 %vm631_vm0, %v3389_v5 }
0x125f   : > { %5107 = vmatmul.mubr.msk.bf16.vlgmr.msra.gmra.mrb[40].mxu1 %vm631_vm0, %v3390_v61 }
0x1260   : > { %5115 = vmatpush3.bf16.xpose.msra.mxu1 %v3501_v20 }
0x1261   : > { %5193 = vmatprep.subr.msk.bf16.mxu1 %vm1270_vm10, %v3487_v43 }
0x1268   : > { %5117 = vmatpush3.bf16.xpose.msra.mxu1 %v3504_v60 }
0x1283   : > { %v3372_v45 = vpop.xlane.xlu1 %3371 }
0x1284   : > { %5449 = vrcp.f32 %v3372_v45 }
0x1285   : > { %5451 = vrcp.f32 %v3363_v3 }
0x1286   : > { %5453 = vrcp.f32 %v3369_v55 }
0x1287   : > { %v3366_v54 = vpop.xlane.xlu1 %3365 }
0x1288   : > { %5455 = vrcp.f32 %v3366_v54 }
0x128b   : > { %v3475_v18 = vpop.permute.xlu1 %3474 }
0x128e   : > { %v5450_v40 = vpop.eup %5449 }
0x128f   : > { %v5452_v12 = vpop.eup %5451  ;;  %v3388_v24 = vmul.f32 %v5450_v40, %v5438_v14  ;;  %v3477_v0 = vpop.permute.xlu1 %3476 }
0x1290   : > { %v5454_v51 = vpop.eup %5453  ;;  %v3385_v11 = vmul.f32 %v5452_v12, %v6896_v59 }
0x1291   : > { %v3387_v38 = vmul.f32 %v5454_v51, %v6892_v50 }
0x1292   : > { %v5456_v26 = vpop.eup %5455 }
0x1293   : > { %v3386_v47 = vmul.f32 %v5456_v26, %v5440_v31  ;;  %v3392_v52 = vpack.c.bf16 %v3388_v24, %v3387_v38  ;;  %v3481_v57 = vpop.permute.xlu1 %3480 }
0x1295   : > { %v3391_v58 = vpack.c.bf16 %v3386_v47, %v3385_v11 }
0x1297   : > { %5110 = vmatprep.mubr.msk.bf16.mxu1 %vm631_vm0, %v3391_v58 }
0x1298   : > { %5111 = vmatmul.mubr.msk.bf16.gmra.mrb[44].mxu1 %vm631_vm0, %v3392_v52 }
0x1299   : > { %5118 = vmatprep.mubr.msk.bf16.mxu1 %vm1270_vm10, %v3475_v18 }
0x12a0   : > { %5119 = vmatmul.mubr.msk.bf16.vlgmr.msra.gmra.mrb[48].mxu1 %vm1270_vm10, %v3477_v0 }
0x12a1   : > { %5122 = vmatprep.mubr.msk.bf16.mxu1 %vm1270_vm10, %v3479_v34 }
0x12a8   : > { %5123 = vmatmul.mubr.msk.bf16.gmra.mrb[52].mxu1 %vm1270_vm10, %v3481_v57 }
0x1332   : > { %v6928_v22 = vpop.f32.mrb[40].mxu1 }
0x1333   : > { %v6930_v19 = vpop.f32.mrb[41].mxu1 }
0x1334   : > { %v6932_v49 = vpop.f32.mrb[42].mxu1 }
0x1335   : > { %v6934_v56 = vpop.f32.mrb[43].mxu1 }
0x136b   : > { %v6936_v50 = vpop.f32.mrb[44].mxu1 }
0x136c   : > { %v6938_v30 = vpop.f32.mrb[45].mxu1 }
0x136d   : > { %v6940_v59 = vpop.f32.mrb[46].mxu1 }
0x136e   : > { %v6942_v37 = vpop.f32.mrb[47].mxu1 }
0x1373   : > { %v5120_v27 = vpop.f32.mrb[48].mxu1 }
0x1374   : > { %v3540_v53 = vpop.f32.mrb[49].mxu1  ;;  %v3573_v8 = vmul.f32 0.25, %v5120_v27 }
0x1375   : > { %v3571_v35 = vmul.f32 0.25, %v3540_v53  ;;  %v5121_v15 = vpop.f32.mrb[50].mxu1 }
0x1376   : > { %v3543_v62 = vpop.f32.mrb[51].mxu1  ;;  %v3574_v10 = vmul.f32 0.25, %v5121_v15  ;;  %v3585_v33 = vsel %vm631_vm0, %v3573_v8, -inf }
0x1377   : > { %v3572_v14 = vmul.f32 0.25, %v3543_v62  ;;  %v3579_v2 = vsel %vm631_vm0, %v3571_v35, -inf }
0x1378   : > { %3580 = vmax.xlane.f32.xlu0 %v3579_v2  ;;  %v3588_v21 = vsel %vm631_vm0, %v3574_v10, -inf }
0x1379   : > { %v3582_v31 = vsel %vm631_vm0, %v3572_v14, -inf }
0x137a   : > { %3583 = vmax.xlane.f32.xlu1 %v3582_v31 }
0x137b   : > { %v5124_v1 = vpop.f32.mrb[52].mxu1 }
0x137c   : > { %3586 = vmax.xlane.f32.xlu0 %v3585_v33  ;;  %v3556_v17 = vpop.f32.mrb[53].mxu1  ;;  %v3577_v28 = vmul.f32 0.25, %v5124_v1 }
0x137d   : > { %v5125_v13 = vpop.f32.mrb[54].mxu1  ;;  %v3575_v3 = vmul.f32 0.25, %v3556_v17 }
0x137e   : > { %v3559_v55 = vpop.f32.mrb[55].mxu1  ;;  %v3578_v6 = vmul.f32 0.25, %v5125_v13  ;;  %v3597_v44 = vsel %vm631_vm0, %v3577_v28, -inf }
0x137f   : > { %v3576_v41 = vmul.f32 0.25, %v3559_v55  ;;  %v3591_v25 = vsel %vm631_vm0, %v3575_v3, -inf }
0x1380   : > { %3589 = vmax.xlane.f32.xlu0 %v3588_v21  ;;  %v3600_v63 = vsel %vm631_vm0, %v3578_v6, -inf }
0x1381   : > { %v3594_v36 = vsel %vm631_vm0, %v3576_v41, -inf }
0x1382   : > { %3595 = vmax.xlane.f32.xlu1 %v3594_v36 }
0x1384   : > { %3592 = vmax.xlane.f32.xlu0 %v3591_v25 }
0x1386   : > { %3601 = vmax.xlane.f32.xlu1 %v3600_v63 }
0x1388   : > { %3598 = vmax.xlane.f32.xlu0 %v3597_v44 }
0x1405   : > { %v3581_v42 = vpop.xlane.xlu0 %3580 }
0x1406   : > { %v3603_v5 = vsub.f32 %v3571_v35, %v3581_v42 }
0x1407   : > { %v3584_v61 = vpop.xlane.xlu1 %3583 }
0x1408   : > { %v3611_v60 = vmul.f32 1.442695, %v3603_v5  ;;  %v3604_v45 = vsub.f32 %v3572_v14, %v3584_v61 }
0x1409   : > { %v3587_v20 = vpop.xlane.xlu0 %3586 }
0x140a   : > { %v3605_v43 = vsub.f32 %v3573_v8, %v3587_v20  ;;  %v3613_v26 = vmul.f32 1.442695, %v3604_v45 }
0x140c   : > { %v3615_v54 = vmul.f32 1.442695, %v3605_v43 }
0x140d   : > { %v3590_v40 = vpop.xlane.xlu0 %3589 }
0x140e   : > { %5457 = vpow2.f32 %v3615_v54  ;;  %v3606_v12 = vsub.f32 %v3574_v10, %v3590_v40 }
0x140f   : > { %v3596_v51 = vpop.xlane.xlu1 %3595  ;;  %5459 = vpow2.f32 %v3611_v60 }
0x1410   : > { %v3617_v24 = vmul.f32 1.442695, %v3606_v12  ;;  %v3608_v47 = vsub.f32 %v3576_v41, %v3596_v51 }
0x1411   : > { %v3593_v11 = vpop.xlane.xlu0 %3592 }
0x1412   : > { %5461 = vpow2.f32 %v3617_v24  ;;  %v3607_v58 = vsub.f32 %v3575_v3, %v3593_v11  ;;  %v3621_v57 = vmul.f32 1.442695, %v3608_v47 }
0x1413   : > { %v3602_v38 = vpop.xlane.xlu1 %3601  ;;  %5463 = vpow2.f32 %v3613_v26 }
0x1414   : > { %v3610_v52 = vsub.f32 %v3578_v6, %v3602_v38  ;;  %v3619_v53 = vmul.f32 1.442695, %v3607_v58 }
0x1415   : > { %v3599_v18 = vpop.xlane.xlu0 %3598 }
0x1416   : > { %v3625_v0 = vmul.f32 1.442695, %v3610_v52  ;;  %v3609_v34 = vsub.f32 %v3577_v28, %v3599_v18 }
0x1418   : > { %v6952_v27 = vpop.eup %5457  ;;  %5465 = vpow2.f32 %v3625_v0  ;;  %v3623_v35 = vmul.f32 1.442695, %v3609_v34 }
0x1419   : > { %v3633_v15 = vsel %vm631_vm0, %v6952_v27, 0.0  ;;  %v5460_v62 = vpop.eup %5459 }
0x141a   : > { %5467 = vpow2.f32 %v3623_v35  ;;  %3634 = vadd.xlane.f32.xlu0 %v3633_v15  ;;  %v3627_v14 = vsel %vm631_vm0, %v5460_v62, 0.0  ;;  %v5270_v35 = vld [vmem:[%s7314_s10 + $0x18] sm:$0xff]  }
0x141b   : > { %5469 = vpow2.f32 %v3621_v57 }
0x141c   : > { %v5462_v8 = vpop.eup %5461  ;;  %5471 = vpow2.f32 %v3619_v53 }
0x141d   : > { %v3636_v2 = vsel %vm631_vm0, %v5462_v8, 0.0  ;;  %v5464_v31 = vpop.eup %5463 }
0x141e   : > { %3628 = vadd.xlane.f32.xlu0 %v3627_v14  ;;  %3637 = vadd.xlane.f32.xlu1 %v3636_v2  ;;  %v3630_v10 = vsel %vm631_vm0, %v5464_v31, 0.0 }
0x1422   : > { %v5466_v1 = vpop.eup %5465  ;;  %3631 = vadd.xlane.f32.xlu1 %v3630_v10 }
0x1423   : > { %v3648_v55 = vsel %vm631_vm0, %v5466_v1, 0.0 }
0x1424   : > { %v5468_v33 = vpop.eup %5467 }
0x1425   : > { %v5470_v17 = vpop.eup %5469  ;;  %v3645_v13 = vsel %vm631_vm0, %v5468_v33, 0.0 }
0x1426   : > { %v5472_v3 = vpop.eup %5471  ;;  %3646 = vadd.xlane.f32.xlu0 %v3645_v13  ;;  %3649 = vadd.xlane.f32.xlu1 %v3648_v55  ;;  %v3642_v21 = vsel %vm631_vm0, %v5470_v17, 0.0 }
0x1427   : > { %v3639_v41 = vsel %vm631_vm0, %v5472_v3, 0.0 }
0x142a   : > { %3640 = vadd.xlane.f32.xlu0 %v3639_v41  ;;  %3643 = vadd.xlane.f32.xlu1 %v3642_v21 }
0x143b   : > { %3675 = vrot.lane.b32.xlu1 %v6856_v16, %s5554_s26 }
0x1440   : > { %3673 = vrot.lane.b32.xlu0 %v6860_v39, %s5554_s26 }
0x14a7   : > { %v3635_v6 = vpop.xlane.xlu0 %3634 }
0x14ab   : > { %v3629_v36 = vpop.xlane.xlu0 %3628  ;;  %v3638_v28 = vpop.xlane.xlu1 %3637 }
0x14ac   : > { %5473 = vrcp.f32 %v3629_v36 }
0x14af   : > { %v3632_v25 = vpop.xlane.xlu1 %3631 }
0x14b0   : > { %5475 = vrcp.f32 %v3632_v25 }
0x14b1   : > { %5477 = vrcp.f32 %v3638_v28 }
0x14b2   : > { %5479 = vrcp.f32 %v3635_v6 }
0x14b3   : > { %v3647_v63 = vpop.xlane.xlu0 %3646  ;;  %v3650_v44 = vpop.xlane.xlu1 %3649 }
0x14b4   : > { %5481 = vrcp.f32 %v3647_v63 }
0x14b5   : > { %5483 = vrcp.f32 %v3650_v44 }
0x14b6   : > { %v5474_v61 = vpop.eup %5473 }
0x14b7   : > { %v3641_v42 = vpop.xlane.xlu0 %3640  ;;  %v3644_v5 = vpop.xlane.xlu1 %3643  ;;  %v3659_v43 = vmul.f32 %v5474_v61, %v5460_v62 }
0x14b8   : > { %5485 = vrcp.f32 %v3641_v42 }
0x14b9   : > { %5487 = vrcp.f32 %v3644_v5 }
0x14ba   : > { %v5476_v16 = vpop.eup %5475 }
0x14bb   : > { %v5478_v20 = vpop.eup %5477  ;;  %v3674_v39 = vpop.permute.xlu0 %3673  ;;  %v3660_v60 = vmul.f32 %v5476_v16, %v5464_v31 }
0x14bc   : > { %5126 = vmatprep.subr.bf16.mxu0 %v3674_v39  ;;  %v5480_v45 = vpop.eup %5479  ;;  %v3676_v54 = vpop.permute.xlu1 %3675  ;;  %v3662_v12 = vmul.f32 %v5478_v20, %v5462_v8 }
0x14bd   : > { %5127 = vmatpush3.bf16.msra.mxu0 %v3674_v39  ;;  %v3667_v40 = vpack.c.bf16 %v3660_v60, %v3659_v43  ;;  %v3661_v26 = vmul.f32 %v5480_v45, %v6952_v27  ;;  %v5269_v27 = vld [vmem:[%s7314_s10 + $0x10] sm:$0xff]  }
0x14be   : > { %5128 = vmatprep.subr.bf16.mxu0 %v3676_v54  ;;  %v5482_v51 = vpop.eup %5481  ;;  %5138 = vmatprep.subr.bf16.mxu1 %v5269_v27 }
0x14bf   : > { %5130 = vmatprep.mubr.msk.bf16.mxu0 %vm631_vm0, %v3667_v40  ;;  %v5484_v24 = vpop.eup %5483  ;;  %v3668_v47 = vpack.c.bf16 %v3662_v12, %v3661_v26  ;;  %v3665_v0 = vmul.f32 %v5482_v51, %v5468_v33  ;;  %5139 = vmatpush3.bf16.msra.mxu1 %v5269_v27  ;;  %v4727_v40 = vld [vmem:[%s7315_s11 + $0x1] ss:$0 sm:$0xff] }
0x14c0   : > { %v3666_v34 = vmul.f32 %v5484_v24, %v5466_v1  ;;  %5140 = vmatprep.subr.bf16.mxu1 %v5270_v35 }
0x14c1   : > { %5129 = vmatpush3.bf16.msra.mxu0 %v3676_v54 }
0x14c2   : > { %v5486_v11 = vpop.eup %5485  ;;  %v3670_v57 = vpack.c.bf16 %v3666_v34, %v3665_v0 }
0x14c3   : > { %v5488_v38 = vpop.eup %5487  ;;  %v3663_v58 = vmul.f32 %v5486_v11, %v5472_v3  ;;  %5141 = vmatpush3.bf16.msra.mxu1 %v5270_v35 }
0x14c4   : > { %5131 = vmatmul.mubr.msk.bf16.vlgmr.msra.gmra.mrb[64].mxu0 %vm631_vm0, %v3668_v47  ;;  %v3664_v52 = vmul.f32 %v5488_v38, %v5470_v17 }
0x14c6   : > { %v3669_v18 = vpack.c.bf16 %v3664_v52, %v3663_v58 }
0x14c8   : > { %5134 = vmatprep.mubr.msk.bf16.mxu0 %vm631_vm0, %v3669_v18 }
0x14cc   : > { %5135 = vmatmul.mubr.msk.bf16.gmra.mrb[68].mxu0 %vm631_vm0, %v3670_v57 }
0x1597   : > { %v5132_v53 = vpop.f32.mrb[64].mxu0 }
0x1598   : > { %v3725_v15 = vpop.f32.mrb[65].mxu0 }
0x1599   : > { %v5133_v62 = vpop.f32.mrb[66].mxu0 }
0x159a   : > { %v5230_v8 = vpack.i.bf16 %v5133_v62, %v5132_v53  ;;  %v3728_v14 = vpop.f32.mrb[67].mxu0 }
0x159b   : > { %v5225_v2 = vpack.i.bf16 %v3728_v14, %v3725_v15 }
0x159d   : > { %5226 = vrot.lane.b32.xlu1 %v5225_v2, %s5555_s22 }
0x159f   : > { %v5136_v31 = vpop.f32.mrb[68].mxu0 }
0x15a0   : > { %v3741_v10 = vpop.f32.mrb[69].mxu0 }
0x15a1   : > { %5231 = vrot.lane.b32.xlu1 %v5230_v8, %s5555_s22  ;;  %v5137_v1 = vpop.f32.mrb[70].mxu0 }
0x15a2   : > { %v5240_v33 = vpack.i.bf16 %v5137_v1, %v5136_v31  ;;  %v3744_v17 = vpop.f32.mrb[71].mxu0 }
0x15a3   : > { %v5235_v13 = vpack.i.bf16 %v3744_v17, %v3741_v10 }
0x15a5   : > { %5241 = vrot.lane.b32.xlu1 %v5240_v33, %s5555_s22  ;;  %5236 = vrot.lane.b32.xlu0 %v5235_v13, %s5555_s22 }
0x160f   : > { %v5227_v55 = vpop.permute.xlu1 %5226 }
0x1610   : > { %v5229_v3 = vunpack.i.h.bf16 %v5227_v55  ;;  %v5228_v41 = vunpack.i.l.bf16 %v5227_v55 }
0x1612   : > { %v3789_v21 = vsel %vm1270_vm10, %v6934_v56, %v5229_v3  ;;  %v3788_v6 = vsel %vm1270_vm10, %v6930_v19, %v5228_v41 }
0x1613   : > { %v3801_v36 = vpack.c.bf16 %v3789_v21, %v3788_v6  ;;  %v5232_v28 = vpop.permute.xlu1 %5231 }
0x1614   : > { %v5234_v25 = vunpack.i.h.bf16 %v5232_v28  ;;  %v5233_v63 = vunpack.i.l.bf16 %v5232_v28 }
0x1615   : > { %5142 = vmatprep.mubr.msk.bf16.mxu1 %vm631_vm0, %v3801_v36 }
0x1616   : > { %v3791_v44 = vsel %vm1270_vm10, %v6932_v49, %v5234_v25  ;;  %v3790_v42 = vsel %vm1270_vm10, %v6928_v22, %v5233_v63 }
0x1617   : > { %v3802_v5 = vpack.c.bf16 %v3791_v44, %v3790_v42  ;;  %v5242_v61 = vpop.permute.xlu1 %5241  ;;  %v5237_v16 = vpop.permute.xlu0 %5236 }
0x1618   : > { %v5244_v20 = vunpack.i.h.bf16 %v5242_v61  ;;  %v5243_v56 = vunpack.i.l.bf16 %v5242_v61  ;;  %v5239_v39 = vunpack.i.h.bf16 %v5237_v16  ;;  %v5238_v43 = vunpack.i.l.bf16 %v5237_v16 }
0x1619   : > { %5143 = vmatmul.mubr.msk.bf16.vlgmr.msra.gmra.mrb[56].mxu1 %vm631_vm0, %v3802_v5 }
0x161a   : > { %v3795_v19 = vsel %vm1270_vm10, %v6940_v59, %v5244_v20  ;;  %v3794_v60 = vsel %vm1270_vm10, %v6936_v50, %v5243_v56  ;;  %v3793_v49 = vsel %vm1270_vm10, %v6942_v37, %v5239_v39  ;;  %v3792_v22 = vsel %vm1270_vm10, %v6938_v30, %v5238_v43 }
0x161b   : > { %v3804_v45 = vpack.c.bf16 %v3795_v19, %v3794_v60  ;;  %v3803_v54 = vpack.c.bf16 %v3793_v49, %v3792_v22 }
0x161d   : > { %5146 = vmatprep.mubr.msk.bf16.mxu1 %vm631_vm0, %v3803_v54 }
0x1621   : > { %5147 = vmatmul.mubr.msk.bf16.gmra.mrb[60].mxu1 %vm631_vm0, %v3804_v45 }
0x16ec   : > { %v5144_v59 = vpop.f32.mrb[56].mxu1 }
0x16ed   : > { %v3871_v12 = vpop.f32.mrb[57].mxu1  ;;  %v3880_v51 = vadd.f32 %v5144_v59, %v4727_v40 }
0x16ee   : > { %v3872_v50 = vadd.f32 %v4727_v40, %v3871_v12  ;;  %v5145_v26 = vpop.f32.mrb[58].mxu1 }
0x16ef   : > { %v3874_v24 = vpop.f32.mrb[59].mxu1  ;;  %v7009_v11 = vadd.f32 %v3880_v51, %v6496_v7  ;;  %v3883_v47 = vadd.f32 %v5145_v26, %v4727_v40 }
0x16f0   : > { %v7006_v37 = vadd.f32 %v3872_v50, %v6475_v46  ;;  %v3875_v30 = vadd.f32 %v4727_v40, %v3874_v24 }
0x16f1   : > { %v7019_v46 = vadd.f32 %v3883_v47, %v6483_v48  ;;  %v3920_v57 = vsel %vm631_vm0, %v7009_v11, 0.0 }
0x16f2   : > { %v7012_v38 = vadd.f32 %v3875_v30, %v6478_v32  ;;  %v3914_v58 = vsel %vm631_vm0, %v7006_v37, 0.0 }
0x16f3   : > { %3915 = vadd.xlane.f32.xlu0 %v3914_v58  ;;  %v3923_v48 = vsel %vm631_vm0, %v7019_v46, 0.0  ;;  %v5271_v58 = vld [vmem:[%s7318_s14 + $0x10] sm:$0xff]  }
0x16f4   : > { %v5148_v52 = vpop.f32.mrb[60].mxu1  ;;  %v3917_v18 = vsel %vm631_vm0, %v7012_v38, 0.0  ;;  %5150 = vmatprep.subr.bf16.mxu0 %v5271_v58 }
0x16f5   : > { %3918 = vadd.xlane.f32.xlu1 %v3917_v18  ;;  %v3887_v0 = vpop.f32.mrb[61].mxu1  ;;  %v3896_v35 = vadd.f32 %v5148_v52, %v4727_v40  ;;  %v5272_v52 = vld [vmem:[%s7318_s14 + $0x18] sm:$0xff]   ;;  %5151 = vmatpush3.bf16.msra.mxu0 %v5271_v58 }
0x16f6   : > { %v3888_v34 = vadd.f32 %v4727_v40, %v3887_v0  ;;  %v5149_v7 = vpop.f32.mrb[62].mxu1  ;;  %5152 = vmatprep.subr.bf16.mxu0 %v5272_v52 }
0x16f7   : > { %3921 = vadd.xlane.f32.xlu0 %v3920_v57  ;;  %v3890_v32 = vpop.f32.mrb[63].mxu1  ;;  %v3899_v27 = vadd.f32 %v5149_v7, %v4727_v40  ;;  %v7037_v2 = vadd.f32 %v3896_v35, %v6508_v29 }
0x16f8   : > { %v3891_v53 = vadd.f32 %v4727_v40, %v3890_v32  ;;  %v7024_v15 = vadd.f32 %v3888_v34, %v6503_v9 }
0x16f9   : > { %v7032_v8 = vadd.f32 %v3899_v27, %v6490_v23  ;;  %v3932_v31 = vsel %vm631_vm0, %v7037_v2, 0.0  ;;  %5153 = vmatpush3.bf16.msra.mxu0 %v5272_v52 }
0x16fa   : > { %v7027_v62 = vadd.f32 %v3891_v53, %v6493_v4  ;;  %v3926_v9 = vsel %vm631_vm0, %v7024_v15, 0.0 }
0x16fb   : > { %3924 = vadd.xlane.f32.xlu0 %v3923_v48  ;;  %v3935_v4 = vsel %vm631_vm0, %v7032_v8, 0.0 }
0x16fc   : > { %v3929_v14 = vsel %vm631_vm0, %v7027_v62, 0.0 }
0x16fd   : > { %3930 = vadd.xlane.f32.xlu1 %v3929_v14 }
0x16ff   : > { %3927 = vadd.xlane.f32.xlu0 %v3926_v9 }
0x1701   : > { %3936 = vadd.xlane.f32.xlu1 %v3935_v4 }
0x1703   : > { %3933 = vadd.xlane.f32.xlu0 %v3932_v31 }
0x1780   : > { %v3916_v23 = vpop.xlane.xlu0 %3915 }
0x1781   : > { %v3938_v10 = vmul.f32 0.03125, %v3916_v23 }
0x1782   : > { %v3919_v1 = vpop.xlane.xlu1 %3918 }
0x1783   : > { %v7046_v33 = vsub.f32 %v7006_v37, %v3938_v10  ;;  %v3939_v29 = vmul.f32 0.03125, %v3919_v1 }
0x1784   : > { %v3922_v17 = vpop.xlane.xlu0 %3921 }
0x1785   : > { %v7049_v13 = vsub.f32 %v7012_v38, %v3939_v29  ;;  %v3940_v55 = vmul.f32 0.03125, %v3922_v17  ;;  %v3954_v3 = vmul.f32 %v7046_v33, %v7046_v33  ;;  %v4736_v29 = vld [vmem:[%s7316_s12 + $0x1] ss:$0 sm:$0xff] }
0x1787   : > { %v7054_v41 = vsub.f32 %v7009_v11, %v3940_v55  ;;  %v3962_v21 = vsel %vm631_vm0, %v3954_v3, 0.0  ;;  %v3955_v6 = vmul.f32 %v7049_v13, %v7049_v13 }
0x1788   : > { %v3925_v36 = vpop.xlane.xlu0 %3924  ;;  %3963 = vadd.xlane.f32.xlu0 %v3962_v21 }
0x1789   : > { %v3941_v28 = vmul.f32 0.03125, %v3925_v36  ;;  %v3965_v25 = vsel %vm631_vm0, %v3955_v6, 0.0  ;;  %v3956_v63 = vmul.f32 %v7054_v41, %v7054_v41 }
0x178a   : > { %3966 = vadd.xlane.f32.xlu1 %v3965_v25  ;;  %v3931_v44 = vpop.xlane.xlu1 %3930 }
0x178b   : > { %v7063_v42 = vsub.f32 %v7019_v46, %v3941_v28  ;;  %v3943_v5 = vmul.f32 0.03125, %v3931_v44  ;;  %v3968_v61 = vsel %vm631_vm0, %v3956_v63, 0.0 }
0x178c   : > { %3969 = vadd.xlane.f32.xlu0 %v3968_v61  ;;  %v3928_v16 = vpop.xlane.xlu0 %3927  ;;  %v4737_v61 = vld [vmem:[%s7317_s13 + $0x1] ss:$0 sm:$0xff] }
0x178d   : > { %v7067_v20 = vsub.f32 %v7027_v62, %v3943_v5  ;;  %v3942_v56 = vmul.f32 0.03125, %v3928_v16  ;;  %v3957_v39 = vmul.f32 %v7063_v42, %v7063_v42 }
0x178e   : > { %v3937_v43 = vpop.xlane.xlu1 %3936 }
0x178f   : > { %v7072_v19 = vsub.f32 %v7024_v15, %v3942_v56  ;;  %v3945_v60 = vmul.f32 0.03125, %v3937_v43  ;;  %v3971_v49 = vsel %vm631_vm0, %v3957_v39, 0.0  ;;  %v3959_v22 = vmul.f32 %v7067_v20, %v7067_v20 }
0x1790   : > { %3972 = vadd.xlane.f32.xlu1 %v3971_v49  ;;  %v3934_v45 = vpop.xlane.xlu0 %3933 }
0x1791   : > { %v7078_v54 = vsub.f32 %v7032_v8, %v3945_v60  ;;  %v3944_v40 = vmul.f32 0.03125, %v3934_v45  ;;  %v3958_v59 = vmul.f32 %v7072_v19, %v7072_v19  ;;  %v3977_v51 = vsel %vm631_vm0, %v3959_v22, 0.0 }
0x1793   : > { %v7083_v12 = vsub.f32 %v7037_v2, %v3944_v40  ;;  %v3974_v50 = vsel %vm631_vm0, %v3958_v59, 0.0  ;;  %v3961_v26 = vmul.f32 %v7078_v54, %v7078_v54 }
0x1794   : > { %3978 = vadd.xlane.f32.xlu1 %v3977_v51  ;;  %3975 = vadd.xlane.f32.xlu0 %v3974_v50 }
0x1795   : > { %v3960_v24 = vmul.f32 %v7083_v12, %v7083_v12  ;;  %v3983_v30 = vsel %vm631_vm0, %v3961_v26, 0.0 }
0x1797   : > { %v3980_v47 = vsel %vm631_vm0, %v3960_v24, 0.0 }
0x1798   : > { %3984 = vadd.xlane.f32.xlu1 %v3983_v30  ;;  %3981 = vadd.xlane.f32.xlu0 %v3980_v47 }
0x1815   : > { %v3964_v18 = vpop.xlane.xlu0 %3963 }
0x1816   : > { %v3986_v0 = vmul.f32 0.03125, %v3964_v18 }
0x1817   : > { %v3967_v34 = vpop.xlane.xlu1 %3966 }
0x1818   : > { %v3994_v7 = vadd.f32 1e-05, %v3986_v0  ;;  %v3987_v57 = vmul.f32 0.03125, %v3967_v34 }
0x1819   : > { %v3970_v32 = vpop.xlane.xlu0 %3969 }
0x181a   : > { %5489 = vrsqrt.f32 %v3994_v7  ;;  %v3995_v27 = vadd.f32 1e-05, %v3987_v57  ;;  %v3988_v53 = vmul.f32 0.03125, %v3970_v32 }
0x181c   : > { %5491 = vrsqrt.f32 %v3995_v27  ;;  %v3996_v35 = vadd.f32 1e-05, %v3988_v53 }
0x181d   : > { %v3973_v48 = vpop.xlane.xlu1 %3972 }
0x181e   : > { %5493 = vrsqrt.f32 %v3996_v35  ;;  %v3989_v14 = vmul.f32 0.03125, %v3973_v48  ;;  %v5275_v35 = vld [vmem:[%s7320_s16 + $0x50] sm:$0xff]   ;;  %v5276_v48 = vld [vmem:[%s7320_s16 + $0x58] sm:$0xff]  }
0x1820   : > { %v3997_v9 = vadd.f32 1e-05, %v3989_v14  ;;  %v5277_v14 = vld [vmem:[%s7320_s16 + $0x60] sm:$0xff]  }
0x1821   : > { %v3979_v4 = vpop.xlane.xlu1 %3978  ;;  %v3976_v31 = vpop.xlane.xlu0 %3975 }
0x1822   : > { %5495 = vrsqrt.f32 %v3997_v9  ;;  %v3991_v23 = vmul.f32 0.03125, %v3979_v4  ;;  %v3990_v10 = vmul.f32 0.03125, %v3976_v31  ;;  %v5278_v9 = vld [vmem:[%s7320_s16 + $0x68] sm:$0xff]   ;;  %v5279_v4 = vld [vmem:[%s7320_s16 + $0x70] sm:$0xff]   ;;  %v5280_v31 = vld [vmem:[%s7320_s16 + $0x78] sm:$0xff]  }
0x1824   : > { %v5490_v1 = vpop.eup %5489  ;;  %v3999_v17 = vadd.f32 1e-05, %v3991_v23  ;;  %v3998_v55 = vadd.f32 1e-05, %v3990_v10  ;;  %v4743_v23 = vld [vmem:[%s7319_s15 + $0x1] ss:$0 sm:$0xff] }
0x1825   : > { %v4010_v3 = vmul.f32 %v5490_v1, %v7046_v33  ;;  %v3985_v21 = vpop.xlane.xlu1 %3984  ;;  %v3982_v6 = vpop.xlane.xlu0 %3981 }
0x1826   : > { %v5492_v36 = vpop.eup %5491  ;;  %5497 = vrsqrt.f32 %v3999_v17  ;;  %v3993_v28 = vmul.f32 0.03125, %v3985_v21  ;;  %v3992_v25 = vmul.f32 0.03125, %v3982_v6 }
0x1827   : > { %v4011_v63 = vmul.f32 %v5492_v36, %v7049_v13  ;;  %5499 = vrsqrt.f32 %v3998_v55  ;;  %v4024_v44 = vmul.f32 %v4736_v29, %v4010_v3 }
0x1828   : > { %v5494_v5 = vpop.eup %5493  ;;  %v4001_v16 = vadd.f32 1e-05, %v3993_v28  ;;  %v4000_v56 = vadd.f32 1e-05, %v3992_v25 }
0x1829   : > { %v4012_v39 = vmul.f32 %v5494_v5, %v7054_v41  ;;  %v4025_v33 = vmul.f32 %v4736_v29, %v4011_v63  ;;  %v4038_v43 = vadd.f32 %v4737_v61, %v4024_v44 }
0x182a   : > { %5501 = vrsqrt.f32 %v4001_v16 }
0x182b   : > { %5503 = vrsqrt.f32 %v4000_v56  ;;  %v4039_v60 = vadd.f32 %v4737_v61, %v4025_v33  ;;  %v4026_v22 = vmul.f32 %v4736_v29, %v4012_v39 }
0x182c   : > { %v5496_v49 = vpop.eup %5495 }
0x182d   : > { %v4013_v13 = vmul.f32 %v5496_v49, %v7063_v42  ;;  %v4051_v45 = vpack.c.bf16 %v4039_v60, %v4038_v43  ;;  %v4040_v50 = vadd.f32 %v4737_v61, %v4026_v22 }
0x182f   : > { %v4027_v40 = vmul.f32 %v4736_v29, %v4013_v13  ;;  %5154 = vmatprep.mubr.msk.bf16.mxu0 %vm631_vm0, %v4051_v45 }
0x1830   : > { %v5498_v59 = vpop.eup %5497 }
0x1831   : > { %v5500_v51 = vpop.eup %5499  ;;  %v4041_v26 = vadd.f32 %v4737_v61, %v4027_v40  ;;  %v4015_v24 = vmul.f32 %v5498_v59, %v7067_v20 }
0x1832   : > { %v4014_v41 = vmul.f32 %v5500_v51, %v7072_v19 }
0x1833   : > { %v4052_v30 = vpack.c.bf16 %v4041_v26, %v4040_v50  ;;  %v4029_v47 = vmul.f32 %v4736_v29, %v4015_v24 }
0x1834   : > { %v5502_v58 = vpop.eup %5501  ;;  %v4028_v52 = vmul.f32 %v4736_v29, %v4014_v41 }
0x1835   : > { %v5504_v18 = vpop.eup %5503  ;;  %v4017_v0 = vmul.f32 %v5502_v58, %v7078_v54  ;;  %5155 = vmatmul.mubr.msk.bf16.vlgmr.msra.gmra.mrb[72].mxu0 %vm631_vm0, %v4052_v30  ;;  %v4043_v42 = vadd.f32 %v4737_v61, %v4029_v47  ;;  %v5273_v54 = vld [vmem:[%s7320_s16 + $0x40] sm:$0xff]  }
0x1836   : > { %v4016_v34 = vmul.f32 %v5504_v18, %v7083_v12  ;;  %v4042_v7 = vadd.f32 %v4737_v61, %v4028_v52  ;;  %5162 = vmatprep.subr.bf16.mxu1 %v5273_v54  ;;  %v5274_v12 = vld [vmem:[%s7320_s16 + $0x48] sm:$0xff]  }
0x1837   : > { %v4031_v57 = vmul.f32 %v4736_v29, %v4017_v0  ;;  %5163 = vmatpush3.bf16.msra.mxu1 %v5273_v54 }
0x1838   : > { %v4053_v32 = vpack.c.bf16 %v4043_v42, %v4042_v7  ;;  %v4030_v27 = vmul.f32 %v4736_v29, %v4016_v34  ;;  %5164 = vmatprep.subr.bf16.mxu1 %v5274_v12 }
0x1839   : > { %v4045_v53 = vadd.f32 %v4737_v61, %v4031_v57 }
0x183a   : > { %5158 = vmatprep.mubr.msk.bf16.mxu0 %vm631_vm0, %v4053_v32  ;;  %v4044_v20 = vadd.f32 %v4737_v61, %v4030_v27 }
0x183b   : > { %5165 = vmatpush3.bf16.msra.mxu1 %v5274_v12 }
0x183c   : > { %v4054_v19 = vpack.c.bf16 %v4045_v53, %v4044_v20  ;;  %5166 = vmatprep.subr.bf16.mxu1 %v5275_v35 }
0x183e   : > { %5159 = vmatmul.mubr.msk.bf16.gmra.mrb[76].mxu0 %vm631_vm0, %v4054_v19 }
0x183f   : > { %5167 = vmatpush3.bf16.msra.mxu1 %v5275_v35 }
0x1840   : > { %5168 = vmatprep.subr.bf16.mxu1 %v5276_v48 }
0x1843   : > { %5169 = vmatpush3.bf16.msra.mxu1 %v5276_v48 }
0x1844   : > { %5170 = vmatprep.subr.bf16.mxu1 %v5277_v14 }
0x1847   : > { %5171 = vmatpush3.bf16.msra.mxu1 %v5277_v14 }
0x1848   : > { %5172 = vmatprep.subr.bf16.mxu1 %v5278_v9 }
0x184b   : > { %5173 = vmatpush3.bf16.msra.mxu1 %v5278_v9 }
0x184c   : > { %5174 = vmatprep.subr.bf16.mxu1 %v5279_v4 }
0x184f   : > { %5175 = vmatpush3.bf16.msra.mxu1 %v5279_v4 }
0x1850   : > { %5176 = vmatprep.subr.bf16.mxu1 %v5280_v31 }
0x1853   : > { %5177 = vmatpush3.bf16.msra.mxu1 %v5280_v31 }
0x1908   : > { %v5156_v10 = vpop.f32.mrb[72].mxu0 }
0x1909   : > { %v4130_v1 = vadd.f32 %v5156_v10, %v4743_v23  ;;  %v4121_v29 = vpop.f32.mrb[73].mxu0 }
0x190a   : > { %v7144_v17 = vadd.f32 %v4743_v23, %v4121_v29  ;;  %v5157_v55 = vpop.f32.mrb[74].mxu0 }
0x190b   : > { %v7146_v3 = vmul.f32 0.70710677, %v4130_v1  ;;  %v7148_v21 = vadd.f32 %v5157_v55, %v4743_v23  ;;  %v4124_v6 = vpop.f32.mrb[75].mxu0  ;;  %v7188_v53 = vmul.f32 0.5, %v4130_v1 }
0x190c   : > { %v7151_v36 = vmul.f32 0.70710677, %v7144_v17  ;;  %v7153_v28 = vadd.f32 %v4743_v23, %v4124_v6 }
0x190d   : > { %v4170_v25 = vand.u32 2147483647, %v7146_v3  ;;  %v7157_v63 = vmul.f32 0.70710677, %v7148_v21  ;;  %vm4330_vm3 = vcmp.ge.f32.partialorder %v7146_v3, 0.0 }
0x190e   : > { %v4168_v44 = vand.u32 2147483647, %v7151_v36  ;;  %v7161_v5 = vmul.f32 0.70710677, %v7153_v28  ;;  %vm4328_vm5 = vcmp.ge.f32.partialorder %v7151_v36, 0.0 }
0x190f   : > { %v4178_v61 = vmul.f32 0.3275911, %v4170_v25  ;;  %v4171_v16 = vand.u32 2147483647, %v7157_v63  ;;  %v4282_v47 = vsub.f32 0.0, %v4170_v25  ;;  %vm4331_vm6 = vcmp.ge.f32.partialorder %v7157_v63, 0.0 }
0x1910   : > { %v4176_v56 = vmul.f32 0.3275911, %v4168_v44  ;;  %v4169_v39 = vand.u32 2147483647, %v7161_v5  ;;  %v4280_v18 = vsub.f32 0.0, %v4168_v44  ;;  %vm4329_vm7 = vcmp.ge.f32.partialorder %v7161_v5, 0.0 }
0x1911   : > { %v4186_v33 = vadd.f32 1.0, %v4178_v61  ;;  %v4179_v43 = vmul.f32 0.3275911, %v4171_v16  ;;  %v5160_v60 = vpop.f32.mrb[76].mxu0  ;;  %v4283_v42 = vsub.f32 0.0, %v4171_v16  ;;  %v4290_v20 = vmul.f32 %v4282_v47, %v4170_v25 }
0x1912   : > { %v4184_v49 = vadd.f32 1.0, %v4176_v56  ;;  %v4177_v22 = vmul.f32 0.3275911, %v4169_v39  ;;  %v4137_v13 = vpop.f32.mrb[77].mxu0  ;;  %v7165_v50 = vadd.f32 %v5160_v60, %v4743_v23  ;;  %v4281_v34 = vsub.f32 0.0, %v4169_v39 }
0x1913   : > { %5505 = vrcp.f32 %v4186_v33  ;;  %v4187_v45 = vadd.f32 1.0, %v4179_v43  ;;  %v5161_v40 = vpop.f32.mrb[78].mxu0  ;;  %v7167_v26 = vadd.f32 %v4743_v23, %v4137_v13  ;;  %v4288_v35 = vmul.f32 %v4280_v18, %v4168_v44 }
0x1914   : > { %5507 = vrcp.f32 %v4184_v49  ;;  %v4140_v59 = vpop.f32.mrb[79].mxu0  ;;  %v4185_v51 = vadd.f32 1.0, %v4177_v22  ;;  %v7169_v24 = vadd.f32 %v5161_v40, %v4743_v23  ;;  %v7172_v41 = vmul.f32 0.70710677, %v7165_v50 }
0x1915   : > { %5509 = vrcp.f32 %v4187_v45  ;;  %v7174_v30 = vadd.f32 %v4743_v23, %v4140_v59  ;;  %v7177_v58 = vmul.f32 0.70710677, %v7167_v26  ;;  %v4291_v23 = vmul.f32 %v4283_v42, %v4171_v16 }
0x1916   : > { %v7180_v52 = vmul.f32 0.70710677, %v7169_v24  ;;  %5511 = vrcp.f32 %v4185_v51  ;;  %v4174_v0 = vand.u32 2147483647, %v7172_v41  ;;  %v4289_v10 = vmul.f32 %v4281_v34, %v4169_v39 }
0x1917   : > { %v4172_v7 = vand.u32 2147483647, %v7177_v58  ;;  %v7186_v27 = vmul.f32 0.70710677, %v7174_v30  ;;  %v4300_v61 = vmul.f32 1.442695, %v4290_v20 }
0x1918   : > { %v4175_v57 = vand.u32 2147483647, %v7180_v52  ;;  %v4182_v32 = vmul.f32 0.3275911, %v4174_v0  ;;  %v4286_v14 = vsub.f32 0.0, %v4174_v0  ;;  %vm4334_vm8 = vcmp.ge.f32.partialorder %v7172_v41, 0.0 }
0x1919   : > { %v4180_v19 = vmul.f32 0.3275911, %v4172_v7  ;;  %v4173_v9 = vand.u32 2147483647, %v7186_v27  ;;  %v4284_v55 = vsub.f32 0.0, %v4172_v7  ;;  %vm4335_vm9 = vcmp.ge.f32.partialorder %v7180_v52, 0.0 }
0x191a   : > { %v4183_v54 = vmul.f32 0.3275911, %v4175_v57  ;;  %v4190_v48 = vadd.f32 1.0, %v4182_v32  ;;  %v4296_v43 = vmul.f32 1.442695, %v4288_v35  ;;  %v4294_v60 = vmul.f32 %v4286_v14, %v4174_v0 }
0x191b   : > { %v4188_v29 = vadd.f32 1.0, %v4180_v19  ;;  %v4181_v44 = vmul.f32 0.3275911, %v4173_v9  ;;  %v4287_v49 = vsub.f32 0.0, %v4175_v57  ;;  %v4302_v39 = vmul.f32 1.442695, %v4291_v23 }
0x191c   : > { %5513 = vrcp.f32 %v4190_v48  ;;  %v4191_v6 = vadd.f32 1.0, %v4183_v54  ;;  %v4298_v59 = vmul.f32 1.442695, %v4289_v10  ;;  %v4292_v51 = vmul.f32 %v4284_v55, %v4172_v7 }
0x191d   : > { %v7190_v12 = vpop.eup %5505  ;;  %5515 = vrcp.f32 %v4188_v29  ;;  %v4189_v13 = vadd.f32 1.0, %v4181_v44  ;;  %v4308_v34 = vmul.f32 1.442695, %v4294_v60  ;;  %v4295_v32 = vmul.f32 %v4287_v49, %v4175_v57 }
0x191e   : > { %v7193_v4 = vpop.eup %5507  ;;  %v4210_v31 = vmul.f32 1.0614054, %v7190_v12  ;;  %5517 = vrcp.f32 %v4191_v6  ;;  %v4304_v7 = vmul.f32 1.442695, %v4292_v51  ;;  %v4285_v48 = vsub.f32 0.0, %v4173_v9 }
0x191f   : > { %v4208_v1 = vmul.f32 1.0614054, %v7193_v4  ;;  %v7197_v56 = vpop.eup %5509  ;;  %5519 = vpow2.f32 %v4300_v61  ;;  %v7212_v57 = vmul.f32 0.5, %v7144_v17  ;;  %vm4332_vm10 = vcmp.ge.f32.partialorder %v7177_v58, 0.0 }
0x1920   : > { %v4218_v25 = vadd.f32 -1.4531521, %v4210_v31  ;;  %v4211_v16 = vmul.f32 1.0614054, %v7197_v56  ;;  %v7201_v45 = vpop.eup %5511  ;;  %5521 = vrcp.f32 %v4189_v13  ;;  %v4293_v60 = vmul.f32 %v4285_v48, %v4173_v9 }
0x1921   : > { %v4216_v33 = vadd.f32 -1.4531521, %v4208_v1  ;;  %v4209_v42 = vmul.f32 1.0614054, %v7201_v45  ;;  %5523 = vpow2.f32 %v4296_v43  ;;  %v4310_v1 = vmul.f32 1.442695, %v4295_v32 }
0x1922   : > { %v4226_v22 = vmul.f32 %v7190_v12, %v4218_v25  ;;  %v4219_v18 = vadd.f32 -1.4531521, %v4211_v16  ;;  %5525 = vpow2.f32 %v4302_v39  ;;  %vm4333_vm11 = vcmp.ge.f32.partialorder %v7186_v27, 0.0 }
0x1923   : > { %v4224_v40 = vmul.f32 %v7193_v4, %v4216_v33  ;;  %v4217_v54 = vadd.f32 -1.4531521, %v4209_v42  ;;  %5527 = vpow2.f32 %v4298_v59 }
0x1924   : > { %v4234_v47 = vadd.f32 1.4214138, %v4226_v22  ;;  %v4227_v19 = vmul.f32 %v7197_v56, %v4219_v18  ;;  %5529 = vpow2.f32 %v4308_v34 }
0x1925   : > { %v4232_v0 = vadd.f32 1.4214138, %v4224_v40  ;;  %v4225_v23 = vmul.f32 %v7201_v45, %v4217_v54  ;;  %5531 = vpow2.f32 %v4304_v7  ;;  %v7226_v40 = vmul.f32 0.5, %v7148_v21 }
0x1926   : > { %v4242_v20 = vmul.f32 %v7190_v12, %v4234_v47  ;;  %v4235_v31 = vadd.f32 1.4214138, %v4227_v19  ;;  %v7209_v10 = vpop.eup %5513  ;;  %5533 = vpow2.f32 %v4310_v1 }
0x1927   : > { %v4240_v35 = vmul.f32 %v7193_v4, %v4232_v0  ;;  %v7214_v55 = vpop.eup %5515  ;;  %v4233_v61 = vadd.f32 1.4214138, %v4225_v23  ;;  %v4214_v44 = vmul.f32 1.0614054, %v7209_v10 }
0x1928   : > { %v4250_v14 = vadd.f32 -0.28449672, %v4242_v20  ;;  %v4243_v25 = vmul.f32 %v7197_v56, %v4235_v31  ;;  %v4212_v43 = vmul.f32 1.0614054, %v7214_v55  ;;  %v7222_v39 = vpop.eup %5517  ;;  %v4306_v20 = vmul.f32 1.442695, %v4293_v60 }
0x1929   : > { %v4248_v29 = vadd.f32 -0.28449672, %v4240_v35  ;;  %v4241_v22 = vmul.f32 %v7201_v45, %v4233_v61  ;;  %v4222_v16 = vadd.f32 -1.4531521, %v4214_v44  ;;  %v5520_v51 = vpop.eup %5519  ;;  %v4215_v21 = vmul.f32 1.0614054, %v7222_v39 }
0x192a   : > { %v4258_v6 = vmul.f32 %v7190_v12, %v4250_v14  ;;  %v4251_v49 = vadd.f32 -0.28449672, %v4243_v25  ;;  %v4220_v59 = vadd.f32 -1.4531521, %v4212_v43  ;;  %v7232_v0 = vpop.eup %5521  ;;  %5535 = vpow2.f32 %v4306_v20 }
0x192b   : > { %v4256_v33 = vmul.f32 %v7193_v4, %v4248_v29  ;;  %v4249_v18 = vadd.f32 -0.28449672, %v4241_v22  ;;  %v4230_v42 = vmul.f32 %v7209_v10, %v4222_v16  ;;  %v5524_v19 = vpop.eup %5523  ;;  %v4223_v23 = vadd.f32 -1.4531521, %v4215_v21 }
0x192c   : > { %v4266_v17 = vadd.f32 0.2548296, %v4258_v6  ;;  %v4259_v9 = vmul.f32 %v7197_v56, %v4251_v49  ;;  %v4228_v32 = vmul.f32 %v7214_v55, %v4220_v59  ;;  %v5526_v48 = vpop.eup %5525  ;;  %v4213_v29 = vmul.f32 1.0614054, %v7232_v0 }
0x192d   : > { %v4264_v13 = vadd.f32 0.2548296, %v4256_v33  ;;  %v4238_v7 = vadd.f32 1.4214138, %v4230_v42  ;;  %v4231_v60 = vmul.f32 %v7222_v39, %v4223_v23 }
0x192e   : > { %v4274_v47 = vmul.f32 %v7190_v12, %v4266_v17  ;;  %v4267_v35 = vadd.f32 0.2548296, %v4259_v9  ;;  %v4257_v12 = vmul.f32 %v7201_v45, %v4249_v18  ;;  %v4236_v31 = vadd.f32 1.4214138, %v4228_v32 }
0x192f   : > { %v4272_v34 = vmul.f32 %v7193_v4, %v4264_v13  ;;  %v5528_v4 = vpop.eup %5527  ;;  %v4246_v61 = vmul.f32 %v7209_v10, %v4238_v7  ;;  %v4221_v17 = vadd.f32 -1.4531521, %v4213_v29  ;;  %v4239_v9 = vadd.f32 1.4214138, %v4231_v60 }
0x1930   : > { %v4314_v54 = vmul.f32 %v5520_v51, %v4274_v47  ;;  %v4275_v6 = vmul.f32 %v7197_v56, %v4267_v35  ;;  %v4265_v25 = vadd.f32 0.2548296, %v4257_v12  ;;  %v5530_v44 = vpop.eup %5529  ;;  %v4244_v43 = vmul.f32 %v7214_v55, %v4236_v31 }
0x1931   : > { %v4312_v14 = vmul.f32 %v5524_v19, %v4272_v34  ;;  %v4254_v13 = vadd.f32 -0.28449672, %v4246_v61  ;;  %v5532_v59 = vpop.eup %5531  ;;  %v4229_v56 = vmul.f32 %v7232_v0, %v4221_v17 }
0x1932   : > { %v4322_v1 = vsub.f32 1.0, %v4314_v54  ;;  %v4315_v22 = vmul.f32 %v5526_v48, %v4275_v6  ;;  %v4273_v16 = vmul.f32 %v7201_v45, %v4265_v25  ;;  %v4252_v47 = vadd.f32 -0.28449672, %v4244_v43  ;;  %v5534_v21 = vpop.eup %5533 }
0x1933   : > { %v4320_v33 = vsub.f32 1.0, %v4312_v14  ;;  %v4262_v32 = vmul.f32 %v7209_v10, %v4254_v13  ;;  %v4247_v54 = vmul.f32 %v7222_v39, %v4239_v9  ;;  %v4237_v31 = vadd.f32 1.4214138, %v4229_v56 }
0x1934   : > { %v4338_v49 = vsub.f32 0.0, %v4322_v1  ;;  %v4323_v42 = vsub.f32 1.0, %v4315_v22  ;;  %v4313_v34 = vmul.f32 %v5528_v4, %v4273_v16  ;;  %v4260_v45 = vmul.f32 %v7214_v55, %v4252_v47 }
0x1935   : > { %v4336_v51 = vsub.f32 0.0, %v4320_v33  ;;  %v4270_v48 = vadd.f32 0.2548296, %v4262_v32  ;;  %v4255_v14 = vadd.f32 -0.28449672, %v4247_v54  ;;  %v4245_v61 = vmul.f32 %v7232_v0, %v4237_v31 }
0x1936   : > { %v4346_v18 = vsel %vm4330_vm3, %v4322_v1, %v4338_v49  ;;  %v4339_v12 = vsub.f32 0.0, %v4323_v42  ;;  %v4321_v7 = vsub.f32 1.0, %v4313_v34  ;;  %v4268_v3 = vadd.f32 0.2548296, %v4260_v45 }
0x1937   : > { %v4344_v19 = vsel %vm4328_vm5, %v4320_v33, %v4336_v51  ;;  %v4354_v35 = vadd.f32 1.0, %v4346_v18  ;;  %v4278_v4 = vmul.f32 %v7209_v10, %v4270_v48  ;;  %v4263_v25 = vmul.f32 %v7222_v39, %v4255_v14 }
0x1938   : > { %v4352_v23 = vadd.f32 1.0, %v4344_v19  ;;  %v4347_v29 = vsel %vm4331_vm6, %v4323_v42, %v4339_v12  ;;  %v4337_v36 = vsub.f32 0.0, %v4321_v7  ;;  %v4276_v6 = vmul.f32 %v7214_v55, %v4268_v3 }
0x1939   : > { %v4355_v1 = vadd.f32 1.0, %v4347_v29  ;;  %v4362_v33 = vmul.f32 %v4354_v35, %v7188_v53  ;;  %v4153_v43 = vmul.f32 0.5, %v7153_v28  ;;  %v4318_v60 = vmul.f32 %v5530_v44, %v4278_v4  ;;  %v5536_v44 = vpop.eup %5535 }
0x193a   : > { %v4345_v20 = vsel %vm4329_vm7, %v4321_v7, %v4337_v36  ;;  %v4316_v49 = vmul.f32 %v5532_v59, %v4276_v6  ;;  %v4271_v10 = vadd.f32 0.2548296, %v4263_v25  ;;  %v4253_v16 = vadd.f32 -0.28449672, %v4245_v61 }
0x193b   : > { %v4363_v63 = vmul.f32 %v4355_v1, %v7226_v40  ;;  %v4353_v17 = vadd.f32 1.0, %v4345_v20  ;;  %v4326_v22 = vsub.f32 1.0, %v4318_v60  ;;  %v4360_v55 = vmul.f32 %v4352_v23, %v7212_v57 }
0x193c   : > { %v4279_v47 = vmul.f32 %v7222_v39, %v4271_v10  ;;  %v4324_v9 = vsub.f32 1.0, %v4316_v49  ;;  %v4261_v28 = vmul.f32 %v7232_v0, %v4253_v16  ;;  %v4158_v19 = vmul.f32 0.5, %v7165_v50 }
0x193d   : > { %v4386_v13 = vpack.c.bf16 %v4363_v63, %v4362_v33  ;;  %v4361_v51 = vmul.f32 %v4353_v17, %v4153_v43  ;;  %v4342_v53 = vsub.f32 0.0, %v4326_v22  ;;  %v4159_v45 = vmul.f32 0.5, %v7169_v24  ;;  %v4767_v24 = vld [vmem:[%s7321_s17 + $0x1] ss:$0 sm:$0xff] }
0x193e   : > { %v4319_v5 = vmul.f32 %v5534_v21, %v4279_v47  ;;  %v4269_v40 = vadd.f32 0.2548296, %v4261_v28  ;;  %v4340_v42 = vsub.f32 0.0, %v4324_v9  ;;  %v4156_v14 = vmul.f32 0.5, %v7167_v26 }
0x193f   : > { %v4385_v56 = vpack.c.bf16 %v4361_v51, %v4360_v55  ;;  %v4350_v59 = vsel %vm4334_vm8, %v4326_v22, %v4342_v53  ;;  %v4157_v50 = vmul.f32 0.5, %v7174_v30 }
0x1940   : > { %v4327_v18 = vsub.f32 1.0, %v4319_v5  ;;  %v4277_v57 = vmul.f32 %v7232_v0, %v4269_v40  ;;  %v4358_v32 = vadd.f32 1.0, %v4350_v59  ;;  %v4348_v41 = vsel %vm4332_vm10, %v4324_v9, %v4340_v42 }
0x1941   : > { %5178 = vmatprep.mubr.bf16.mxu1 %v4385_v56  ;;  %v4356_v0 = vadd.f32 1.0, %v4348_v41 }
0x1942   : > { %5179 = vmatmul.mubr.bf16.vlgmr.msra.gmra.mrb[64].mxu1 %v4386_v13  ;;  %v4343_v34 = vsub.f32 0.0, %v4327_v18  ;;  %v4317_v39 = vmul.f32 %v5536_v44, %v4277_v57  ;;  %v4366_v12 = vmul.f32 %v4358_v32, %v4158_v19 }
0x1943   : > { %v4364_v31 = vmul.f32 %v4356_v0, %v4156_v14 }
0x1944   : > { %v4351_v21 = vsel %vm4335_vm9, %v4327_v18, %v4343_v34  ;;  %v4325_v35 = vsub.f32 1.0, %v4317_v39 }
0x1945   : > { %v4359_v54 = vadd.f32 1.0, %v4351_v21 }
0x1946   : > { %v4341_v48 = vsub.f32 0.0, %v4325_v35 }
0x1947   : > { %v4367_v7 = vmul.f32 %v4359_v54, %v4159_v45 }
0x1948   : > { %v4349_v3 = vsel %vm4333_vm11, %v4325_v35, %v4341_v48 }
0x1949   : > { %v4388_v52 = vpack.c.bf16 %v4367_v7, %v4366_v12  ;;  %v4357_v58 = vadd.f32 1.0, %v4349_v3 }
0x194b   : > { %v4365_v23 = vmul.f32 %v4357_v58, %v4157_v50 }
0x194d   : > { %v4387_v29 = vpack.c.bf16 %v4365_v23, %v4364_v31 }
0x194f   : > { %5182 = vmatprep.mubr.bf16.mxu1 %v4387_v29 }
0x1950   : > { %5183 = vmatmul.mubr.bf16.gmra.mrb[68].mxu1 %v4388_v52 }
0x1a15   : > { %v5180_v36 = vpop.f32.mrb[64].mxu1 }
0x1a16   : > { %v4488_v4 = vadd.f32 %v5180_v36, %v4767_v24  ;;  %v4479_v1 = vpop.f32.mrb[65].mxu1 }
0x1a17   : > { %v4480_v26 = vadd.f32 %v4767_v24, %v4479_v1  ;;  %v5181_v30 = vpop.f32.mrb[66].mxu1 }
0x1a18   : > { %v4512_v27 = vadd.f32 %v4488_v4, %v7009_v11  ;;  %v4491_v6 = vadd.f32 %v5181_v30, %v4767_v24  ;;  %v4482_v25 = vpop.f32.mrb[67].mxu1 }
0x1a19   : > { %v4510_v61 = vadd.f32 %v4480_v26, %v7006_v37  ;;  %v4483_v33 = vadd.f32 %v4767_v24, %v4482_v25 }
0x1a1a   : > { %4520 = vst.msk [vmem:[%s577_s20 + $0x10] sm:$0xff] %vm631_vm0, %v4512_v27  ;;  %v4513_v43 = vadd.f32 %v4491_v6, %v7019_v46 }
0x1a1b   : > { %4518 = vst.msk [vmem:[%s577_s20] sm:$0xff] %vm631_vm0, %v4510_v61  ;;  %v4511_v20 = vadd.f32 %v4483_v33, %v7012_v38 }
0x1a1c   : > { %4521 = vst.msk [vmem:[%s577_s20 + $0x18] sm:$0xff] %vm631_vm0, %v4513_v43 }
0x1a1d   : > { %4519 = vst.msk [vmem:[%s577_s20 + $0x8] sm:$0xff] %vm631_vm0, %v4511_v20 }
0x1a23   : > { %v5184_v60 = vpop.f32.mrb[68].mxu1 }
0x1a24   : > { %v4504_v63 = vadd.f32 %v5184_v60, %v4767_v24  ;;  %v4495_v11 = vpop.f32.mrb[69].mxu1 }
0x1a25   : > { %v4496_v17 = vadd.f32 %v4767_v24, %v4495_v11  ;;  %v5185_v49 = vpop.f32.mrb[70].mxu1 }
0x1a26   : > { %v4516_v37 = vadd.f32 %v4504_v63, %v7037_v2  ;;  %v4507_v10 = vadd.f32 %v5185_v49, %v4767_v24  ;;  %v4498_v22 = vpop.f32.mrb[71].mxu1 }
0x1a27   : > { %v4514_v16 = vadd.f32 %v4496_v17, %v7024_v15  ;;  %v4499_v46 = vadd.f32 %v4767_v24, %v4498_v22 }
0x1a28   : > { %4524 = vst.msk [vmem:[%s577_s20 + $0x30] sm:$0xff] %vm631_vm0, %v4516_v37  ;;  %v4517_v38 = vadd.f32 %v4507_v10, %v7032_v8 }
0x1a29   : > { %4522 = vst.msk [vmem:[%s577_s20 + $0x20] sm:$0xff] %vm631_vm0, %v4514_v16  ;;  %v4515_v55 = vadd.f32 %v4499_v46, %v7027_v62 }
0x1a2a   : > { %4525 = vst.msk [vmem:[%s577_s20 + $0x38] sm:$0xff] %vm631_vm0, %v4517_v38 }
0x1a2b   : > { %4523 = vst.msk [vmem:[%s577_s20 + $0x28] sm:$0xff] %vm631_vm0, %v4515_v55 }
0x1a2c PF: > { %s28_s27 = sadd.s32 1, %s5551_s27  }
0x1a2d   : > { %p25_p4 = scmp.ge.s32.totalorder %s28_s27, 4  }
0x1a2f   :  { %27 = sbr.rel (!%p25_p4) target bundleno = 4 (0x4), region = 139 }

</bundles_post_ra>
